<compile_context>
chip_gen: v7x
topology: tpu7x:2x2x1
jax: 0.10.0
libtpu: 0.0.40
codegen_flags: <defaults>
</compile_context>

<pallas_src>
import numpy as np
import jax
import jax.numpy as jnp
from jax.experimental import pallas as pl
from jax.experimental.pallas import tpu as pltpu


# ----------------------------- host-side prep --------------------------------

def _banded_conv_weight(w_hwio, W):
    """(3,3,Cin,Cout) HWIO filter -> (3, Cin*W, Cout*W) banded matrices so that
    a 3x3 'same' cross-correlation over activations laid out as x[h, ci*W + w]
    (zero-padded only in h) is three matmuls over h-shifted row slabs."""
    _, _, cin, cout = w_hwio.shape
    wi = np.arange(W)[:, None]
    wo = np.arange(W)[None, :]
    masks = np.stack([(wi == wo + kx - 1).astype(np.float32) for kx in range(3)], 0)
    out = []
    for ky in range(3):
        bky = jnp.einsum("kab,kio->iaob", jnp.asarray(masks), w_hwio[ky])
        out.append(bky.reshape(cin * W, cout * W))
    return jnp.stack(out, axis=0)


def _even_col_selector(C, Wprev):
    """(C*Wprev, C*(Wprev//2)) 0/1 matrix selecting even-w columns of the
    previous layer's sparse activation layout into the compact layout.  It is
    folded into the next layer's banded weight on the host."""
    Wn = Wprev // 2
    S = np.zeros((C * Wprev, C * Wn), np.float32)
    for c in range(C):
        for w in range(Wn):
            S[c * Wprev + 2 * w, c * Wn + w] = 1.0
    return jnp.asarray(S)


def _row_pool_placement(H, pack, parity):
    """0/1 matrix (pack*(H//2+2), pack*(H+2)-2) that simultaneously
    (a) selects conv-output rows 2j+parity of every packed image,
    (b) places them at rows 1..H//2 of that image's segment of the next
        row-padded, batch-stacked activation buffer, and
    (c) leaves the per-image padding rows zero."""
    Hn = H // 2
    R_next, M = pack * (Hn + 2), pack * (H + 2) - 2
    P = np.zeros((R_next, M), np.float32)
    for b in range(pack):
        for j in range(Hn):
            P[b * (Hn + 2) + 1 + j, b * (H + 2) + 2 * j + parity] = 1.0
    return jnp.asarray(P)


# ----------------------------- fused kernel ----------------------------------

def _build_kernel(cfgs, pack):
    def kernel(*refs):
        it = iter(refs)
        x_ref = next(it)                                  # (pack*(H0+2), C0p*W0)
        lrefs = []
        for cfg in cfgs:
            w_ref = next(it)                              # (3, K, Cout*W)
            b_ref = next(it)                              # (1, Cout*W)
            sc_ref = next(it) if cfg["bn"] else None
            sh_ref = next(it) if cfg["bn"] else None
            p0_ref = next(it) if cfg["pool"] else None    # (R_next, R-2)
            p1_ref = next(it) if cfg["pool"] else None
            lrefs.append((w_ref, b_ref, sc_ref, sh_ref, p0_ref, p1_ref))
        out_ref = next(it)                                # (pack*Hf, Cf*Wf)
        bufs = list(it)                                   # padded VMEM buffers

        src = x_ref
        buf_i = 0
        for cfg, (w_ref, b_ref, sc_ref, sh_ref, p0_ref, p1_ref) in zip(cfgs, lrefs):
            M = cfg["R"] - 2
            # 3x3 'same' conv == 3 banded matmuls over the h-shifted slabs of
            # the batch-stacked row-padded activation.
            acc = jnp.dot(src[0:M, :], w_ref[0], preferred_element_type=jnp.float32)
            acc = acc + jnp.dot(src[1:M + 1, :], w_ref[1],
                                preferred_element_type=jnp.float32)
            acc = acc + jnp.dot(src[2:M + 2, :], w_ref[2],
                                preferred_element_type=jnp.float32)
            y = jnp.maximum(acc + b_ref[...], 0.0)        # conv bias + ReLU
            if cfg["bn"]:                                 # folded BatchNorm (eval stats)
                y = y * sc_ref[...] + sh_ref[...]

            if cfg["pool"]:
                # MaxPool2x2 rows: one 0/1 placement matmul per parity (also
                # re-inserts the per-image zero pad rows of the next buffer).
                zh = jnp.maximum(
                    jnp.dot(p0_ref[...], y, preferred_element_type=jnp.float32),
                    jnp.dot(p1_ref[...], y, preferred_element_type=jnp.float32))
                # MaxPool2x2 cols: neighbour max in the sparse lane layout
                # (col j <- max(col j, col j+1)).  The wrapped / odd columns are
                # never consumed: the next layer's banded weight only reads
                # even-w columns (selector folded on the host).
                znb = jnp.concatenate([zh[:, 1:], zh[:, :1]], axis=1)
                nxt = bufs[buf_i]
                buf_i += 1
                nxt[...] = jnp.maximum(zh, znb)           # single 128-lane-dense store
                src = nxt
            else:
                # Last layer: unstack each packed image's valid rows.
                H = cfg["H"]
                for b in range(pack):
                    out_ref[b * H:(b + 1) * H, :] = (
                        y[b * (H + 2):b * (H + 2) + H, :].astype(out_ref.dtype))

    return kernel


# ----------------------------- wrapper ----------------------------------------

def forward_pallas(x_nchw, conv_params, *, pack=2, bn_layers=frozenset({1, 3, 5})):
    N, C0, H0, W0 = x_nchw.shape
    assert N % pack == 0, "batch must be divisible by pack"
    G = N // pack
    nl = len(conv_params)

    # Pad input channels so the layer-0 contraction / input DMA is lane dense.
    if W0 <= 128 and 128 % W0 == 0:
        c0p = max(C0, ((C0 * W0 + 127) // 128) * 128 // W0)
    else:
        c0p = C0

    # (rows, C*W) layout, one zero pad row per image top & bottom, `pack`
    # images stacked along the row axis per grid step.
    xp = jnp.pad(x_nchw, ((0, 0), (0, c0p - C0), (0, 0), (0, 0)))
    x2d = jnp.transpose(xp, (0, 2, 1, 3)).reshape(N, H0, c0p * W0)
    x2d = jnp.pad(x2d, ((0, 0), (1, 1), (0, 0)))
    xstk = x2d.reshape(G, pack * (H0 + 2), c0p * W0)

    flat_inputs = [xstk]
    in_specs = [pl.BlockSpec((None, pack * (H0 + 2), c0p * W0), lambda n: (n, 0, 0))]
    scratch_shapes = []
    cfgs = []

    H, W = H0, W0
    prev_sel = None                     # even-column selector to fold into this layer
    for i, (w, b, scale, shift) in enumerate(conv_params):
        Cout = w.shape[-1]
        bn = i in bn_layers
        pool = i < nl - 1               # last layer has no pooling
        CWout = Cout * W
        cfgs.append(dict(H=H, W=W, Cout=Cout, CWout=CWout,
                         R=pack * (H + 2), bn=bn, pool=pool))

        if i == 0 and c0p != C0:        # zero weights for padded input channels
            w = jnp.pad(w, ((0, 0), (0, 0), (0, c0p - C0), (0, 0)))
        B = _banded_conv_weight(w, W)                       # (3, Cin*W, Cout*W)
        if prev_sel is not None:                            # fold even-col selection
            B = jnp.einsum("sc,kco->kso", prev_sel, B)      # (3, CW_prev, Cout*W)
        bias2 = jnp.repeat(b, W).reshape(1, CWout)
        flat_inputs += [B, bias2]
        in_specs += [pl.BlockSpec(B.shape, lambda n: (0, 0, 0)),
                     pl.BlockSpec((1, CWout), lambda n: (0, 0))]
        if bn:
            flat_inputs += [jnp.repeat(scale, W).reshape(1, CWout),
                            jnp.repeat(shift, W).reshape(1, CWout)]
            in_specs += [pl.BlockSpec((1, CWout), lambda n: (0, 0))] * 2
        if pool:
            assert H % 2 == 0 and W % 2 == 0, "pooled layers need even H and W"
            P0 = _row_pool_placement(H, pack, 0)
            P1 = _row_pool_placement(H, pack, 1)
            flat_inputs += [P0, P1]
            in_specs += [pl.BlockSpec(P0.shape, lambda n: (0, 0))] * 2
            prev_sel = _even_col_selector(Cout, W)          # fold into NEXT layer
            H, W = H // 2, W // 2
            scratch_shapes.append(pltpu.VMEM((pack * (H + 2), CWout), jnp.float32))

    Hf, Wf, Cf, CWf = cfgs[-1]["H"], cfgs[-1]["W"], cfgs[-1]["Cout"], cfgs[-1]["CWout"]
    out = pl.pallas_call(
        _build_kernel(cfgs, pack),
        out_shape=jax.ShapeDtypeStruct((G, pack * Hf, CWf), jnp.float32),
        grid_spec=pltpu.PrefetchScalarGridSpec(
            num_scalar_prefetch=0,
            grid=(G,),
            in_specs=in_specs,
            out_specs=pl.BlockSpec((None, pack * Hf, CWf), lambda n: (n, 0, 0)),
            scratch_shapes=scratch_shapes),
        compiler_params=pltpu.CompilerParams(
            dimension_semantics=("parallel",)),             # split batch over cores
    )(*flat_inputs)

    # (G, pack*Hf, Cf*Wf) with column = c*Wf + w  ->  NCHW
    return out.reshape(N, Hf, Cf, Wf).transpose(0, 2, 1, 3)


# ----------------------------- reference & params ----------------------------

def maxpool2x2_nhwc(x):
    N, H, W, C = x.shape
    return x.reshape(N, H // 2, 2, W // 2, 2, C).max(axis=(2, 4))


def forward_reference(x_nchw, conv_params):
    x = jnp.transpose(x_nchw, (0, 2, 3, 1))                 # NCHW -> NHWC
    for i, (w, b, scale, shift) in enumerate(conv_params):
        y = jax.lax.conv_general_dilated(
            x, w, window_strides=(1, 1), padding="SAME",
            dimension_numbers=("NHWC", "HWIO", "NHWC"))
        y = jnp.maximum(y + b, 0.0) * scale + shift
        x = maxpool2x2_nhwc(y) if i < len(conv_params) - 1 else y
    return jnp.transpose(x, (0, 3, 1, 2))                   # NHWC -> NCHW


def init_params(key, num_filters, input_shape):
    """input_shape = (H, W, C_in), module-style. Returns 6 conv layers'
    (weight HWIO, bias, folded-BN scale, folded-BN shift)."""
    _, _, in_ch = input_shape
    chans = [in_ch, num_filters, 2 * num_filters, 4 * num_filters,
             8 * num_filters, 16 * num_filters, 32 * num_filters]
    bn_layers = {1, 3, 5}
    eps = 1e-3
    params = []
    for i in range(6):
        key, kw, kb, kg, kbt, km, kv = jax.random.split(key, 7)
        cin, cout = chans[i], chans[i + 1]
        w = 0.1 * jax.random.normal(kw, (3, 3, cin, cout), jnp.float32)
        b = 0.1 * jax.random.normal(kb, (cout,), jnp.float32)
        if i in bn_layers:
            gamma = 1.0 + 0.1 * jax.random.normal(kg, (cout,), jnp.float32)
            beta = 0.1 * jax.random.normal(kbt, (cout,), jnp.float32)
            rmean = 0.1 * jax.random.normal(km, (cout,), jnp.float32)
            rvar = jnp.abs(jax.random.normal(kv, (cout,), jnp.float32)) + 0.5
            scale = gamma / jnp.sqrt(rvar + eps)
            shift = beta - rmean * scale
        else:
            scale = jnp.ones((cout,), jnp.float32)
            shift = jnp.zeros((cout,), jnp.float32)
        params.append((w, b, scale, shift))
    return params


# ----------------------------- main -------------------------------------------

if __name__ == "__main__":
    # Small module-consistent config: input_shape=(H=64, W=32, C=3),
    # num_filters=4 (channels 4->8->16->32->64->128), batch=4, 2 images/step.
    num_filters = 4
    input_shape = (64, 32, 3)
    batch = 4

    key = jax.random.PRNGKey(0)
    key, kx, kp = jax.random.split(key, 3)
    x = jax.random.normal(
        kx, (batch, input_shape[2], input_shape[0], input_shape[1]),
        jnp.float32)                                   # PyTorch-style NCHW input
    conv_params = init_params(kp, num_filters, input_shape)

    out = jax.jit(lambda a, p: forward_pallas(a, p, pack=2))(x, conv_params)
    out = jax.block_until_ready(out)

    ref = jax.block_until_ready(forward_reference(x, conv_params))

    assert out.shape == (batch, 32 * num_filters,
                         input_shape[0] // 32, input_shape[1] // 32), out.shape
    assert out.shape == ref.shape
    assert jnp.allclose(out, ref, rtol=1e-3, atol=1e-3), \
        f"mismatch vs reference, max abs err {float(jnp.max(jnp.abs(out - ref)))}"
    print("KERNEL_OK")
</pallas_src>

<mosaic_0001>
module attributes {stable_mosaic.version = 11 : i64} {
  func.func @kernel(%arg0: i32, %arg1: memref<1x132x128xf32, #tpu.memory_space<vmem>>, %arg2: memref<3x128x128xf32, #tpu.memory_space<vmem>>, %arg3: memref<1x128xf32, #tpu.memory_space<vmem>>, %arg4: memref<68x130xf32, #tpu.memory_space<vmem>>, %arg5: memref<68x130xf32, #tpu.memory_space<vmem>>, %arg6: memref<3x128x128xf32, #tpu.memory_space<vmem>>, %arg7: memref<1x128xf32, #tpu.memory_space<vmem>>, %arg8: memref<1x128xf32, #tpu.memory_space<vmem>>, %arg9: memref<1x128xf32, #tpu.memory_space<vmem>>, %arg10: memref<36x66xf32, #tpu.memory_space<vmem>>, %arg11: memref<36x66xf32, #tpu.memory_space<vmem>>, %arg12: memref<3x128x128xf32, #tpu.memory_space<vmem>>, %arg13: memref<1x128xf32, #tpu.memory_space<vmem>>, %arg14: memref<20x34xf32, #tpu.memory_space<vmem>>, %arg15: memref<20x34xf32, #tpu.memory_space<vmem>>, %arg16: memref<3x128x128xf32, #tpu.memory_space<vmem>>, %arg17: memref<1x128xf32, #tpu.memory_space<vmem>>, %arg18: memref<1x128xf32, #tpu.memory_space<vmem>>, %arg19: memref<1x128xf32, #tpu.memory_space<vmem>>, %arg20: memref<12x18xf32, #tpu.memory_space<vmem>>, %arg21: memref<12x18xf32, #tpu.memory_space<vmem>>, %arg22: memref<3x128x128xf32, #tpu.memory_space<vmem>>, %arg23: memref<1x128xf32, #tpu.memory_space<vmem>>, %arg24: memref<8x10xf32, #tpu.memory_space<vmem>>, %arg25: memref<8x10xf32, #tpu.memory_space<vmem>>, %arg26: memref<3x128x128xf32, #tpu.memory_space<vmem>>, %arg27: memref<1x128xf32, #tpu.memory_space<vmem>>, %arg28: memref<1x128xf32, #tpu.memory_space<vmem>>, %arg29: memref<1x128xf32, #tpu.memory_space<vmem>>, %arg30: memref<1x4x128xf32, #tpu.memory_space<vmem>>, %arg31: memref<68x128xf32, #tpu.memory_space<vmem>>, %arg32: memref<36x128xf32, #tpu.memory_space<vmem>>, %arg33: memref<20x128xf32, #tpu.memory_space<vmem>>, %arg34: memref<12x128xf32, #tpu.memory_space<vmem>>, %arg35: memref<8x128xf32, #tpu.memory_space<vmem>>) attributes {dimension_semantics = [#tpu.dimension_semantics<parallel>], iteration_bounds = array<i64: 2>, scalar_prefetch = 0 : i64, scratch_operands = 5 : i64, tpu.core_type = #tpu.core_type<tc>, window_params = [{transform_indices = @transform_0, window_bounds = array<i64: 1, 132, 128>}, {pipeline_mode = #tpu.pipeline_mode<synchronous>, transform_indices = @transform_1, window_bounds = array<i64: 3, 128, 128>}, {pipeline_mode = #tpu.pipeline_mode<synchronous>, transform_indices = @transform_2, window_bounds = array<i64: 1, 128>}, {pipeline_mode = #tpu.pipeline_mode<synchronous>, transform_indices = @transform_3, window_bounds = array<i64: 68, 130>}, {pipeline_mode = #tpu.pipeline_mode<synchronous>, transform_indices = @transform_4, window_bounds = array<i64: 68, 130>}, {pipeline_mode = #tpu.pipeline_mode<synchronous>, transform_indices = @transform_5, window_bounds = array<i64: 3, 128, 128>}, {pipeline_mode = #tpu.pipeline_mode<synchronous>, transform_indices = @transform_6, window_bounds = array<i64: 1, 128>}, {pipeline_mode = #tpu.pipeline_mode<synchronous>, transform_indices = @transform_7, window_bounds = array<i64: 1, 128>}, {pipeline_mode = #tpu.pipeline_mode<synchronous>, transform_indices = @transform_8, window_bounds = array<i64: 1, 128>}, {pipeline_mode = #tpu.pipeline_mode<synchronous>, transform_indices = @transform_9, window_bounds = array<i64: 36, 66>}, {pipeline_mode = #tpu.pipeline_mode<synchronous>, transform_indices = @transform_10, window_bounds = array<i64: 36, 66>}, {pipeline_mode = #tpu.pipeline_mode<synchronous>, transform_indices = @transform_11, window_bounds = array<i64: 3, 128, 128>}, {pipeline_mode = #tpu.pipeline_mode<synchronous>, transform_indices = @transform_12, window_bounds = array<i64: 1, 128>}, {pipeline_mode = #tpu.pipeline_mode<synchronous>, transform_indices = @transform_13, window_bounds = array<i64: 20, 34>}, {pipeline_mode = #tpu.pipeline_mode<synchronous>, transform_indices = @transform_14, window_bounds = array<i64: 20, 34>}, {pipeline_mode = #tpu.pipeline_mode<synchronous>, transform_indices = @transform_15, window_bounds = array<i64: 3, 128, 128>}, {pipeline_mode = #tpu.pipeline_mode<synchronous>, transform_indices = @transform_16, window_bounds = array<i64: 1, 128>}, {pipeline_mode = #tpu.pipeline_mode<synchronous>, transform_indices = @transform_17, window_bounds = array<i64: 1, 128>}, {pipeline_mode = #tpu.pipeline_mode<synchronous>, transform_indices = @transform_18, window_bounds = array<i64: 1, 128>}, {pipeline_mode = #tpu.pipeline_mode<synchronous>, transform_indices = @transform_19, window_bounds = array<i64: 12, 18>}, {pipeline_mode = #tpu.pipeline_mode<synchronous>, transform_indices = @transform_20, window_bounds = array<i64: 12, 18>}, {pipeline_mode = #tpu.pipeline_mode<synchronous>, transform_indices = @transform_21, window_bounds = array<i64: 3, 128, 128>}, {pipeline_mode = #tpu.pipeline_mode<synchronous>, transform_indices = @transform_22, window_bounds = array<i64: 1, 128>}, {pipeline_mode = #tpu.pipeline_mode<synchronous>, transform_indices = @transform_23, window_bounds = array<i64: 8, 10>}, {pipeline_mode = #tpu.pipeline_mode<synchronous>, transform_indices = @transform_24, window_bounds = array<i64: 8, 10>}, {pipeline_mode = #tpu.pipeline_mode<synchronous>, transform_indices = @transform_25, window_bounds = array<i64: 3, 128, 128>}, {pipeline_mode = #tpu.pipeline_mode<synchronous>, transform_indices = @transform_26, window_bounds = array<i64: 1, 128>}, {pipeline_mode = #tpu.pipeline_mode<synchronous>, transform_indices = @transform_27, window_bounds = array<i64: 1, 128>}, {pipeline_mode = #tpu.pipeline_mode<synchronous>, transform_indices = @transform_28, window_bounds = array<i64: 1, 128>}, {transform_indices = @transform_29, window_bounds = array<i64: 1, 4, 128>}]} {
    %c0 = arith.constant 0 : index
    %c0_0 = arith.constant 0 : index
    %c0_1 = arith.constant 0 : index
    %0 = vector.load %arg1[%c0, %c0_0, %c0_1] : memref<1x132x128xf32, #tpu.memory_space<vmem>>, vector<1x130x128xf32>
    %1 = vector.shape_cast %0 : vector<1x130x128xf32> to vector<130x128xf32>
    %c0_2 = arith.constant 0 : index
    %c0_3 = arith.constant 0 : index
    %c0_4 = arith.constant 0 : index
    %2 = vector.load %arg2[%c0_2, %c0_3, %c0_4] : memref<3x128x128xf32, #tpu.memory_space<vmem>>, vector<1x128x128xf32>
    %3 = vector.shape_cast %2 : vector<1x128x128xf32> to vector<128x128xf32>
    %cst = arith.constant dense<0.000000e+00> : vector<130x128xf32>
    %4 = tpu.matmul %1, %3, %cst {dimension_numbers = #tpu.dot_dimension_numbers<[1], [0], [0], [1], [0, 0, 1, 1], [], []>} : vector<130x128xf32>, vector<128x128xf32>, vector<130x128xf32> -> vector<130x128xf32>
    %c0_5 = arith.constant 0 : index
    %c1 = arith.constant 1 : index
    %c0_6 = arith.constant 0 : index
    %5 = vector.load %arg1[%c0_5, %c1, %c0_6] : memref<1x132x128xf32, #tpu.memory_space<vmem>>, vector<1x130x128xf32>
    %6 = vector.shape_cast %5 : vector<1x130x128xf32> to vector<130x128xf32>
    %c1_7 = arith.constant 1 : index
    %c0_8 = arith.constant 0 : index
    %c0_9 = arith.constant 0 : index
    %7 = vector.load %arg2[%c1_7, %c0_8, %c0_9] : memref<3x128x128xf32, #tpu.memory_space<vmem>>, vector<1x128x128xf32>
    %8 = vector.shape_cast %7 : vector<1x128x128xf32> to vector<128x128xf32>
    %cst_10 = arith.constant dense<0.000000e+00> : vector<130x128xf32>
    %9 = tpu.matmul %6, %8, %cst_10 {dimension_numbers = #tpu.dot_dimension_numbers<[1], [0], [0], [1], [0, 0, 1, 1], [], []>} : vector<130x128xf32>, vector<128x128xf32>, vector<130x128xf32> -> vector<130x128xf32>
    %10 = arith.addf %4, %9 : vector<130x128xf32>
    %c0_11 = arith.constant 0 : index
    %c2 = arith.constant 2 : index
    %c0_12 = arith.constant 0 : index
    %11 = vector.load %arg1[%c0_11, %c2, %c0_12] : memref<1x132x128xf32, #tpu.memory_space<vmem>>, vector<1x130x128xf32>
    %12 = vector.shape_cast %11 : vector<1x130x128xf32> to vector<130x128xf32>
    %c2_13 = arith.constant 2 : index
    %c0_14 = arith.constant 0 : index
    %c0_15 = arith.constant 0 : index
    %13 = vector.load %arg2[%c2_13, %c0_14, %c0_15] : memref<3x128x128xf32, #tpu.memory_space<vmem>>, vector<1x128x128xf32>
    %14 = vector.shape_cast %13 : vector<1x128x128xf32> to vector<128x128xf32>
    %cst_16 = arith.constant dense<0.000000e+00> : vector<130x128xf32>
    %15 = tpu.matmul %12, %14, %cst_16 {dimension_numbers = #tpu.dot_dimension_numbers<[1], [0], [0], [1], [0, 0, 1, 1], [], []>} : vector<130x128xf32>, vector<128x128xf32>, vector<130x128xf32> -> vector<130x128xf32>
    %16 = arith.addf %10, %15 : vector<130x128xf32>
    %c0_17 = arith.constant 0 : index
    %c0_18 = arith.constant 0 : index
    %17 = vector.load %arg3[%c0_17, %c0_18] : memref<1x128xf32, #tpu.memory_space<vmem>>, vector<1x128xf32>
    %18 = vector.broadcast %17 : vector<1x128xf32> to vector<130x128xf32>
    %19 = arith.addf %16, %18 : vector<130x128xf32>
    %cst_19 = arith.constant 0.000000e+00 : f32
    %20 = vector.broadcast %cst_19 : f32 to vector<130x128xf32>
    %21 = arith.maximumf %19, %20 : vector<130x128xf32>
    %c0_20 = arith.constant 0 : index
    %c0_21 = arith.constant 0 : index
    %22 = vector.load %arg4[%c0_20, %c0_21] : memref<68x130xf32, #tpu.memory_space<vmem>>, vector<68x130xf32>
    %cst_22 = arith.constant dense<0.000000e+00> : vector<68x128xf32>
    %23 = tpu.matmul %22, %21, %cst_22 {dimension_numbers = #tpu.dot_dimension_numbers<[1], [0], [0], [1], [0, 0, 1, 1], [], []>} : vector<68x130xf32>, vector<130x128xf32>, vector<68x128xf32> -> vector<68x128xf32>
    %c0_23 = arith.constant 0 : index
    %c0_24 = arith.constant 0 : index
    %24 = vector.load %arg5[%c0_23, %c0_24] : memref<68x130xf32, #tpu.memory_space<vmem>>, vector<68x130xf32>
    %cst_25 = arith.constant dense<0.000000e+00> : vector<68x128xf32>
    %25 = tpu.matmul %24, %21, %cst_25 {dimension_numbers = #tpu.dot_dimension_numbers<[1], [0], [0], [1], [0, 0, 1, 1], [], []>} : vector<68x130xf32>, vector<130x128xf32>, vector<68x128xf32> -> vector<68x128xf32>
    %26 = arith.maximumf %23, %25 : vector<68x128xf32>
    %27 = vector.extract_strided_slice %26 {offsets = [0, 1], sizes = [68, 127], strides = [1, 1]} : vector<68x128xf32> to vector<68x127xf32>
    %28 = vector.extract_strided_slice %26 {offsets = [0, 0], sizes = [68, 1], strides = [1, 1]} : vector<68x128xf32> to vector<68x1xf32>
    %29 = tpu.concatenate %27, %28 in 1 : vector<68x127xf32>, vector<68x1xf32> -> vector<68x128xf32>
    %30 = arith.maximumf %26, %29 : vector<68x128xf32>
    %c0_26 = arith.constant 0 : index
    %c0_27 = arith.constant 0 : index
    %31 = vector.load %arg31[%c0_26, %c0_27] : memref<68x128xf32, #tpu.memory_space<vmem>>, vector<68x128xf32>
    tpu.vector_store %arg31[%c0_26, %c0_27], %30 {strides = array<i32>} : memref<68x128xf32, #tpu.memory_space<vmem>>, vector<68x128xf32>,
    %c0_28 = arith.constant 0 : index
    %c0_29 = arith.constant 0 : index
    %32 = vector.load %arg31[%c0_28, %c0_29] : memref<68x128xf32, #tpu.memory_space<vmem>>, vector<66x128xf32>
    %c0_30 = arith.constant 0 : index
    %c0_31 = arith.constant 0 : index
    %c0_32 = arith.constant 0 : index
    %33 = vector.load %arg6[%c0_30, %c0_31, %c0_32] : memref<3x128x128xf32, #tpu.memory_space<vmem>>, vector<1x128x128xf32>
    %34 = vector.shape_cast %33 : vector<1x128x128xf32> to vector<128x128xf32>
    %cst_33 = arith.constant dense<0.000000e+00> : vector<66x128xf32>
    %35 = tpu.matmul %32, %34, %cst_33 {dimension_numbers = #tpu.dot_dimension_numbers<[1], [0], [0], [1], [0, 0, 1, 1], [], []>} : vector<66x128xf32>, vector<128x128xf32>, vector<66x128xf32> -> vector<66x128xf32>
    %c1_34 = arith.constant 1 : index
    %c0_35 = arith.constant 0 : index
    %36 = vector.load %arg31[%c1_34, %c0_35] : memref<68x128xf32, #tpu.memory_space<vmem>>, vector<66x128xf32>
    %c1_36 = arith.constant 1 : index
    %c0_37 = arith.constant 0 : index
    %c0_38 = arith.constant 0 : index
    %37 = vector.load %arg6[%c1_36, %c0_37, %c0_38] : memref<3x128x128xf32, #tpu.memory_space<vmem>>, vector<1x128x128xf32>
    %38 = vector.shape_cast %37 : vector<1x128x128xf32> to vector<128x128xf32>
    %cst_39 = arith.constant dense<0.000000e+00> : vector<66x128xf32>
    %39 = tpu.matmul %36, %38, %cst_39 {dimension_numbers = #tpu.dot_dimension_numbers<[1], [0], [0], [1], [0, 0, 1, 1], [], []>} : vector<66x128xf32>, vector<128x128xf32>, vector<66x128xf32> -> vector<66x128xf32>
    %40 = arith.addf %35, %39 : vector<66x128xf32>
    %c2_40 = arith.constant 2 : index
    %c0_41 = arith.constant 0 : index
    %41 = vector.load %arg31[%c2_40, %c0_41] : memref<68x128xf32, #tpu.memory_space<vmem>>, vector<66x128xf32>
    %c2_42 = arith.constant 2 : index
    %c0_43 = arith.constant 0 : index
    %c0_44 = arith.constant 0 : index
    %42 = vector.load %arg6[%c2_42, %c0_43, %c0_44] : memref<3x128x128xf32, #tpu.memory_space<vmem>>, vector<1x128x128xf32>
    %43 = vector.shape_cast %42 : vector<1x128x128xf32> to vector<128x128xf32>
    %cst_45 = arith.constant dense<0.000000e+00> : vector<66x128xf32>
    %44 = tpu.matmul %41, %43, %cst_45 {dimension_numbers = #tpu.dot_dimension_numbers<[1], [0], [0], [1], [0, 0, 1, 1], [], []>} : vector<66x128xf32>, vector<128x128xf32>, vector<66x128xf32> -> vector<66x128xf32>
    %45 = arith.addf %40, %44 : vector<66x128xf32>
    %c0_46 = arith.constant 0 : index
    %c0_47 = arith.constant 0 : index
    %46 = vector.load %arg7[%c0_46, %c0_47] : memref<1x128xf32, #tpu.memory_space<vmem>>, vector<1x128xf32>
    %47 = vector.broadcast %46 : vector<1x128xf32> to vector<66x128xf32>
    %48 = arith.addf %45, %47 : vector<66x128xf32>
    %cst_48 = arith.constant 0.000000e+00 : f32
    %49 = vector.broadcast %cst_48 : f32 to vector<66x128xf32>
    %50 = arith.maximumf %48, %49 : vector<66x128xf32>
    %c0_49 = arith.constant 0 : index
    %c0_50 = arith.constant 0 : index
    %51 = vector.load %arg8[%c0_49, %c0_50] : memref<1x128xf32, #tpu.memory_space<vmem>>, vector<1x128xf32>
    %52 = vector.broadcast %51 : vector<1x128xf32> to vector<66x128xf32>
    %53 = arith.mulf %50, %52 : vector<66x128xf32>
    %c0_51 = arith.constant 0 : index
    %c0_52 = arith.constant 0 : index
    %54 = vector.load %arg9[%c0_51, %c0_52] : memref<1x128xf32, #tpu.memory_space<vmem>>, vector<1x128xf32>
    %55 = vector.broadcast %54 : vector<1x128xf32> to vector<66x128xf32>
    %56 = arith.addf %53, %55 : vector<66x128xf32>
    %c0_53 = arith.constant 0 : index
    %c0_54 = arith.constant 0 : index
    %57 = vector.load %arg10[%c0_53, %c0_54] : memref<36x66xf32, #tpu.memory_space<vmem>>, vector<36x66xf32>
    %cst_55 = arith.constant dense<0.000000e+00> : vector<36x128xf32>
    %58 = tpu.matmul %57, %56, %cst_55 {dimension_numbers = #tpu.dot_dimension_numbers<[1], [0], [0], [1], [0, 0, 1, 1], [], []>} : vector<36x66xf32>, vector<66x128xf32>, vector<36x128xf32> -> vector<36x128xf32>
    %c0_56 = arith.constant 0 : index
    %c0_57 = arith.constant 0 : index
    %59 = vector.load %arg11[%c0_56, %c0_57] : memref<36x66xf32, #tpu.memory_space<vmem>>, vector<36x66xf32>
    %cst_58 = arith.constant dense<0.000000e+00> : vector<36x128xf32>
    %60 = tpu.matmul %59, %56, %cst_58 {dimension_numbers = #tpu.dot_dimension_numbers<[1], [0], [0], [1], [0, 0, 1, 1], [], []>} : vector<36x66xf32>, vector<66x128xf32>, vector<36x128xf32> -> vector<36x128xf32>
    %61 = arith.maximumf %58, %60 : vector<36x128xf32>
    %62 = vector.extract_strided_slice %61 {offsets = [0, 1], sizes = [36, 127], strides = [1, 1]} : vector<36x128xf32> to vector<36x127xf32>
    %63 = vector.extract_strided_slice %61 {offsets = [0, 0], sizes = [36, 1], strides = [1, 1]} : vector<36x128xf32> to vector<36x1xf32>
    %64 = tpu.concatenate %62, %63 in 1 : vector<36x127xf32>, vector<36x1xf32> -> vector<36x128xf32>
    %65 = arith.maximumf %61, %64 : vector<36x128xf32>
    %c0_59 = arith.constant 0 : index
    %c0_60 = arith.constant 0 : index
    %66 = vector.load %arg32[%c0_59, %c0_60] : memref<36x128xf32, #tpu.memory_space<vmem>>, vector<36x128xf32>
    tpu.vector_store %arg32[%c0_59, %c0_60], %65 {strides = array<i32>} : memref<36x128xf32, #tpu.memory_space<vmem>>, vector<36x128xf32>,
    %c0_61 = arith.constant 0 : index
    %c0_62 = arith.constant 0 : index
    %67 = vector.load %arg32[%c0_61, %c0_62] : memref<36x128xf32, #tpu.memory_space<vmem>>, vector<34x128xf32>
    %c0_63 = arith.constant 0 : index
    %c0_64 = arith.constant 0 : index
    %c0_65 = arith.constant 0 : index
    %68 = vector.load %arg12[%c0_63, %c0_64, %c0_65] : memref<3x128x128xf32, #tpu.memory_space<vmem>>, vector<1x128x128xf32>
    %69 = vector.shape_cast %68 : vector<1x128x128xf32> to vector<128x128xf32>
    %cst_66 = arith.constant dense<0.000000e+00> : vector<34x128xf32>
    %70 = tpu.matmul %67, %69, %cst_66 {dimension_numbers = #tpu.dot_dimension_numbers<[1], [0], [0], [1], [0, 0, 1, 1], [], []>} : vector<34x128xf32>, vector<128x128xf32>, vector<34x128xf32> -> vector<34x128xf32>
    %c1_67 = arith.constant 1 : index
    %c0_68 = arith.constant 0 : index
    %71 = vector.load %arg32[%c1_67, %c0_68] : memref<36x128xf32, #tpu.memory_space<vmem>>, vector<34x128xf32>
    %c1_69 = arith.constant 1 : index
    %c0_70 = arith.constant 0 : index
    %c0_71 = arith.constant 0 : index
    %72 = vector.load %arg12[%c1_69, %c0_70, %c0_71] : memref<3x128x128xf32, #tpu.memory_space<vmem>>, vector<1x128x128xf32>
    %73 = vector.shape_cast %72 : vector<1x128x128xf32> to vector<128x128xf32>
    %cst_72 = arith.constant dense<0.000000e+00> : vector<34x128xf32>
    %74 = tpu.matmul %71, %73, %cst_72 {dimension_numbers = #tpu.dot_dimension_numbers<[1], [0], [0], [1], [0, 0, 1, 1], [], []>} : vector<34x128xf32>, vector<128x128xf32>, vector<34x128xf32> -> vector<34x128xf32>
    %75 = arith.addf %70, %74 : vector<34x128xf32>
    %c2_73 = arith.constant 2 : index
    %c0_74 = arith.constant 0 : index
    %76 = vector.load %arg32[%c2_73, %c0_74] : memref<36x128xf32, #tpu.memory_space<vmem>>, vector<34x128xf32>
    %c2_75 = arith.constant 2 : index
    %c0_76 = arith.constant 0 : index
    %c0_77 = arith.constant 0 : index
    %77 = vector.load %arg12[%c2_75, %c0_76, %c0_77] : memref<3x128x128xf32, #tpu.memory_space<vmem>>, vector<1x128x128xf32>
    %78 = vector.shape_cast %77 : vector<1x128x128xf32> to vector<128x128xf32>
    %cst_78 = arith.constant dense<0.000000e+00> : vector<34x128xf32>
    %79 = tpu.matmul %76, %78, %cst_78 {dimension_numbers = #tpu.dot_dimension_numbers<[1], [0], [0], [1], [0, 0, 1, 1], [], []>} : vector<34x128xf32>, vector<128x128xf32>, vector<34x128xf32> -> vector<34x128xf32>
    %80 = arith.addf %75, %79 : vector<34x128xf32>
    %c0_79 = arith.constant 0 : index
    %c0_80 = arith.constant 0 : index
    %81 = vector.load %arg13[%c0_79, %c0_80] : memref<1x128xf32, #tpu.memory_space<vmem>>, vector<1x128xf32>
    %82 = vector.broadcast %81 : vector<1x128xf32> to vector<34x128xf32>
    %83 = arith.addf %80, %82 : vector<34x128xf32>
    %cst_81 = arith.constant 0.000000e+00 : f32
    %84 = vector.broadcast %cst_81 : f32 to vector<34x128xf32>
    %85 = arith.maximumf %83, %84 : vector<34x128xf32>
    %c0_82 = arith.constant 0 : index
    %c0_83 = arith.constant 0 : index
    %86 = vector.load %arg14[%c0_82, %c0_83] : memref<20x34xf32, #tpu.memory_space<vmem>>, vector<20x34xf32>
    %cst_84 = arith.constant dense<0.000000e+00> : vector<20x128xf32>
    %87 = tpu.matmul %86, %85, %cst_84 {dimension_numbers = #tpu.dot_dimension_numbers<[1], [0], [0], [1], [0, 0, 1, 1], [], []>} : vector<20x34xf32>, vector<34x128xf32>, vector<20x128xf32> -> vector<20x128xf32>
    %c0_85 = arith.constant 0 : index
    %c0_86 = arith.constant 0 : index
    %88 = vector.load %arg15[%c0_85, %c0_86] : memref<20x34xf32, #tpu.memory_space<vmem>>, vector<20x34xf32>
    %cst_87 = arith.constant dense<0.000000e+00> : vector<20x128xf32>
    %89 = tpu.matmul %88, %85, %cst_87 {dimension_numbers = #tpu.dot_dimension_numbers<[1], [0], [0], [1], [0, 0, 1, 1], [], []>} : vector<20x34xf32>, vector<34x128xf32>, vector<20x128xf32> -> vector<20x128xf32>
    %90 = arith.maximumf %87, %89 : vector<20x128xf32>
    %91 = vector.extract_strided_slice %90 {offsets = [0, 1], sizes = [20, 127], strides = [1, 1]} : vector<20x128xf32> to vector<20x127xf32>
    %92 = vector.extract_strided_slice %90 {offsets = [0, 0], sizes = [20, 1], strides = [1, 1]} : vector<20x128xf32> to vector<20x1xf32>
    %93 = tpu.concatenate %91, %92 in 1 : vector<20x127xf32>, vector<20x1xf32> -> vector<20x128xf32>
    %94 = arith.maximumf %90, %93 : vector<20x128xf32>
    %c0_88 = arith.constant 0 : index
    %c0_89 = arith.constant 0 : index
    %95 = vector.load %arg33[%c0_88, %c0_89] : memref<20x128xf32, #tpu.memory_space<vmem>>, vector<20x128xf32>
    tpu.vector_store %arg33[%c0_88, %c0_89], %94 {strides = array<i32>} : memref<20x128xf32, #tpu.memory_space<vmem>>, vector<20x128xf32>,
    %c0_90 = arith.constant 0 : index
    %c0_91 = arith.constant 0 : index
    %96 = vector.load %arg33[%c0_90, %c0_91] : memref<20x128xf32, #tpu.memory_space<vmem>>, vector<18x128xf32>
    %c0_92 = arith.constant 0 : index
    %c0_93 = arith.constant 0 : index
    %c0_94 = arith.constant 0 : index
    %97 = vector.load %arg16[%c0_92, %c0_93, %c0_94] : memref<3x128x128xf32, #tpu.memory_space<vmem>>, vector<1x128x128xf32>
    %98 = vector.shape_cast %97 : vector<1x128x128xf32> to vector<128x128xf32>
    %cst_95 = arith.constant dense<0.000000e+00> : vector<18x128xf32>
    %99 = tpu.matmul %96, %98, %cst_95 {dimension_numbers = #tpu.dot_dimension_numbers<[1], [0], [0], [1], [0, 0, 1, 1], [], []>} : vector<18x128xf32>, vector<128x128xf32>, vector<18x128xf32> -> vector<18x128xf32>
    %c1_96 = arith.constant 1 : index
    %c0_97 = arith.constant 0 : index
    %100 = vector.load %arg33[%c1_96, %c0_97] : memref<20x128xf32, #tpu.memory_space<vmem>>, vector<18x128xf32>
    %c1_98 = arith.constant 1 : index
    %c0_99 = arith.constant 0 : index
    %c0_100 = arith.constant 0 : index
    %101 = vector.load %arg16[%c1_98, %c0_99, %c0_100] : memref<3x128x128xf32, #tpu.memory_space<vmem>>, vector<1x128x128xf32>
    %102 = vector.shape_cast %101 : vector<1x128x128xf32> to vector<128x128xf32>
    %cst_101 = arith.constant dense<0.000000e+00> : vector<18x128xf32>
    %103 = tpu.matmul %100, %102, %cst_101 {dimension_numbers = #tpu.dot_dimension_numbers<[1], [0], [0], [1], [0, 0, 1, 1], [], []>} : vector<18x128xf32>, vector<128x128xf32>, vector<18x128xf32> -> vector<18x128xf32>
    %104 = arith.addf %99, %103 : vector<18x128xf32>
    %c2_102 = arith.constant 2 : index
    %c0_103 = arith.constant 0 : index
    %105 = vector.load %arg33[%c2_102, %c0_103] : memref<20x128xf32, #tpu.memory_space<vmem>>, vector<18x128xf32>
    %c2_104 = arith.constant 2 : index
    %c0_105 = arith.constant 0 : index
    %c0_106 = arith.constant 0 : index
    %106 = vector.load %arg16[%c2_104, %c0_105, %c0_106] : memref<3x128x128xf32, #tpu.memory_space<vmem>>, vector<1x128x128xf32>
    %107 = vector.shape_cast %106 : vector<1x128x128xf32> to vector<128x128xf32>
    %cst_107 = arith.constant dense<0.000000e+00> : vector<18x128xf32>
    %108 = tpu.matmul %105, %107, %cst_107 {dimension_numbers = #tpu.dot_dimension_numbers<[1], [0], [0], [1], [0, 0, 1, 1], [], []>} : vector<18x128xf32>, vector<128x128xf32>, vector<18x128xf32> -> vector<18x128xf32>
    %109 = arith.addf %104, %108 : vector<18x128xf32>
    %c0_108 = arith.constant 0 : index
    %c0_109 = arith.constant 0 : index
    %110 = vector.load %arg17[%c0_108, %c0_109] : memref<1x128xf32, #tpu.memory_space<vmem>>, vector<1x128xf32>
    %111 = vector.broadcast %110 : vector<1x128xf32> to vector<18x128xf32>
    %112 = arith.addf %109, %111 : vector<18x128xf32>
    %cst_110 = arith.constant 0.000000e+00 : f32
    %113 = vector.broadcast %cst_110 : f32 to vector<18x128xf32>
    %114 = arith.maximumf %112, %113 : vector<18x128xf32>
    %c0_111 = arith.constant 0 : index
    %c0_112 = arith.constant 0 : index
    %115 = vector.load %arg18[%c0_111, %c0_112] : memref<1x128xf32, #tpu.memory_space<vmem>>, vector<1x128xf32>
    %116 = vector.broadcast %115 : vector<1x128xf32> to vector<18x128xf32>
    %117 = arith.mulf %114, %116 : vector<18x128xf32>
    %c0_113 = arith.constant 0 : index
    %c0_114 = arith.constant 0 : index
    %118 = vector.load %arg19[%c0_113, %c0_114] : memref<1x128xf32, #tpu.memory_space<vmem>>, vector<1x128xf32>
    %119 = vector.broadcast %118 : vector<1x128xf32> to vector<18x128xf32>
    %120 = arith.addf %117, %119 : vector<18x128xf32>
    %c0_115 = arith.constant 0 : index
    %c0_116 = arith.constant 0 : index
    %121 = vector.load %arg20[%c0_115, %c0_116] : memref<12x18xf32, #tpu.memory_space<vmem>>, vector<12x18xf32>
    %cst_117 = arith.constant dense<0.000000e+00> : vector<12x128xf32>
    %122 = tpu.matmul %121, %120, %cst_117 {dimension_numbers = #tpu.dot_dimension_numbers<[1], [0], [0], [1], [0, 0, 1, 1], [], []>} : vector<12x18xf32>, vector<18x128xf32>, vector<12x128xf32> -> vector<12x128xf32>
    %c0_118 = arith.constant 0 : index
    %c0_119 = arith.constant 0 : index
    %123 = vector.load %arg21[%c0_118, %c0_119] : memref<12x18xf32, #tpu.memory_space<vmem>>, vector<12x18xf32>
    %cst_120 = arith.constant dense<0.000000e+00> : vector<12x128xf32>
    %124 = tpu.matmul %123, %120, %cst_120 {dimension_numbers = #tpu.dot_dimension_numbers<[1], [0], [0], [1], [0, 0, 1, 1], [], []>} : vector<12x18xf32>, vector<18x128xf32>, vector<12x128xf32> -> vector<12x128xf32>
    %125 = arith.maximumf %122, %124 : vector<12x128xf32>
    %126 = vector.extract_strided_slice %125 {offsets = [0, 1], sizes = [12, 127], strides = [1, 1]} : vector<12x128xf32> to vector<12x127xf32>
    %127 = vector.extract_strided_slice %125 {offsets = [0, 0], sizes = [12, 1], strides = [1, 1]} : vector<12x128xf32> to vector<12x1xf32>
    %128 = tpu.concatenate %126, %127 in 1 : vector<12x127xf32>, vector<12x1xf32> -> vector<12x128xf32>
    %129 = arith.maximumf %125, %128 : vector<12x128xf32>
    %c0_121 = arith.constant 0 : index
    %c0_122 = arith.constant 0 : index
    %130 = vector.load %arg34[%c0_121, %c0_122] : memref<12x128xf32, #tpu.memory_space<vmem>>, vector<12x128xf32>
    tpu.vector_store %arg34[%c0_121, %c0_122], %129 {strides = array<i32>} : memref<12x128xf32, #tpu.memory_space<vmem>>, vector<12x128xf32>,
    %c0_123 = arith.constant 0 : index
    %c0_124 = arith.constant 0 : index
    %131 = vector.load %arg34[%c0_123, %c0_124] : memref<12x128xf32, #tpu.memory_space<vmem>>, vector<10x128xf32>
    %c0_125 = arith.constant 0 : index
    %c0_126 = arith.constant 0 : index
    %c0_127 = arith.constant 0 : index
    %132 = vector.load %arg22[%c0_125, %c0_126, %c0_127] : memref<3x128x128xf32, #tpu.memory_space<vmem>>, vector<1x128x128xf32>
    %133 = vector.shape_cast %132 : vector<1x128x128xf32> to vector<128x128xf32>
    %cst_128 = arith.constant dense<0.000000e+00> : vector<10x128xf32>
    %134 = tpu.matmul %131, %133, %cst_128 {dimension_numbers = #tpu.dot_dimension_numbers<[1], [0], [0], [1], [0, 0, 1, 1], [], []>} : vector<10x128xf32>, vector<128x128xf32>, vector<10x128xf32> -> vector<10x128xf32>
    %c1_129 = arith.constant 1 : index
    %c0_130 = arith.constant 0 : index
    %135 = vector.load %arg34[%c1_129, %c0_130] : memref<12x128xf32, #tpu.memory_space<vmem>>, vector<10x128xf32>
    %c1_131 = arith.constant 1 : index
    %c0_132 = arith.constant 0 : index
    %c0_133 = arith.constant 0 : index
    %136 = vector.load %arg22[%c1_131, %c0_132, %c0_133] : memref<3x128x128xf32, #tpu.memory_space<vmem>>, vector<1x128x128xf32>
    %137 = vector.shape_cast %136 : vector<1x128x128xf32> to vector<128x128xf32>
    %cst_134 = arith.constant dense<0.000000e+00> : vector<10x128xf32>
    %138 = tpu.matmul %135, %137, %cst_134 {dimension_numbers = #tpu.dot_dimension_numbers<[1], [0], [0], [1], [0, 0, 1, 1], [], []>} : vector<10x128xf32>, vector<128x128xf32>, vector<10x128xf32> -> vector<10x128xf32>
    %139 = arith.addf %134, %138 : vector<10x128xf32>
    %c2_135 = arith.constant 2 : index
    %c0_136 = arith.constant 0 : index
    %140 = vector.load %arg34[%c2_135, %c0_136] : memref<12x128xf32, #tpu.memory_space<vmem>>, vector<10x128xf32>
    %c2_137 = arith.constant 2 : index
    %c0_138 = arith.constant 0 : index
    %c0_139 = arith.constant 0 : index
    %141 = vector.load %arg22[%c2_137, %c0_138, %c0_139] : memref<3x128x128xf32, #tpu.memory_space<vmem>>, vector<1x128x128xf32>
    %142 = vector.shape_cast %141 : vector<1x128x128xf32> to vector<128x128xf32>
    %cst_140 = arith.constant dense<0.000000e+00> : vector<10x128xf32>
    %143 = tpu.matmul %140, %142, %cst_140 {dimension_numbers = #tpu.dot_dimension_numbers<[1], [0], [0], [1], [0, 0, 1, 1], [], []>} : vector<10x128xf32>, vector<128x128xf32>, vector<10x128xf32> -> vector<10x128xf32>
    %144 = arith.addf %139, %143 : vector<10x128xf32>
    %c0_141 = arith.constant 0 : index
    %c0_142 = arith.constant 0 : index
    %145 = vector.load %arg23[%c0_141, %c0_142] : memref<1x128xf32, #tpu.memory_space<vmem>>, vector<1x128xf32>
    %146 = vector.broadcast %145 : vector<1x128xf32> to vector<10x128xf32>
    %147 = arith.addf %144, %146 : vector<10x128xf32>
    %cst_143 = arith.constant 0.000000e+00 : f32
    %148 = vector.broadcast %cst_143 : f32 to vector<10x128xf32>
    %149 = arith.maximumf %147, %148 : vector<10x128xf32>
    %c0_144 = arith.constant 0 : index
    %c0_145 = arith.constant 0 : index
    %150 = vector.load %arg24[%c0_144, %c0_145] : memref<8x10xf32, #tpu.memory_space<vmem>>, vector<8x10xf32>
    %cst_146 = arith.constant dense<0.000000e+00> : vector<8x128xf32>
    %151 = tpu.matmul %150, %149, %cst_146 {dimension_numbers = #tpu.dot_dimension_numbers<[1], [0], [0], [1], [0, 0, 1, 1], [], []>} : vector<8x10xf32>, vector<10x128xf32>, vector<8x128xf32> -> vector<8x128xf32>
    %c0_147 = arith.constant 0 : index
    %c0_148 = arith.constant 0 : index
    %152 = vector.load %arg25[%c0_147, %c0_148] : memref<8x10xf32, #tpu.memory_space<vmem>>, vector<8x10xf32>
    %cst_149 = arith.constant dense<0.000000e+00> : vector<8x128xf32>
    %153 = tpu.matmul %152, %149, %cst_149 {dimension_numbers = #tpu.dot_dimension_numbers<[1], [0], [0], [1], [0, 0, 1, 1], [], []>} : vector<8x10xf32>, vector<10x128xf32>, vector<8x128xf32> -> vector<8x128xf32>
    %154 = arith.maximumf %151, %153 : vector<8x128xf32>
    %155 = vector.extract_strided_slice %154 {offsets = [0, 1], sizes = [8, 127], strides = [1, 1]} : vector<8x128xf32> to vector<8x127xf32>
    %156 = vector.extract_strided_slice %154 {offsets = [0, 0], sizes = [8, 1], strides = [1, 1]} : vector<8x128xf32> to vector<8x1xf32>
    %157 = tpu.concatenate %155, %156 in 1 : vector<8x127xf32>, vector<8x1xf32> -> vector<8x128xf32>
    %158 = arith.maximumf %154, %157 : vector<8x128xf32>
    %c0_150 = arith.constant 0 : index
    %c0_151 = arith.constant 0 : index
    %159 = vector.load %arg35[%c0_150, %c0_151] : memref<8x128xf32, #tpu.memory_space<vmem>>, vector<8x128xf32>
    tpu.vector_store %arg35[%c0_150, %c0_151], %158 {strides = array<i32>} : memref<8x128xf32, #tpu.memory_space<vmem>>, vector<8x128xf32>,
    %c0_152 = arith.constant 0 : index
    %c0_153 = arith.constant 0 : index
    %160 = vector.load %arg35[%c0_152, %c0_153] : memref<8x128xf32, #tpu.memory_space<vmem>>, vector<6x128xf32>
    %c0_154 = arith.constant 0 : index
    %c0_155 = arith.constant 0 : index
    %c0_156 = arith.constant 0 : index
    %161 = vector.load %arg26[%c0_154, %c0_155, %c0_156] : memref<3x128x128xf32, #tpu.memory_space<vmem>>, vector<1x128x128xf32>
    %162 = vector.shape_cast %161 : vector<1x128x128xf32> to vector<128x128xf32>
    %cst_157 = arith.constant dense<0.000000e+00> : vector<6x128xf32>
    %163 = tpu.matmul %160, %162, %cst_157 {dimension_numbers = #tpu.dot_dimension_numbers<[1], [0], [0], [1], [0, 0, 1, 1], [], []>} : vector<6x128xf32>, vector<128x128xf32>, vector<6x128xf32> -> vector<6x128xf32>
    %c1_158 = arith.constant 1 : index
    %c0_159 = arith.constant 0 : index
    %164 = vector.load %arg35[%c1_158, %c0_159] : memref<8x128xf32, #tpu.memory_space<vmem>>, vector<6x128xf32>
    %c1_160 = arith.constant 1 : index
    %c0_161 = arith.constant 0 : index
    %c0_162 = arith.constant 0 : index
    %165 = vector.load %arg26[%c1_160, %c0_161, %c0_162] : memref<3x128x128xf32, #tpu.memory_space<vmem>>, vector<1x128x128xf32>
    %166 = vector.shape_cast %165 : vector<1x128x128xf32> to vector<128x128xf32>
    %cst_163 = arith.constant dense<0.000000e+00> : vector<6x128xf32>
    %167 = tpu.matmul %164, %166, %cst_163 {dimension_numbers = #tpu.dot_dimension_numbers<[1], [0], [0], [1], [0, 0, 1, 1], [], []>} : vector<6x128xf32>, vector<128x128xf32>, vector<6x128xf32> -> vector<6x128xf32>
    %168 = arith.addf %163, %167 : vector<6x128xf32>
    %c2_164 = arith.constant 2 : index
    %c0_165 = arith.constant 0 : index
    %169 = vector.load %arg35[%c2_164, %c0_165] : memref<8x128xf32, #tpu.memory_space<vmem>>, vector<6x128xf32>
    %c2_166 = arith.constant 2 : index
    %c0_167 = arith.constant 0 : index
    %c0_168 = arith.constant 0 : index
    %170 = vector.load %arg26[%c2_166, %c0_167, %c0_168] : memref<3x128x128xf32, #tpu.memory_space<vmem>>, vector<1x128x128xf32>
    %171 = vector.shape_cast %170 : vector<1x128x128xf32> to vector<128x128xf32>
    %cst_169 = arith.constant dense<0.000000e+00> : vector<6x128xf32>
    %172 = tpu.matmul %169, %171, %cst_169 {dimension_numbers = #tpu.dot_dimension_numbers<[1], [0], [0], [1], [0, 0, 1, 1], [], []>} : vector<6x128xf32>, vector<128x128xf32>, vector<6x128xf32> -> vector<6x128xf32>
    %173 = arith.addf %168, %172 : vector<6x128xf32>
    %c0_170 = arith.constant 0 : index
    %c0_171 = arith.constant 0 : index
    %174 = vector.load %arg27[%c0_170, %c0_171] : memref<1x128xf32, #tpu.memory_space<vmem>>, vector<1x128xf32>
    %175 = vector.broadcast %174 : vector<1x128xf32> to vector<6x128xf32>
    %176 = arith.addf %173, %175 : vector<6x128xf32>
    %cst_172 = arith.constant 0.000000e+00 : f32
    %177 = vector.broadcast %cst_172 : f32 to vector<6x128xf32>
    %178 = arith.maximumf %176, %177 : vector<6x128xf32>
    %c0_173 = arith.constant 0 : index
    %c0_174 = arith.constant 0 : index
    %179 = vector.load %arg28[%c0_173, %c0_174] : memref<1x128xf32, #tpu.memory_space<vmem>>, vector<1x128xf32>
    %180 = vector.broadcast %179 : vector<1x128xf32> to vector<6x128xf32>
    %181 = arith.mulf %178, %180 : vector<6x128xf32>
    %c0_175 = arith.constant 0 : index
    %c0_176 = arith.constant 0 : index
    %182 = vector.load %arg29[%c0_175, %c0_176] : memref<1x128xf32, #tpu.memory_space<vmem>>, vector<1x128xf32>
    %183 = vector.broadcast %182 : vector<1x128xf32> to vector<6x128xf32>
    %184 = arith.addf %181, %183 : vector<6x128xf32>
    %185 = vector.extract_strided_slice %184 {offsets = [0, 0], sizes = [2, 128], strides = [1, 1]} : vector<6x128xf32> to vector<2x128xf32>
    %c0_177 = arith.constant 0 : index
    %c0_178 = arith.constant 0 : index
    %c0_179 = arith.constant 0 : index
    %186 = vector.load %arg30[%c0_177, %c0_178, %c0_179] : memref<1x4x128xf32, #tpu.memory_space<vmem>>, vector<1x2x128xf32>
    %187 = vector.shape_cast %186 : vector<1x2x128xf32> to vector<2x128xf32>
    %188 = vector.shape_cast %185 : vector<2x128xf32> to vector<1x2x128xf32>
    tpu.vector_store %arg30[%c0_177, %c0_178, %c0_179], %188 {strides = array<i32>} : memref<1x4x128xf32, #tpu.memory_space<vmem>>, vector<1x2x128xf32>,
    %189 = vector.extract_strided_slice %184 {offsets = [4, 0], sizes = [2, 128], strides = [1, 1]} : vector<6x128xf32> to vector<2x128xf32>
    %c0_180 = arith.constant 0 : index
    %c2_181 = arith.constant 2 : index
    %c0_182 = arith.constant 0 : index
    %190 = vector.load %arg30[%c0_180, %c2_181, %c0_182] : memref<1x4x128xf32, #tpu.memory_space<vmem>>, vector<1x2x128xf32>
    %191 = vector.shape_cast %190 : vector<1x2x128xf32> to vector<2x128xf32>
    %192 = vector.shape_cast %189 : vector<2x128xf32> to vector<1x2x128xf32>
    tpu.vector_store %arg30[%c0_180, %c2_181, %c0_182], %192 {strides = array<i32>} : memref<1x4x128xf32, #tpu.memory_space<vmem>>, vector<1x2x128xf32>,
    return
  }
  func.func @transform_0(%arg0: i32) -> (i32, i32, i32) {
    %c0_i32 = arith.constant 0 : i32
    %c0_i32_0 = arith.constant 0 : i32
    %c0_i32_1 = arith.constant 0 : i32
    return %arg0, %c0_i32, %c0_i32_0 : i32, i32, i32
  }
  func.func @transform_1(%arg0: i32) -> (i32, i32, i32) {
    %c0_i32 = arith.constant 0 : i32
    %c0_i32_0 = arith.constant 0 : i32
    %c0_i32_1 = arith.constant 0 : i32
    %c0_i32_2 = arith.constant 0 : i32
    return %c0_i32, %c0_i32_0, %c0_i32_1 : i32, i32, i32
  }
  func.func @transform_2(%arg0: i32) -> (i32, i32) {
    %c0_i32 = arith.constant 0 : i32
    %c0_i32_0 = arith.constant 0 : i32
    %c0_i32_1 = arith.constant 0 : i32
    return %c0_i32, %c0_i32_0 : i32, i32
  }
  func.func @transform_3(%arg0: i32) -> (i32, i32) {
    %c0_i32 = arith.constant 0 : i32
    %c0_i32_0 = arith.constant 0 : i32
    %c0_i32_1 = arith.constant 0 : i32
    return %c0_i32, %c0_i32_0 : i32, i32
  }
  func.func @transform_4(%arg0: i32) -> (i32, i32) {
    %c0_i32 = arith.constant 0 : i32
    %c0_i32_0 = arith.constant 0 : i32
    %c0_i32_1 = arith.constant 0 : i32
    return %c0_i32, %c0_i32_0 : i32, i32
  }
  func.func @transform_5(%arg0: i32) -> (i32, i32, i32) {
    %c0_i32 = arith.constant 0 : i32
    %c0_i32_0 = arith.constant 0 : i32
    %c0_i32_1 = arith.constant 0 : i32
    %c0_i32_2 = arith.constant 0 : i32
    return %c0_i32, %c0_i32_0, %c0_i32_1 : i32, i32, i32
  }
  func.func @transform_6(%arg0: i32) -> (i32, i32) {
    %c0_i32 = arith.constant 0 : i32
    %c0_i32_0 = arith.constant 0 : i32
    %c0_i32_1 = arith.constant 0 : i32
    return %c0_i32, %c0_i32_0 : i32, i32
  }
  func.func @transform_7(%arg0: i32) -> (i32, i32) {
    %c0_i32 = arith.constant 0 : i32
    %c0_i32_0 = arith.constant 0 : i32
    %c0_i32_1 = arith.constant 0 : i32
    return %c0_i32, %c0_i32_0 : i32, i32
  }
  func.func @transform_8(%arg0: i32) -> (i32, i32) {
    %c0_i32 = arith.constant 0 : i32
    %c0_i32_0 = arith.constant 0 : i32
    %c0_i32_1 = arith.constant 0 : i32
    return %c0_i32, %c0_i32_0 : i32, i32
  }
  func.func @transform_9(%arg0: i32) -> (i32, i32) {
    %c0_i32 = arith.constant 0 : i32
    %c0_i32_0 = arith.constant 0 : i32
    %c0_i32_1 = arith.constant 0 : i32
    return %c0_i32, %c0_i32_0 : i32, i32
  }
  func.func @transform_10(%arg0: i32) -> (i32, i32) {
    %c0_i32 = arith.constant 0 : i32
    %c0_i32_0 = arith.constant 0 : i32
    %c0_i32_1 = arith.constant 0 : i32
    return %c0_i32, %c0_i32_0 : i32, i32
  }
  func.func @transform_11(%arg0: i32) -> (i32, i32, i32) {
    %c0_i32 = arith.constant 0 : i32
    %c0_i32_0 = arith.constant 0 : i32
    %c0_i32_1 = arith.constant 0 : i32
    %c0_i32_2 = arith.constant 0 : i32
    return %c0_i32, %c0_i32_0, %c0_i32_1 : i32, i32, i32
  }
  func.func @transform_12(%arg0: i32) -> (i32, i32) {
    %c0_i32 = arith.constant 0 : i32
    %c0_i32_0 = arith.constant 0 : i32
    %c0_i32_1 = arith.constant 0 : i32
    return %c0_i32, %c0_i32_0 : i32, i32
  }
  func.func @transform_13(%arg0: i32) -> (i32, i32) {
    %c0_i32 = arith.constant 0 : i32
    %c0_i32_0 = arith.constant 0 : i32
    %c0_i32_1 = arith.constant 0 : i32
    return %c0_i32, %c0_i32_0 : i32, i32
  }
  func.func @transform_14(%arg0: i32) -> (i32, i32) {
    %c0_i32 = arith.constant 0 : i32
    %c0_i32_0 = arith.constant 0 : i32
    %c0_i32_1 = arith.constant 0 : i32
    return %c0_i32, %c0_i32_0 : i32, i32
  }
  func.func @transform_15(%arg0: i32) -> (i32, i32, i32) {
    %c0_i32 = arith.constant 0 : i32
    %c0_i32_0 = arith.constant 0 : i32
    %c0_i32_1 = arith.constant 0 : i32
    %c0_i32_2 = arith.constant 0 : i32
    return %c0_i32, %c0_i32_0, %c0_i32_1 : i32, i32, i32
  }
  func.func @transform_16(%arg0: i32) -> (i32, i32) {
    %c0_i32 = arith.constant 0 : i32
    %c0_i32_0 = arith.constant 0 : i32
    %c0_i32_1 = arith.constant 0 : i32
    return %c0_i32, %c0_i32_0 : i32, i32
  }
  func.func @transform_17(%arg0: i32) -> (i32, i32) {
    %c0_i32 = arith.constant 0 : i32
    %c0_i32_0 = arith.constant 0 : i32
    %c0_i32_1 = arith.constant 0 : i32
    return %c0_i32, %c0_i32_0 : i32, i32
  }
  func.func @transform_18(%arg0: i32) -> (i32, i32) {
    %c0_i32 = arith.constant 0 : i32
    %c0_i32_0 = arith.constant 0 : i32
    %c0_i32_1 = arith.constant 0 : i32
    return %c0_i32, %c0_i32_0 : i32, i32
  }
  func.func @transform_19(%arg0: i32) -> (i32, i32) {
    %c0_i32 = arith.constant 0 : i32
    %c0_i32_0 = arith.constant 0 : i32
    %c0_i32_1 = arith.constant 0 : i32
    return %c0_i32, %c0_i32_0 : i32, i32
  }
  func.func @transform_20(%arg0: i32) -> (i32, i32) {
    %c0_i32 = arith.constant 0 : i32
    %c0_i32_0 = arith.constant 0 : i32
    %c0_i32_1 = arith.constant 0 : i32
    return %c0_i32, %c0_i32_0 : i32, i32
  }
  func.func @transform_21(%arg0: i32) -> (i32, i32, i32) {
    %c0_i32 = arith.constant 0 : i32
    %c0_i32_0 = arith.constant 0 : i32
    %c0_i32_1 = arith.constant 0 : i32
    %c0_i32_2 = arith.constant 0 : i32
    return %c0_i32, %c0_i32_0, %c0_i32_1 : i32, i32, i32
  }
  func.func @transform_22(%arg0: i32) -> (i32, i32) {
    %c0_i32 = arith.constant 0 : i32
    %c0_i32_0 = arith.constant 0 : i32
    %c0_i32_1 = arith.constant 0 : i32
    return %c0_i32, %c0_i32_0 : i32, i32
  }
  func.func @transform_23(%arg0: i32) -> (i32, i32) {
    %c0_i32 = arith.constant 0 : i32
    %c0_i32_0 = arith.constant 0 : i32
    %c0_i32_1 = arith.constant 0 : i32
    return %c0_i32, %c0_i32_0 : i32, i32
  }
  func.func @transform_24(%arg0: i32) -> (i32, i32) {
    %c0_i32 = arith.constant 0 : i32
    %c0_i32_0 = arith.constant 0 : i32
    %c0_i32_1 = arith.constant 0 : i32
    return %c0_i32, %c0_i32_0 : i32, i32
  }
  func.func @transform_25(%arg0: i32) -> (i32, i32, i32) {
    %c0_i32 = arith.constant 0 : i32
    %c0_i32_0 = arith.constant 0 : i32
    %c0_i32_1 = arith.constant 0 : i32
    %c0_i32_2 = arith.constant 0 : i32
    return %c0_i32, %c0_i32_0, %c0_i32_1 : i32, i32, i32
  }
  func.func @transform_26(%arg0: i32) -> (i32, i32) {
    %c0_i32 = arith.constant 0 : i32
    %c0_i32_0 = arith.constant 0 : i32
    %c0_i32_1 = arith.constant 0 : i32
    return %c0_i32, %c0_i32_0 : i32, i32
  }
  func.func @transform_27(%arg0: i32) -> (i32, i32) {
    %c0_i32 = arith.constant 0 : i32
    %c0_i32_0 = arith.constant 0 : i32
    %c0_i32_1 = arith.constant 0 : i32
    return %c0_i32, %c0_i32_0 : i32, i32
  }
  func.func @transform_28(%arg0: i32) -> (i32, i32) {
    %c0_i32 = arith.constant 0 : i32
    %c0_i32_0 = arith.constant 0 : i32
    %c0_i32_1 = arith.constant 0 : i32
    return %c0_i32, %c0_i32_0 : i32, i32
  }
  func.func @transform_29(%arg0: i32) -> (i32, i32, i32) {
    %c0_i32 = arith.constant 0 : i32
    %c0_i32_0 = arith.constant 0 : i32
    %c0_i32_1 = arith.constant 0 : i32
    return %arg0, %c0_i32, %c0_i32_0 : i32, i32, i32
  }
}

</mosaic_0001>

<bundles_post_ra>
// kernel: _lambda_.1
= control target key start
LH: loop header
LB: loop body
LE: loop exit
PB: predicated region body
PF: predicated region fallthrough
CT: control target
= control target key end

     0   :  { %s7008_s6 = smov 1   ;;  %s7009_s10 = smov 2   ;;  %s8306_s0 = inlined_call_operand.smem [shape: u32[30], index: -1, kind: input, shape index: {}] }
   0x1   :  { %s7051_s5 = sld [smem:[%s8306_s0]]   ;;  %s7010_s14 = smov 3  }
   0x2   :  { %s7056_s9 = sld [smem:[%s8306_s0 + %s7008_s6]]   ;;  %s7011_s18 = smov 4  }
   0x3   :  { %s7061_s13 = sld [smem:[%s8306_s0 + %s7009_s10]]   ;;  %s7012_s22 = smov 5  }
   0x4   :  { %s7066_s17 = sld [smem:[%s8306_s0 + %s7010_s14]]   ;;  %s7013_s26 = smov 6  }
   0x5   :  { %s7071_s21 = sld [smem:[%s8306_s0 + %s7011_s18]]   ;;  %s7014_s30 = smov 7  }
   0x6   :  { %s7076_s25 = sld [smem:[%s8306_s0 + %s7012_s22]]   ;;  %s7015_s4 = smov 8  }
   0x7   :  { %8321 = sst [smem:[#allocation10_spill]] %s7051_s5  ;;  %s7016_s10 = smov 9  }
   0x8   :  { %8322 = sst [smem:[#allocation11_spill]] %s7056_s9  ;;  %s7017_s15 = smov 10  }
   0x9   :  { %8323 = sst [smem:[#allocation12_spill]] %s7061_s13  ;;  %s7018_s20 = smov 11  }
   0xa   :  { %s7081_s29 = sld [smem:[%s8306_s0 + %s7013_s26]]   ;;  %s7019_s26 = smov 12  }
   0xb   :  { %s7086_s3 = sld [smem:[%s8306_s0 + %s7014_s30]]   ;;  %s7020_s1 = smov 13  }
   0xc   :  { %s7091_s8 = sld [smem:[%s8306_s0 + %s7015_s4]]   ;;  %s7021_s7 = smov 14  }
   0xd   :  { %s7096_s14 = sld [smem:[%s8306_s0 + %s7016_s10]]   ;;  %s7023_s22 = smov 16  }
   0xe   :  { %s7101_s19 = sld [smem:[%s8306_s0 + %s7017_s15]]   ;;  %s7022_s15 = smov 15  }
   0xf   :  { %s7106_s24 = sld [smem:[%s8306_s0 + %s7018_s20]]   ;;  %s7024_s28 = smov 17  }
  0x10   :  { %s7111_s30 = sld [smem:[%s8306_s0 + %s7019_s26]]  }
  0x11   :  { %8324 = sst [smem:[#allocation13_spill]] %s7086_s3 }
  0x12   :  { %8325 = sst [smem:[#allocation14_spill]] %s7091_s8 }
  0x13   :  { %8326 = sst [smem:[#allocation15_spill]] %s7096_s14 }
  0x14   :  { %s7116_s6 = sld [smem:[%s8306_s0 + %s7020_s1]]  }
  0x15   :  { %s7121_s12 = sld [smem:[%s8306_s0 + %s7021_s7]]   ;;  %s7025_s7 = smov 18  }
  0x16   :  { %s7126_s20 = sld [smem:[%s8306_s0 + %s7022_s15]]   ;;  %s7026_s15 = smov 19  }
  0x17   :  { %s7131_s27 = sld [smem:[%s8306_s0 + %s7023_s22]]   ;;  %s7027_s22 = smov 20  }
  0x18   :  { %s7136_s4 = sld [smem:[%s8306_s0 + %s7024_s28]]   ;;  %s7028_s28 = smov 21  }
  0x1a   :  { %8327 = sst [smem:[#allocation16_spill]] %s7116_s6 }
  0x1b   :  { %8328 = sst [smem:[#allocation17_spill]] %s7121_s12 }
  0x1c   :  { %8329 = sst [smem:[#allocation18_spill]] %s7126_s20 }
  0x1d   :  { %8330 = sst [smem:[#allocation19_spill]] %s7131_s27 }
  0x1e   :  { %8331 = sst [smem:[#allocation20_spill]] %s7136_s4 }
  0x1f   :  { %s7141_s12 = sld [smem:[%s8306_s0 + %s7025_s7]]   ;;  %s7029_s7 = smov 22  }
  0x20   :  { %s7146_s20 = sld [smem:[%s8306_s0 + %s7026_s15]]   ;;  %s7030_s15 = smov 23  }
  0x21   :  { %s7151_s27 = sld [smem:[%s8306_s0 + %s7027_s22]]   ;;  %s7031_s22 = smov 24  }
  0x22   :  { %s7156_s4 = sld [smem:[%s8306_s0 + %s7028_s28]]   ;;  %s7032_s28 = smov 25  }
  0x25   :  { %8332 = sst [smem:[#allocation21_spill]] %s7141_s12 }
  0x26   :  { %8333 = sst [smem:[#allocation22_spill]] %s7146_s20 }
  0x27   :  { %8334 = sst [smem:[#allocation23_spill]] %s7151_s27 }
  0x28   :  { %8335 = sst [smem:[#allocation24_spill]] %s7156_s4 }
  0x29   :  { %s7161_s12 = sld [smem:[%s8306_s0 + %s7029_s7]]   ;;  %s7033_s7 = smov 26  }
  0x2a   :  { %s7166_s20 = sld [smem:[%s8306_s0 + %s7030_s15]]   ;;  %s7034_s15 = smov 27  }
  0x2b   :  { %s7171_s27 = sld [smem:[%s8306_s0 + %s7031_s22]]   ;;  %s7035_s22 = smov 28  }
  0x2c   :  { %s7176_s4 = sld [smem:[%s8306_s0 + %s7032_s28]]   ;;  %s7036_s28 = smov 29  }
  0x2f   :  { %8336 = sst [smem:[#allocation25_spill]] %s7161_s12 }
  0x30   :  { %8337 = sst [smem:[#allocation26_spill]] %s7166_s20 }
  0x31   :  { %8338 = sst [smem:[#allocation27_spill]] %s7171_s27 }
  0x32   :  { %8339 = sst [smem:[#allocation28_spill]] %s7176_s4 }
  0x33   :  { %s7181_s12 = sld [smem:[%s8306_s0 + %s7033_s7]]  }
  0x34   :  { %s7186_s20 = sld [smem:[%s8306_s0 + %s7034_s15]]  }
  0x35   :  { %s7191_s27 = sld [smem:[%s8306_s0 + %s7035_s22]]  }
  0x36   :  { %s7196_s4 = sld [smem:[%s8306_s0 + %s7036_s28]]  }
  0x39   :  { %8340 = sst [smem:[#allocation29_spill]] %s7181_s12 }
  0x3a   :  { %64 = vsyncpa [#allocation8], 0 }
  0x3b   :  { %66 = vsyncpa [#allocation8 + $0x1], 0  ;;  %s7198_s7 = smov 0   ;;  %s7200_s10 = smov 0  }
  0x3c   :  { %s7202_s11 = smov 0   ;;  %s7204_s15 = smov 0  }
  0x3d LB: > { %s8341_s14 = sld [smem:[#allocation15_spill]]  ;;  %s8342_s9 = sld [smem:[#allocation11_spill]]  ;;  %s7002_s11 = sphi %s7202_s11, %s8366_s11   ;;  %s6998_s10 = sphi %s7200_s10, %s8365_s10   ;;  %s6994_s7 = sphi %s7198_s7, %s8364_s7   ;;  %s7006_s15 = sphi %s7204_s15, %s8367_s15  }
  0x3e   : > { %s8343_s6 = sld [smem:[#allocation16_spill]]  ;;  %s7219_s0 = sadd.s32 4294967295, %s7006_s15  }
  0x3f   : > { %s4551_s16 = sadd.s32 4294967294, %s7006_s15   ;;  %s7223_s18 = sadd.s32 1, %s7006_s15  }
  0x40   : > { %s693_s22 = sadd.s32 1, %s7002_s11  ;;  %s690_s23 = ssub.s32 %s7006_s15, %s7223_s18 }
  0x41   : > { %p703_p0 = scmp.ne.s32.totalorder %s7002_s11, %s6998_s10  ;;  %p691_p1 = scmp.eq.s32.totalorder %s690_s23, 0 }
  0x42   : > { %p704_p2 = scmp.eq.s32.totalorder %s7219_s0, 1  ;;  %p709_p3 = scmp.ne.s32.totalorder %s6998_s10, %s6994_s7 }
  0x43   : > { %p710_p4 = scmp.eq.s32.totalorder %s4551_s16, 1  ;;  %p4554_p7 = scmp.ge.s32.totalorder %s7006_s15, 1 }
  0x44   : > { %s7234_s26 = scalar_select %p691_p1, %s7002_s11, %s693_s22  }
  0x45   : > { %p7236_p5 = por %p704_p2, %p703_p0  ;;  %p7240_p6 = por %p710_p4, %p709_p3 }
  0x46   : > { %p820_p8 = scmp.lt.s32.totalorder %s7006_s15, 3 }
  0x48   : > { %p821_p9 = pnand %p4554_p7, %p820_p8 }
  0x49   : > { %v4557_v0 = vld [vmem:[%s8342_s9 + $0x80] sm:$0xff] (!%p821_p9)  ;;  %v4558_v1 = vld [vmem:[%s8342_s9 + $0x88] sm:$0xff] (!%p821_p9)  ;;  %v7037_v3 = vmov (!%p821_p9), 0.0|0.0   ;;  %v4559_v6 = vld [vmem:[%s8342_s9 + $0x90] sm:$0xff] (!%p821_p9)  ;;  %vm7038_vm0 = vmmov (!%p821_p9), 0   ;;  %v7039_v11 = vmov (!%p821_p9), 0.0  }
  0x4a   : > { %824 = sbr.rel (%p821_p9) target bundleno = 3655 (0xe47), region = 136  ;;  %v918_v2 = vld [vmem:[%s8342_s9] sm:$0xff] (!%p821_p9)  ;;  %6310 = vmatprep.subr.bf16.mxu0 (!%p821_p9), %v7037_v3  ;;  %6334 = vmatprep.subr.bf16.mxu1 (!%p821_p9), %v7037_v3  ;;  %v6311_v4 = vpack.c.bf16 (!%p821_p9), %v4558_v1, %v4557_v0  ;;  %v919_v5 = vld [vmem:[%s8342_s9 + $0x8] sm:$0xff] (!%p821_p9)  ;;  %v4560_v7 = vld [vmem:[%s8342_s9 + $0x98] sm:$0xff] (!%p821_p9)  ;;  %p896_p10 = scmp.lt.s32.totalorder (!%p821_p9), %s7219_s0, 1  ;;  %vm1528_vm1 = vcmask (!%p821_p9), 15360  }
  0x4b   : > { %v6335_v8 = vpack.c.bf16 (!%p821_p9), %v919_v5, %v918_v2  ;;  %v920_v9 = vld [vmem:[%s8342_s9 + $0x10] sm:$0xff] (!%p821_p9)  ;;  %v921_v10 = vld [vmem:[%s8342_s9 + $0x18] sm:$0xff] (!%p821_p9)  ;;  %5306 = vmatprep.mubr.msk.f32.mxu0 (!%p821_p9), %vm7038_vm0, %v7039_v11  ;;  %5389 = vmatprep.mubr.msk.f32.mxu1 (!%p821_p9), %vm7038_vm0, %v7039_v11  ;;  %v6314_v12 = vpack.c.bf16 (!%p821_p9), %v4560_v7, %v4559_v6  ;;  %v4561_v14 = vld [vmem:[%s8342_s9 + $0xa0] sm:$0xff] (!%p821_p9)  ;;  %s8346_s5 = sld [smem:[#allocation10_spill]] (!%p821_p9)  ;;  %s8347_s13 = sld [smem:[#allocation12_spill]] (!%p821_p9)  ;;  %vm1556_vm2 = vcmask (!%p821_p9), 1041408  }
  0x4c   : > { %6312 = vmatpush3.bf16.msra.mxu0 (!%p821_p9), %v6311_v4  ;;  %v6338_v13 = vpack.c.bf16 (!%p821_p9), %v921_v10, %v920_v9  ;;  %v4562_v15 = vld [vmem:[%s8342_s9 + $0xa8] sm:$0xff] (!%p821_p9)  ;;  %v922_v16 = vld [vmem:[%s8342_s9 + $0x20] sm:$0xff] (!%p821_p9)  ;;  %v4563_v20 = vld [vmem:[%s8342_s9 + $0xb0] sm:$0xff] (!%p821_p9)  ;;  %s8313_s23 = smov (!%p821_p9), 127   ;;  %s8348_s3 = sld [smem:[#allocation13_spill]] (!%p821_p9)  ;;  %vm2366_vm3 = vcmask (!%p821_p9), 539648  }
  0x4d   : > { %6336 = vmatpush3.bf16.msra.mxu1 (!%p821_p9), %v6335_v8  ;;  %6313 = vmatprep.subr.bf16.mxu0 (!%p821_p9), %v7037_v3  ;;  %v923_v17 = vld [vmem:[%s8342_s9 + $0x28] sm:$0xff] (!%p821_p9)  ;;  %v6317_v18 = vpack.c.bf16 (!%p821_p9), %v4562_v15, %v4561_v14  ;;  %v4564_v21 = vld [vmem:[%s8342_s9 + $0xb8] sm:$0xff] (!%p821_p9)  ;;  %v924_v22 = vld [vmem:[%s8342_s9 + $0x30] sm:$0xff] (!%p821_p9)  ;;  %s8349_s8 = sld [smem:[#allocation14_spill]] (!%p821_p9)  ;;  %vm2980_vm4 = vcmask (!%p821_p9), 277504   ;;  %vm3523_vm5 = vcmask (!%p821_p9), 146432  }
  0x4e   : > { %6337 = vmatprep.subr.bf16.mxu1 (!%p821_p9), %v7037_v3  ;;  %v6341_v19 = vpack.c.bf16 (!%p821_p9), %v923_v17, %v922_v16  ;;  %v925_v23 = vld [vmem:[%s8342_s9 + $0x38] sm:$0xff] (!%p821_p9)  ;;  %v6320_v24 = vpack.c.bf16 (!%p821_p9), %v4564_v21, %v4563_v20  ;;  %v4565_v26 = vld [vmem:[%s8342_s9 + $0xc0] sm:$0xff] (!%p821_p9)  ;;  %v4566_v27 = vld [vmem:[%s8342_s9 + $0xc8] sm:$0xff] (!%p821_p9)  ;;  %vm7041_vm6 = vmmov (!%p821_p9), 1   ;;  %vm4000_vm8 = vcmask (!%p821_p9), 80896   ;;  %s8363_s12 = sld [smem:[#allocation29_spill]] (!%p821_p9) }
  0x4f   : > { %v6344_v25 = vpack.c.bf16 (!%p821_p9), %v925_v23, %v924_v22  ;;  %v926_v28 = vld [vmem:[%s8342_s9 + $0x40] sm:$0xff] (!%p821_p9)  ;;  %v927_v29 = vld [vmem:[%s8342_s9 + $0x48] sm:$0xff] (!%p821_p9)  ;;  %v6323_v30 = vpack.c.bf16 (!%p821_p9), %v4566_v27, %v4565_v26  ;;  %v4567_v32 = vld [vmem:[%s8342_s9 + $0xd0] sm:$0xff] (!%p821_p9) }
  0x50   : > { %6315 = vmatpush3.bf16.msra.mxu0 (!%p821_p9), %v6314_v12  ;;  %v6347_v31 = vpack.c.bf16 (!%p821_p9), %v927_v29, %v926_v28  ;;  %v4568_v33 = vld [vmem:[%s8342_s9 + $0xd8] sm:$0xff] (!%p821_p9)  ;;  %v928_v34 = vld [vmem:[%s8342_s9 + $0x50] sm:$0xff] (!%p821_p9)  ;;  %v4569_v38 = vld [vmem:[%s8342_s9 + $0xe0] sm:$0xff] (!%p821_p9) }
  0x51   : > { %6339 = vmatpush3.bf16.msra.mxu1 %v6338_v13  ;;  %6316 = vmatprep.subr.bf16.mxu0 %v7037_v3  ;;  %v929_v35 = vld [vmem:[%s8342_s9 + $0x58] sm:$0xff]  ;;  %v6326_v36 = vpack.c.bf16 %v4568_v33, %v4567_v32  ;;  %v4570_v39 = vld [vmem:[%s8342_s9 + $0xe8] sm:$0xff]  ;;  %s897_s2 = scalar_select %p896_p10, %s7219_s0, 1  ;;  %v930_v40 = vld [vmem:[%s8342_s9 + $0x60] sm:$0xff] }
  0x52   : > { %6340 = vmatprep.subr.bf16.mxu1 %v7037_v3  ;;  %v6350_v37 = vpack.c.bf16 %v929_v35, %v928_v34  ;;  %v931_v41 = vld [vmem:[%s8342_s9 + $0x68] sm:$0xff]  ;;  %v6329_v42 = vpack.c.bf16 %v4570_v39, %v4569_v38  ;;  %v4571_v44 = vld [vmem:[%s8342_s9 + $0xf0] sm:$0xff]  ;;  %v4572_v45 = vld [vmem:[%s8342_s9 + $0xf8] sm:$0xff] }
  0x53   : > { %v6353_v43 = vpack.c.bf16 %v931_v41, %v930_v40  ;;  %s6870_s16 = smul.u32 136, %s897_s2  ;;  %v932_v46 = vld [vmem:[%s8342_s9 + $0x70] sm:$0xff]  ;;  %v933_v47 = vld [vmem:[%s8342_s9 + $0x78] sm:$0xff]  ;;  %v6332_v48 = vpack.c.bf16 %v4572_v45, %v4571_v44  ;;  %v4573_v50 = vld [vmem:[%s8342_s9 + $0x100] sm:$0xff]  ;;  %s8350_s2 = sld [smem:[#allocation17_spill]] }
  0x54   : > { %6318 = vmatpush3.bf16.msra.mxu0 %v6317_v18  ;;  %v6356_v49 = vpack.c.bf16 %v933_v47, %v932_v46  ;;  %v4574_v51 = vld [vmem:[%s8342_s9 + $0x108] sm:$0xff]  ;;  %v4575_v55 = vld [vmem:[%s8342_s9 + $0x110] sm:$0xff]  ;;  %v4576_v56 = vld [vmem:[%s8342_s9 + $0x118] sm:$0xff] }
  0x55   : > { %6342 = vmatpush3.bf16.msra.mxu1 %v6341_v19  ;;  %6319 = vmatprep.subr.bf16.mxu0 %v7037_v3  ;;  %s7300_s22 = scalar_lea.vmem %s8346_s5, %s6870_s16  ;;  %v6359_v54 = vpack.c.bf16 %v4574_v51, %v4573_v50  ;;  %v6362_v59 = vpack.c.bf16 %v4576_v56, %v4575_v55  ;;  %v4577_v60 = vld [vmem:[%s8342_s9 + $0x120] sm:$0xff]  ;;  %v4578_v61 = vld [vmem:[%s8342_s9 + $0x128] sm:$0xff]  ;;  %v4579_v1 = vld [vmem:[%s8342_s9 + $0x130] sm:$0xff]  ;;  %s8351_s16 = sld [smem:[#allocation18_spill]] }
  0x56   : > { %6343 = vmatprep.subr.bf16.mxu1 %v7037_v3  ;;  %v934_v52 = vld [vmem:[%s7300_s22 + $0x1] sm:$0xff]  ;;  %v935_v57 = vld [vmem:[%s7300_s22 + $0x9] sm:$0xff]  ;;  %v936_v62 = vld [vmem:[%s7300_s22 + $0x11] sm:$0xff]  ;;  %v6365_v0 = vpack.c.bf16 %v4578_v61, %v4577_v60  ;;  %s8356_s5 = sld [smem:[#allocation21_spill]] }
  0x57   : > { %v901_v53 = vld [vmem:[%s7300_s22] sm:$0xff]  ;;  %v902_v58 = vld [vmem:[%s7300_s22 + $0x8] sm:$0xff]  ;;  %v903_v63 = vld [vmem:[%s7300_s22 + $0x10] sm:$0xff] }
  0x58   : > { %6321 = vmatpush3.bf16.msra.mxu0 %v6320_v24  ;;  %v4580_v2 = vld [vmem:[%s8342_s9 + $0x138] sm:$0xff]  ;;  %v4581_v7 = vld [vmem:[%s8342_s9 + $0x140] sm:$0xff]  ;;  %v4582_v8 = vld [vmem:[%s8342_s9 + $0x148] sm:$0xff] }
  0x59   : > { %6345 = vmatpush3.bf16.msra.mxu1 %v6344_v25  ;;  %6322 = vmatprep.subr.bf16.mxu0 %v7037_v3  ;;  %v937_v4 = vld [vmem:[%s7300_s22 + $0x19] sm:$0xff]  ;;  %v6368_v6 = vpack.c.bf16 %v4580_v2, %v4579_v1  ;;  %v938_v9 = vld [vmem:[%s7300_s22 + $0x21] sm:$0xff]  ;;  %v6371_v12 = vpack.c.bf16 %v4582_v8, %v4581_v7  ;;  %v4583_v13 = vld [vmem:[%s8342_s9 + $0x150] sm:$0xff] }
  0x5a   : > { %6346 = vmatprep.subr.bf16.mxu1 %v7037_v3  ;;  %v904_v5 = vld [vmem:[%s7300_s22 + $0x18] sm:$0xff]  ;;  %v905_v10 = vld [vmem:[%s7300_s22 + $0x20] sm:$0xff]  ;;  %v939_v15 = vld [vmem:[%s7300_s22 + $0x29] sm:$0xff] }
  0x5b   : > { %v4584_v14 = vld [vmem:[%s8342_s9 + $0x158] sm:$0xff]  ;;  %v906_v16 = vld [vmem:[%s7300_s22 + $0x28] sm:$0xff]  ;;  %v4585_v18 = vld [vmem:[%s8342_s9 + $0x160] sm:$0xff] }
  0x5c   : > { %6324 = vmatpush3.bf16.msra.mxu0 %v6323_v30  ;;  %v6374_v17 = vpack.c.bf16 %v4584_v14, %v4583_v13  ;;  %v4586_v19 = vld [vmem:[%s8342_s9 + $0x168] sm:$0xff]  ;;  %v940_v20 = vld [vmem:[%s7300_s22 + $0x31] sm:$0xff]  ;;  %v941_v25 = vld [vmem:[%s7300_s22 + $0x39] sm:$0xff] }
  0x5d   : > { %6348 = vmatpush3.bf16.msra.mxu1 %v6347_v31  ;;  %6325 = vmatprep.subr.bf16.mxu0 %v7037_v3  ;;  %v907_v21 = vld [vmem:[%s7300_s22 + $0x30] sm:$0xff]  ;;  %v6377_v22 = vpack.c.bf16 %v4586_v19, %v4585_v18  ;;  %v4588_v24 = vld [vmem:[%s8342_s9 + $0x178] sm:$0xff]  ;;  %v942_v28 = vld [vmem:[%s7300_s22 + $0x41] sm:$0xff] }
  0x5e   : > { %6349 = vmatprep.subr.bf16.mxu1 %v7037_v3  ;;  %v4587_v23 = vld [vmem:[%s8342_s9 + $0x170] sm:$0xff]  ;;  %v908_v26 = vld [vmem:[%s7300_s22 + $0x38] sm:$0xff]  ;;  %v909_v29 = vld [vmem:[%s7300_s22 + $0x40] sm:$0xff]  ;;  %s8362_s9 = sld [smem:[#allocation28_spill]] }
  0x5f   : > { %v6380_v27 = vpack.c.bf16 %v4588_v24, %v4587_v23  ;;  %v943_v30 = vld [vmem:[%s7300_s22 + $0x49] sm:$0xff]  ;;  %v944_v32 = vld [vmem:[%s7300_s22 + $0x51] sm:$0xff]  ;;  %v945_v34 = vld [vmem:[%s7300_s22 + $0x59] sm:$0xff] }
  0x60   : > { %6327 = vmatpush3.bf16.msra.mxu0 %v6326_v36  ;;  %v910_v31 = vld [vmem:[%s7300_s22 + $0x48] sm:$0xff]  ;;  %v911_v33 = vld [vmem:[%s7300_s22 + $0x50] sm:$0xff]  ;;  %v912_v35 = vld [vmem:[%s7300_s22 + $0x58] sm:$0xff] }
  0x61   : > { %6351 = vmatpush3.bf16.msra.mxu1 %v6350_v37  ;;  %6328 = vmatprep.subr.bf16.mxu0 %v7037_v3  ;;  %v946_v36 = vld [vmem:[%s7300_s22 + $0x61] sm:$0xff]  ;;  %v947_v38 = vld [vmem:[%s7300_s22 + $0x69] sm:$0xff]  ;;  %v948_v40 = vld [vmem:[%s7300_s22 + $0x71] sm:$0xff] }
  0x62   : > { %6352 = vmatprep.subr.bf16.mxu1 %v7037_v3  ;;  %v913_v37 = vld [vmem:[%s7300_s22 + $0x60] sm:$0xff]  ;;  %v914_v39 = vld [vmem:[%s7300_s22 + $0x68] sm:$0xff]  ;;  %v915_v41 = vld [vmem:[%s7300_s22 + $0x70] sm:$0xff] }
  0x63   : > { %v950_v44 = vld [vmem:[%s7300_s22 + $0x81] sm:$0x3]  ;;  %v1269_v47 = vld [vmem:[%s7300_s22 + $0xa] sm:$0xff]  ;;  %v1278_v56 = vld [vmem:[%s7300_s22 + $0x52] sm:$0xff] }
  0x64   : > { %6330 = vmatpush3.bf16.msra.mxu0 %v6329_v42  ;;  %v949_v42 = vld [vmem:[%s7300_s22 + $0x79] sm:$0xff]  ;;  %v1268_v46 = vld [vmem:[%s7300_s22 + $0x2] sm:$0xff]  ;;  %v1273_v51 = vld [vmem:[%s7300_s22 + $0x2a] sm:$0xff] }
  0x65   : > { %6354 = vmatpush3.bf16.msra.mxu1 %v6353_v43  ;;  %6331 = vmatprep.subr.bf16.mxu0 %v7037_v3  ;;  %v916_v43 = vld [vmem:[%s7300_s22 + $0x78] sm:$0xff]  ;;  %v917_v45 = vld [vmem:[%s7300_s22 + $0x80] sm:$0x3]  ;;  %v1272_v50 = vld [vmem:[%s7300_s22 + $0x22] sm:$0xff] }
  0x66   : > { %6355 = vmatprep.subr.bf16.mxu1 %v7037_v3  ;;  %v1277_v55 = vld [vmem:[%s7300_s22 + $0x4a] sm:$0xff]  ;;  %v1282_v60 = vld [vmem:[%s7300_s22 + $0x72] sm:$0xff]  ;;  %v1283_v61 = vld [vmem:[%s7300_s22 + $0x7a] sm:$0xff] }
  0x67   : > { %v1511_v19 = vld [vmem:[%s7066_s17 + $0x8] sm:$0xff]  ;;  %vm6788_vm7 = vmpackc.low %vm1556_vm2, %vm7041_vm6 }
  0x68   : > { %6333 = vmatpush3.bf16.msra.mxu0 %v6332_v48  ;;  %v1270_v48 = vld [vmem:[%s7300_s22 + $0x12] sm:$0xff] }
  0x69   : > { %6357 = vmatpush3.bf16.msra.mxu1 %v6356_v49  ;;  %6358 = vmatprep.subr.bf16.mxu0 %v7037_v3  ;;  %v1271_v49 = vld [vmem:[%s7300_s22 + $0x1a] sm:$0xff] }
  0x6a   : > { %6382 = vmatprep.subr.bf16.mxu1 %v7037_v3 }
  0x6b   : > { %5307 = vmatmul.mubr.f32.vlgmr.msra.gmra.mrb[0].mxu0 %v934_v52  ;;  %v1274_v52 = vld [vmem:[%s7300_s22 + $0x32] sm:$0xff] }
  0x6c   : > { %5390 = vmatmul.mubr.f32.vlgmr.msra.gmra.mrb[0].mxu1 %v901_v53  ;;  %5309 = vmatprep.mubr.msk.f32.mxu0 %vm7038_vm0, %v7039_v11  ;;  %v1275_v53 = vld [vmem:[%s7300_s22 + $0x3a] sm:$0xff] }
  0x6d   : > { %5392 = vmatprep.mubr.msk.f32.mxu1 %vm7038_vm0, %v7039_v11  ;;  %6360 = vmatpush3.bf16.msra.mxu0 %v6359_v54  ;;  %v1276_v54 = vld [vmem:[%s7300_s22 + $0x42] sm:$0xff] }
  0x6e   : > { %6361 = vmatprep.subr.bf16.mxu0 %v7037_v3 }
  0x6f   : > { %5310 = vmatmul.mubr.f32.gmra.mrb[2].mxu0 %v935_v57  ;;  %v1279_v57 = vld [vmem:[%s7300_s22 + $0x5a] sm:$0xff] }
  0x70   : > { %5393 = vmatmul.mubr.f32.gmra.mrb[2].mxu1 %v902_v58  ;;  %5312 = vmatprep.mubr.msk.f32.mxu0 %vm7038_vm0, %v7039_v11  ;;  %v1280_v58 = vld [vmem:[%s7300_s22 + $0x62] sm:$0xff] }
  0x71   : > { %5395 = vmatprep.mubr.msk.f32.mxu1 %vm7038_vm0, %v7039_v11  ;;  %6363 = vmatpush3.bf16.msra.mxu0 %v6362_v59  ;;  %v1281_v59 = vld [vmem:[%s7300_s22 + $0x6a] sm:$0xff] }
  0x72   : > { %6364 = vmatprep.subr.bf16.mxu0 %v7037_v3 }
  0x73   : > { %5313 = vmatmul.mubr.f32.gmra.mrb[4].mxu0 %v936_v62  ;;  %v1284_v62 = vld [vmem:[%s7300_s22 + $0x82] sm:$0x3]  ;;  %s8352_s22 = sld [smem:[#allocation22_spill]] }
  0x74   : > { %5396 = vmatmul.mubr.f32.gmra.mrb[4].mxu1 %v903_v63  ;;  %5315 = vmatprep.mubr.msk.f32.mxu0 %vm7038_vm0, %v7039_v11 }
  0x75   : > { %5398 = vmatprep.mubr.msk.f32.mxu1 %vm7038_vm0, %v7039_v11  ;;  %6366 = vmatpush3.bf16.msra.mxu0 %v6365_v0 }
  0x76   : > { %6367 = vmatprep.subr.bf16.mxu0 %v7037_v3 }
  0x77   : > { %5316 = vmatmul.mubr.f32.gmra.mrb[6].mxu0 %v937_v4 }
  0x78   : > { %5399 = vmatmul.mubr.f32.gmra.mrb[6].mxu1 %v904_v5  ;;  %5318 = vmatprep.mubr.msk.f32.mxu0 %vm7038_vm0, %v7039_v11 }
  0x79   : > { %5401 = vmatprep.mubr.msk.f32.mxu1 %vm7038_vm0, %v7039_v11  ;;  %6369 = vmatpush3.bf16.msra.mxu0 %v6368_v6 }
  0x7a   : > { %6370 = vmatprep.subr.bf16.mxu0 %v7037_v3 }
  0x7b   : > { %5319 = vmatmul.mubr.f32.gmra.mrb[8].mxu0 %v938_v9 }
  0x7c   : > { %5402 = vmatmul.mubr.f32.gmra.mrb[8].mxu1 %v905_v10  ;;  %5321 = vmatprep.mubr.msk.f32.mxu0 %vm7038_vm0, %v7039_v11 }
  0x7d   : > { %5404 = vmatprep.mubr.msk.f32.mxu1 %vm7038_vm0, %v7039_v11  ;;  %6372 = vmatpush3.bf16.msra.mxu0 %v6371_v12 }
  0x7e   : > { %6373 = vmatprep.subr.bf16.mxu0 %v7037_v3 }
  0x7f   : > { %5322 = vmatmul.mubr.f32.gmra.mrb[10].mxu0 %v939_v15 }
  0x80   : > { %5405 = vmatmul.mubr.f32.gmra.mrb[10].mxu1 %v906_v16  ;;  %5324 = vmatprep.mubr.msk.f32.mxu0 %vm7038_vm0, %v7039_v11 }
  0x81   : > { %5407 = vmatprep.mubr.msk.f32.mxu1 %vm7038_vm0, %v7039_v11  ;;  %6375 = vmatpush3.bf16.msra.mxu0 %v6374_v17 }
  0x82   : > { %6376 = vmatprep.subr.bf16.mxu0 %v7037_v3 }
  0x83   : > { %5325 = vmatmul.mubr.f32.gmra.mrb[12].mxu0 %v940_v20 }
  0x84   : > { %5408 = vmatmul.mubr.f32.gmra.mrb[12].mxu1 %v907_v21  ;;  %5327 = vmatprep.mubr.msk.f32.mxu0 %vm7038_vm0, %v7039_v11 }
  0x85   : > { %5410 = vmatprep.mubr.msk.f32.mxu1 %vm7038_vm0, %v7039_v11  ;;  %6378 = vmatpush3.bf16.msra.mxu0 %v6377_v22 }
  0x86   : > { %6379 = vmatprep.subr.bf16.mxu0 %v7037_v3 }
  0x87   : > { %5328 = vmatmul.mubr.f32.gmra.mrb[14].mxu0 %v941_v25 }
  0x88   : > { %5411 = vmatmul.mubr.f32.gmra.mrb[14].mxu1 %v908_v26  ;;  %5330 = vmatprep.mubr.msk.f32.mxu0 %vm7038_vm0, %v7039_v11 }
  0x89   : > { %5413 = vmatprep.mubr.msk.f32.mxu1 %vm7038_vm0, %v7039_v11  ;;  %6381 = vmatpush3.bf16.msra.mxu0 %v6380_v27 }
  0x8a   : > { %6430 = vmatprep.subr.bf16.mxu0 %v7037_v3 }
  0x8b   : > { %5331 = vmatmul.mubr.f32.gmra.mrb[16].mxu0 %v942_v28 }
  0x8c   : > { %5414 = vmatmul.mubr.f32.gmra.mrb[16].mxu1 %v909_v29  ;;  %5333 = vmatprep.mubr.msk.f32.mxu0 %vm7038_vm0, %v7039_v11 }
  0x8d   : > { %5416 = vmatprep.mubr.msk.f32.mxu1 %vm7038_vm0, %v7039_v11 }
  0x8f   : > { %5334 = vmatmul.mubr.f32.gmra.mrb[18].mxu0 %v943_v30 }
  0x90   : > { %5417 = vmatmul.mubr.f32.gmra.mrb[18].mxu1 %v910_v31  ;;  %5336 = vmatprep.mubr.msk.f32.mxu0 %vm7038_vm0, %v7039_v11 }
  0x91   : > { %5419 = vmatprep.mubr.msk.f32.mxu1 %vm7038_vm0, %v7039_v11 }
  0x93   : > { %5337 = vmatmul.mubr.f32.gmra.mrb[20].mxu0 %v944_v32 }
  0x94   : > { %5420 = vmatmul.mubr.f32.gmra.mrb[20].mxu1 %v911_v33  ;;  %5339 = vmatprep.mubr.msk.f32.mxu0 %vm7038_vm0, %v7039_v11 }
  0x95   : > { %5422 = vmatprep.mubr.msk.f32.mxu1 %vm7038_vm0, %v7039_v11 }
  0x97   : > { %5340 = vmatmul.mubr.f32.gmra.mrb[22].mxu0 %v945_v34 }
  0x98   : > { %5423 = vmatmul.mubr.f32.gmra.mrb[22].mxu1 %v912_v35  ;;  %5342 = vmatprep.mubr.msk.f32.mxu0 %vm7038_vm0, %v7039_v11 }
  0x99   : > { %5425 = vmatprep.mubr.msk.f32.mxu1 %vm7038_vm0, %v7039_v11 }
  0x9b   : > { %5343 = vmatmul.mubr.f32.gmra.mrb[24].mxu0 %v946_v36 }
  0x9c   : > { %5426 = vmatmul.mubr.f32.gmra.mrb[24].mxu1 %v913_v37  ;;  %5345 = vmatprep.mubr.msk.f32.mxu0 %vm7038_vm0, %v7039_v11 }
  0x9d   : > { %5428 = vmatprep.mubr.msk.f32.mxu1 %vm7038_vm0, %v7039_v11 }
  0x9f   : > { %5346 = vmatmul.mubr.f32.gmra.mrb[26].mxu0 %v947_v38 }
  0xa0   : > { %5429 = vmatmul.mubr.f32.gmra.mrb[26].mxu1 %v914_v39  ;;  %5348 = vmatprep.mubr.msk.f32.mxu0 %vm7038_vm0, %v7039_v11 }
  0xa1   : > { %5431 = vmatprep.mubr.msk.f32.mxu1 %vm7038_vm0, %v7039_v11 }
  0xa3   : > { %5349 = vmatmul.mubr.f32.gmra.mrb[28].mxu0 %v948_v40 }
  0xa4   : > { %5432 = vmatmul.mubr.f32.gmra.mrb[28].mxu1 %v915_v41  ;;  %5351 = vmatprep.mubr.msk.f32.mxu0 %vm7038_vm0, %v7039_v11 }
  0xa5   : > { %5434 = vmatprep.mubr.msk.f32.mxu1 %vm7038_vm0, %v7039_v11 }
  0xa7   : > { %5352 = vmatmul.mubr.f32.gmra.mrb[30].mxu0 %v949_v42 }
  0xa8   : > { %5435 = vmatmul.mubr.f32.gmra.mrb[30].mxu1 %v916_v43  ;;  %5354 = vmatprep.mubr.msk.f32.mxu0 %vm7038_vm0, %v7039_v11 }
  0xa9   : > { %5437 = vmatprep.mubr.msk.f32.mxu1 %vm7038_vm0, %v7039_v11 }
  0xab   : > { %5355 = vmatmul.mubr.f32.gmra.mrb[32].mxu0 %v950_v44 }
  0xac   : > { %5438 = vmatmul.mubr.f32.gmra.mrb[32].mxu1 %v917_v45  ;;  %5472 = vmatprep.mubr.msk.f32.mxu0 %vm7038_vm0, %v7039_v11 }
  0xad   : > { %4591 = vmatprep.mubr.msk.f32.mxu1 %vm1528_vm1, %v1511_v19 }
  0xaf   : > { %5473 = vmatmul.mubr.f32.vlgmr.msra.gmra.mrb[34].mxu0 %v1268_v46 }
  0xb0   : > { %5475 = vmatprep.mubr.msk.f32.mxu0 %vm7038_vm0, %v7039_v11 }
  0xb3   : > { %5476 = vmatmul.mubr.f32.gmra.mrb[36].mxu0 %v1269_v47 }
  0xb4   : > { %5478 = vmatprep.mubr.msk.f32.mxu0 %vm7038_vm0, %v7039_v11 }
  0xb7   : > { %5479 = vmatmul.mubr.f32.gmra.mrb[38].mxu0 %v1270_v48 }
  0xb8   : > { %5481 = vmatprep.mubr.msk.f32.mxu0 %vm7038_vm0, %v7039_v11 }
  0xbb   : > { %5482 = vmatmul.mubr.f32.gmra.mrb[40].mxu0 %v1271_v49 }
  0xbc   : > { %5484 = vmatprep.mubr.msk.f32.mxu0 %vm7038_vm0, %v7039_v11 }
  0xbf   : > { %5485 = vmatmul.mubr.f32.gmra.mrb[42].mxu0 %v1272_v50 }
  0xc0   : > { %5487 = vmatprep.mubr.msk.f32.mxu0 %vm7038_vm0, %v7039_v11 }
  0xc3   : > { %5488 = vmatmul.mubr.f32.gmra.mrb[44].mxu0 %v1273_v51 }
  0xc4   : > { %5490 = vmatprep.mubr.msk.f32.mxu0 %vm7038_vm0, %v7039_v11 }
  0xc7   : > { %5491 = vmatmul.mubr.f32.gmra.mrb[46].mxu0 %v1274_v52 }
  0xc8   : > { %5493 = vmatprep.mubr.msk.f32.mxu0 %vm7038_vm0, %v7039_v11 }
  0xcb   : > { %5494 = vmatmul.mubr.f32.gmra.mrb[48].mxu0 %v1275_v53 }
  0xcc   : > { %5496 = vmatprep.mubr.msk.f32.mxu0 %vm7038_vm0, %v7039_v11 }
  0xcf   : > { %5497 = vmatmul.mubr.f32.gmra.mrb[50].mxu0 %v1276_v54 }
  0xd0   : > { %5499 = vmatprep.mubr.msk.f32.mxu0 %vm7038_vm0, %v7039_v11 }
  0xd3   : > { %5500 = vmatmul.mubr.f32.gmra.mrb[52].mxu0 %v1277_v55 }
  0xd4   : > { %5502 = vmatprep.mubr.msk.f32.mxu0 %vm7038_vm0, %v7039_v11 }
  0xd7   : > { %5503 = vmatmul.mubr.f32.gmra.mrb[54].mxu0 %v1278_v56 }
  0xd8   : > { %5505 = vmatprep.mubr.msk.f32.mxu0 %vm7038_vm0, %v7039_v11 }
  0xdb   : > { %5506 = vmatmul.mubr.f32.gmra.mrb[56].mxu0 %v1279_v57 }
  0xdc   : > { %5508 = vmatprep.mubr.msk.f32.mxu0 %vm7038_vm0, %v7039_v11 }
  0xdf   : > { %5509 = vmatmul.mubr.f32.gmra.mrb[58].mxu0 %v1280_v58 }
  0xe0   : > { %5511 = vmatprep.mubr.msk.f32.mxu0 %vm7038_vm0, %v7039_v11 }
  0xe3   : > { %5512 = vmatmul.mubr.f32.gmra.mrb[60].mxu0 %v1281_v59 }
  0xe4   : > { %5514 = vmatprep.mubr.msk.f32.mxu0 %vm7038_vm0, %v7039_v11 }
  0xe7   : > { %5515 = vmatmul.mubr.f32.gmra.mrb[62].mxu0 %v1282_v60 }
  0xe8   : > { %5517 = vmatprep.mubr.msk.f32.mxu0 %vm7038_vm0, %v7039_v11 }
  0xeb   : > { %5518 = vmatmul.mubr.f32.gmra.mrb[64].mxu0 %v1283_v61 }
  0xec   : > { %5520 = vmatprep.mubr.msk.f32.mxu0 %vm7038_vm0, %v7039_v11 }
  0xef   : > { %5521 = vmatmul.mubr.f32.gmra.mrb[66].mxu0 %v1284_v62 }
  0xf0   : > { %5555 = vmatprep.mubr.msk.f32.mxu0 %vm7038_vm0, %v7039_v11 }
 0x13e   : > { %v1034_v63 = vpop.f32.mrb[0].mxu0 }
 0x13f   : > { %v1184_v0 = vpop.f32.mrb[0].mxu1  ;;  %v5308_v1 = vpop.f32.mrb[1].mxu0 }
 0x140   : > { %v7480_v2 = vadd.f32 %v1184_v0, %v1034_v63  ;;  %v5391_v4 = vpop.f32.mrb[1].mxu1 }
 0x142   : > { %v1039_v5 = vpop.f32.mrb[2].mxu0 }
 0x143   : > { %v1189_v6 = vpop.f32.mrb[2].mxu1  ;;  %v5311_v7 = vpop.f32.mrb[3].mxu0 }
 0x144   : > { %v7482_v8 = vadd.f32 %v1189_v6, %v1039_v5  ;;  %v5394_v9 = vpop.f32.mrb[3].mxu1 }
 0x146   : > { %v1044_v10 = vpop.f32.mrb[4].mxu0 }
 0x147   : > { %v1194_v12 = vpop.f32.mrb[4].mxu1  ;;  %v5314_v13 = vpop.f32.mrb[5].mxu0 }
 0x148   : > { %v7484_v14 = vadd.f32 %v1194_v12, %v1044_v10  ;;  %v5397_v15 = vpop.f32.mrb[5].mxu1 }
 0x14a   : > { %v1049_v16 = vpop.f32.mrb[6].mxu0 }
 0x14b   : > { %v1199_v17 = vpop.f32.mrb[6].mxu1  ;;  %v5317_v18 = vpop.f32.mrb[7].mxu0 }
 0x14c   : > { %v7487_v20 = vadd.f32 %v1199_v17, %v1049_v16  ;;  %v5400_v21 = vpop.f32.mrb[7].mxu1 }
 0x14e   : > { %v1054_v22 = vpop.f32.mrb[8].mxu0 }
 0x14f   : > { %v1204_v23 = vpop.f32.mrb[8].mxu1  ;;  %v5320_v24 = vpop.f32.mrb[9].mxu0 }
 0x150   : > { %v7490_v25 = vadd.f32 %v1204_v23, %v1054_v22  ;;  %v5403_v26 = vpop.f32.mrb[9].mxu1 }
 0x152   : > { %v1059_v27 = vpop.f32.mrb[10].mxu0 }
 0x153   : > { %v1209_v28 = vpop.f32.mrb[10].mxu1  ;;  %v5323_v29 = vpop.f32.mrb[11].mxu0 }
 0x154   : > { %v7492_v30 = vadd.f32 %v1209_v28, %v1059_v27  ;;  %v5406_v31 = vpop.f32.mrb[11].mxu1 }
 0x156   : > { %v1064_v32 = vpop.f32.mrb[12].mxu0 }
 0x157   : > { %v1214_v33 = vpop.f32.mrb[12].mxu1  ;;  %v5326_v34 = vpop.f32.mrb[13].mxu0 }
 0x158   : > { %v7494_v35 = vadd.f32 %v1214_v33, %v1064_v32  ;;  %v5409_v36 = vpop.f32.mrb[13].mxu1  ;;  %v7518_v34 = vld [vmem:[%s8347_s13] ss:$0 sm:$0xff] }
 0x15a   : > { %v1069_v37 = vpop.f32.mrb[14].mxu0 }
 0x15b   : > { %v1219_v38 = vpop.f32.mrb[14].mxu1  ;;  %v5329_v39 = vpop.f32.mrb[15].mxu0 }
 0x15c   : > { %v7496_v40 = vadd.f32 %v1219_v38, %v1069_v37  ;;  %v5412_v41 = vpop.f32.mrb[15].mxu1 }
 0x15e   : > { %v1074_v42 = vpop.f32.mrb[16].mxu0 }
 0x15f   : > { %v1224_v43 = vpop.f32.mrb[16].mxu1  ;;  %v5332_v44 = vpop.f32.mrb[17].mxu0 }
 0x160   : > { %v7498_v45 = vadd.f32 %v1224_v43, %v1074_v42  ;;  %v5415_v46 = vpop.f32.mrb[17].mxu1 }
 0x162   : > { %v1079_v47 = vpop.f32.mrb[18].mxu0 }
 0x163   : > { %v1229_v48 = vpop.f32.mrb[18].mxu1  ;;  %v5335_v49 = vpop.f32.mrb[19].mxu0 }
 0x164   : > { %v7500_v50 = vadd.f32 %v1229_v48, %v1079_v47  ;;  %v5418_v51 = vpop.f32.mrb[19].mxu1 }
 0x166   : > { %v1084_v52 = vpop.f32.mrb[20].mxu0 }
 0x167   : > { %v1234_v53 = vpop.f32.mrb[20].mxu1  ;;  %v5338_v54 = vpop.f32.mrb[21].mxu0 }
 0x168   : > { %v7502_v55 = vadd.f32 %v1234_v53, %v1084_v52  ;;  %v5421_v56 = vpop.f32.mrb[21].mxu1 }
 0x16a   : > { %v1089_v57 = vpop.f32.mrb[22].mxu0 }
 0x16b   : > { %v1239_v58 = vpop.f32.mrb[22].mxu1  ;;  %v5341_v59 = vpop.f32.mrb[23].mxu0 }
 0x16c   : > { %v7504_v60 = vadd.f32 %v1239_v58, %v1089_v57  ;;  %v5424_v61 = vpop.f32.mrb[23].mxu1 }
 0x16e   : > { %v1094_v62 = vpop.f32.mrb[24].mxu0 }
 0x16f   : > { %v1244_v63 = vpop.f32.mrb[24].mxu1  ;;  %v5344_v0 = vpop.f32.mrb[25].mxu0 }
 0x170   : > { %v7506_v1 = vadd.f32 %v1244_v63, %v1094_v62  ;;  %v5427_v4 = vpop.f32.mrb[25].mxu1 }
 0x172   : > { %v1099_v5 = vpop.f32.mrb[26].mxu0 }
 0x173   : > { %v1249_v6 = vpop.f32.mrb[26].mxu1  ;;  %v5347_v7 = vpop.f32.mrb[27].mxu0 }
 0x174   : > { %v7508_v9 = vadd.f32 %v1249_v6, %v1099_v5  ;;  %v5430_v10 = vpop.f32.mrb[27].mxu1 }
 0x176   : > { %v1104_v12 = vpop.f32.mrb[28].mxu0 }
 0x177   : > { %v1254_v13 = vpop.f32.mrb[28].mxu1  ;;  %v5350_v15 = vpop.f32.mrb[29].mxu0 }
 0x178   : > { %v7510_v16 = vadd.f32 %v1254_v13, %v1104_v12  ;;  %v5433_v17 = vpop.f32.mrb[29].mxu1 }
 0x17a   : > { %v1109_v18 = vpop.f32.mrb[30].mxu0 }
 0x17b   : > { %v1259_v19 = vpop.f32.mrb[30].mxu1  ;;  %v5353_v21 = vpop.f32.mrb[31].mxu0 }
 0x17c   : > { %v7512_v22 = vadd.f32 %v1259_v19, %v1109_v18  ;;  %v5436_v23 = vpop.f32.mrb[31].mxu1 }
 0x17e   : > { %v1114_v24 = vpop.f32.mrb[32].mxu0 }
 0x17f   : > { %v1264_v26 = vpop.f32.mrb[32].mxu1  ;;  %v5356_v27 = vpop.f32.mrb[33].mxu0 }
 0x180   : > { %v7514_v28 = vadd.f32 %v1264_v26, %v1114_v24  ;;  %v5439_v29 = vpop.f32.mrb[33].mxu1 }
 0x182   : > { %v1368_v31 = vpop.f32.mrb[34].mxu0 }
 0x183   : > { %v1452_v32 = vadd.f32 %v1368_v31, %v7480_v2  ;;  %v5474_v33 = vpop.f32.mrb[35].mxu0 }
 0x185   : > { %v1476_v37 = vadd.f32 %v7518_v34, %v1452_v32 }
 0x186   : > { %v1373_v36 = vpop.f32.mrb[36].mxu0 }
 0x187   : > { %v1453_v38 = vadd.f32 %v1373_v36, %v7482_v8  ;;  %v5477_v39 = vpop.f32.mrb[37].mxu0  ;;  %v1493_v43 = vmax.f32 %v1476_v37, 0.0 }
 0x189   : > { %v1477_v41 = vadd.f32 %v7518_v34, %v1453_v38 }
 0x18a   : > { %v1378_v42 = vpop.f32.mrb[38].mxu0 }
 0x18b   : > { %v1494_v44 = vmax.f32 %v1477_v41, 0.0  ;;  %v1454_v46 = vadd.f32 %v1378_v42, %v7484_v14  ;;  %v5480_v47 = vpop.f32.mrb[39].mxu0 }
 0x18d   : > { %v7524_v48 = vpack.c.bf16 %v1494_v44, %v1493_v43  ;;  %v1478_v49 = vadd.f32 %v7518_v34, %v1454_v46 }
 0x18e   : > { %v1383_v2 = vpop.f32.mrb[40].mxu0 }
 0x18f   : > { %v1455_v51 = vadd.f32 %v1383_v2, %v7487_v20  ;;  %v5483_v52 = vpop.f32.mrb[41].mxu0  ;;  %6384 = vmatpush1.bf16.msra.mxu1 %v7524_v48  ;;  %v1495_v54 = vmax.f32 %v1478_v49, 0.0 }
 0x190   : > { %6385 = vmatprep.subr.bf16.mxu1 %v7037_v3 }
 0x191   : > { %v1479_v8 = vadd.f32 %v7518_v34, %v1455_v51 }
 0x192   : > { %v1388_v53 = vpop.f32.mrb[42].mxu0 }
 0x193   : > { %v1496_v56 = vmax.f32 %v1479_v8, 0.0  ;;  %v1456_v14 = vadd.f32 %v1388_v53, %v7490_v25  ;;  %v5486_v57 = vpop.f32.mrb[43].mxu0 }
 0x195   : > { %v7532_v58 = vpack.c.bf16 %v1496_v56, %v1495_v54  ;;  %v1480_v61 = vadd.f32 %v7518_v34, %v1456_v14 }
 0x196   : > { %v1393_v59 = vpop.f32.mrb[44].mxu0 }
 0x197   : > { %v1457_v20 = vadd.f32 %v1393_v59, %v7492_v30  ;;  %v5489_v62 = vpop.f32.mrb[45].mxu0  ;;  %6387 = vmatpush1.bf16.msra.mxu1 %v7532_v58  ;;  %v1497_v4 = vmax.f32 %v1480_v61, 0.0 }
 0x198   : > { %6388 = vmatprep.subr.bf16.mxu1 %v7037_v3 }
 0x199   : > { %v1481_v63 = vadd.f32 %v7518_v34, %v1457_v20 }
 0x19a   : > { %v1398_v0 = vpop.f32.mrb[46].mxu0 }
 0x19b   : > { %v1498_v5 = vmax.f32 %v1481_v63, 0.0  ;;  %v1458_v25 = vadd.f32 %v1398_v0, %v7494_v35  ;;  %v5492_v6 = vpop.f32.mrb[47].mxu0 }
 0x19d   : > { %v7540_v7 = vpack.c.bf16 %v1498_v5, %v1497_v4  ;;  %v1482_v12 = vadd.f32 %v7518_v34, %v1458_v25 }
 0x19e   : > { %v1403_v10 = vpop.f32.mrb[48].mxu0 }
 0x19f   : > { %v1459_v30 = vadd.f32 %v1403_v10, %v7496_v40  ;;  %v5495_v13 = vpop.f32.mrb[49].mxu0  ;;  %6390 = vmatpush1.bf16.msra.mxu1 %v7540_v7  ;;  %v1499_v18 = vmax.f32 %v1482_v12, 0.0  ;;  %v1510_v10 = vld [vmem:[%s7066_s17] sm:$0xff]  ;;  %v1513_v12 = vld [vmem:[%s7066_s17 + $0x18] sm:$0xff] }
 0x1a0   : > { %6391 = vmatprep.subr.bf16.mxu1 %v7037_v3  ;;  %v1517_v13 = vld [vmem:[%s7066_s17 + $0x38] sm:$0xff] }
 0x1a1   : > { %v1483_v15 = vadd.f32 %v7518_v34, %v1459_v30  ;;  %v1514_v30 = vld [vmem:[%s7066_s17 + $0x20] sm:$0xff] }
 0x1a2   : > { %v1408_v17 = vpop.f32.mrb[50].mxu0 }
 0x1a3   : > { %v1500_v19 = vmax.f32 %v1483_v15, 0.0  ;;  %v1460_v35 = vadd.f32 %v1408_v17, %v7498_v45  ;;  %v5498_v21 = vpop.f32.mrb[51].mxu0  ;;  %v1519_v15 = vld [vmem:[%s7066_s17 + $0x48] sm:$0xff]  ;;  %v1521_v17 = vld [vmem:[%s7066_s17 + $0x58] sm:$0xff] }
 0x1a4   : > { %v1524_v21 = vld [vmem:[%s7066_s17 + $0x70] sm:$0xff] }
 0x1a5   : > { %v7548_v23 = vpack.c.bf16 %v1500_v19, %v1499_v18  ;;  %v1484_v26 = vadd.f32 %v7518_v34, %v1460_v35  ;;  %v1523_v18 = vld [vmem:[%s7066_s17 + $0x68] sm:$0xff]  ;;  %v1522_v19 = vld [vmem:[%s7066_s17 + $0x60] sm:$0xff]  ;;  %v1525_v35 = vld [vmem:[%s7066_s17 + $0x78] sm:$0xff] }
 0x1a6   : > { %v1413_v24 = vpop.f32.mrb[52].mxu0 }
 0x1a7   : > { %v1461_v40 = vadd.f32 %v1413_v24, %v7500_v50  ;;  %v5501_v27 = vpop.f32.mrb[53].mxu0  ;;  %6393 = vmatpush1.bf16.msra.mxu1 %v7548_v23  ;;  %v1501_v32 = vmax.f32 %v1484_v26, 0.0  ;;  %v1526_v24 = vld [vmem:[%s7066_s17 + $0x80] sm:$0xf]  ;;  %v1671_v26 = vld [vmem:[%s7071_s21 + $0x8] sm:$0xff] }
 0x1a8   : > { %6394 = vmatprep.subr.bf16.mxu1 %v7037_v3  ;;  %v1673_v27 = vld [vmem:[%s7071_s21 + $0x18] sm:$0xff] }
 0x1a9   : > { %v1485_v29 = vadd.f32 %v7518_v34, %v1461_v40  ;;  %v1670_v40 = vld [vmem:[%s7071_s21] sm:$0xff] }
 0x1aa   : > { %v1418_v31 = vpop.f32.mrb[54].mxu0 }
 0x1ab   : > { %v1502_v33 = vmax.f32 %v1485_v29, 0.0  ;;  %v1462_v45 = vadd.f32 %v1418_v31, %v7502_v55  ;;  %v5504_v36 = vpop.f32.mrb[55].mxu0  ;;  %v1672_v29 = vld [vmem:[%s7071_s21 + $0x10] sm:$0xff]  ;;  %v1675_v31 = vld [vmem:[%s7071_s21 + $0x28] sm:$0xff] }
 0x1ac   : > { %v1679_v36 = vld [vmem:[%s7071_s21 + $0x48] sm:$0xff] }
 0x1ad   : > { %v7556_v37 = vpack.c.bf16 %v1502_v33, %v1501_v32  ;;  %v1486_v39 = vadd.f32 %v7518_v34, %v1462_v45  ;;  %v1674_v32 = vld [vmem:[%s7071_s21 + $0x20] sm:$0xff]  ;;  %v1677_v33 = vld [vmem:[%s7071_s21 + $0x38] sm:$0xff]  ;;  %v1676_v45 = vld [vmem:[%s7071_s21 + $0x30] sm:$0xff] }
 0x1ae   : > { %v1423_v38 = vpop.f32.mrb[56].mxu0 }
 0x1af   : > { %v1463_v50 = vadd.f32 %v1423_v38, %v7504_v60  ;;  %v5507_v41 = vpop.f32.mrb[57].mxu0  ;;  %6396 = vmatpush1.bf16.msra.mxu1 %v7556_v37  ;;  %v1503_v44 = vmax.f32 %v1486_v39, 0.0  ;;  %v1681_v38 = vld [vmem:[%s7071_s21 + $0x58] sm:$0xff]  ;;  %v1680_v39 = vld [vmem:[%s7071_s21 + $0x50] sm:$0xff] }
 0x1b0   : > { %6397 = vmatprep.subr.bf16.mxu1 %v7037_v3  ;;  %v1682_v41 = vld [vmem:[%s7071_s21 + $0x60] sm:$0xff] }
 0x1b1   : > { %v1487_v42 = vadd.f32 %v7518_v34, %v1463_v50  ;;  %v1683_v50 = vld [vmem:[%s7071_s21 + $0x68] sm:$0xff] }
 0x1b2   : > { %v1428_v43 = vpop.f32.mrb[58].mxu0 }
 0x1b3   : > { %v1504_v46 = vmax.f32 %v1487_v42, 0.0  ;;  %v1464_v55 = vadd.f32 %v1428_v43, %v7506_v1  ;;  %v5510_v47 = vpop.f32.mrb[59].mxu0  ;;  %v1685_v42 = vld [vmem:[%s7071_s21 + $0x78] sm:$0xff]  ;;  %v1684_v43 = vld [vmem:[%s7071_s21 + $0x70] sm:$0xff] }
 0x1b4   : > { %v4611_v47 = vld [vmem:[%s7076_s25 + $0x88] sm:$0xff] }
 0x1b5   : > { %v7564_v2 = vpack.c.bf16 %v1504_v46, %v1503_v44  ;;  %v1488_v51 = vadd.f32 %v7518_v34, %v1464_v55  ;;  %v1687_v44 = vld [vmem:[%s7071_s21 + $0x88] sm:$0xf]  ;;  %v1686_v46 = vld [vmem:[%s7071_s21 + $0x80] sm:$0xf] }
 0x1b6   : > { %v1433_v49 = vpop.f32.mrb[60].mxu0  ;;  %v4610_v55 = vld [vmem:[%s7076_s25 + $0x80] sm:$0xff] }
 0x1b7   : > { %v1465_v60 = vadd.f32 %v1433_v49, %v7508_v9  ;;  %v5513_v52 = vpop.f32.mrb[61].mxu0  ;;  %6399 = vmatpush1.bf16.msra.mxu1 %v7564_v2  ;;  %v1505_v54 = vmax.f32 %v1488_v51, 0.0  ;;  %v6431_v49 = vpack.c.bf16 %v4611_v47, %v4610_v55  ;;  %v4613_v51 = vld [vmem:[%s7076_s25 + $0x98] sm:$0xff]  ;;  %v4624_v47 = vld [vmem:[%s7076_s25 + $0xf0] sm:$0xff] }
 0x1b8   : > { %6400 = vmatprep.subr.bf16.mxu1 %v7037_v3  ;;  %v1898_v52 = vld [vmem:[%s7076_s25 + $0x8] sm:$0xff] }
 0x1b9   : > { %v1489_v8 = vadd.f32 %v7518_v34, %v1465_v60  ;;  %v1897_v60 = vld [vmem:[%s7076_s25] sm:$0xff]  ;;  %6432 = vmatpush3.bf16.msra.mxu0 %v6431_v49 }
 0x1ba   : > { %v1438_v53 = vpop.f32.mrb[62].mxu0  ;;  %6433 = vmatprep.subr.bf16.mxu0 %v7037_v3 }
 0x1bb   : > { %v1506_v56 = vmax.f32 %v1489_v8, 0.0  ;;  %v1466_v1 = vadd.f32 %v1438_v53, %v7510_v16  ;;  %v5516_v14 = vpop.f32.mrb[63].mxu0  ;;  %v6455_v53 = vpack.c.bf16 %v1898_v52, %v1897_v60 }
 0x1bc   : > { %v4615_v14 = vld [vmem:[%s7076_s25 + $0xa8] sm:$0xff] }
 0x1bd   : > { %v6401_v57 = vpack.c.bf16 %v1506_v56, %v1505_v54  ;;  %v1490_v61 = vadd.f32 %v7518_v34, %v1466_v1  ;;  %v1899_v54 = vld [vmem:[%s7076_s25 + $0x10] sm:$0xff]  ;;  %v1900_v56 = vld [vmem:[%s7076_s25 + $0x18] sm:$0xff]  ;;  %v4614_v1 = vld [vmem:[%s7076_s25 + $0xa0] sm:$0xff] }
 0x1be   : > { %v1443_v59 = vpop.f32.mrb[64].mxu0 }
 0x1bf   : > { %v1467_v20 = vadd.f32 %v1443_v59, %v7512_v22  ;;  %v5519_v9 = vpop.f32.mrb[65].mxu0  ;;  %6402 = vmatpush1.bf16.msra.mxu1 %v6401_v57  ;;  %v1507_v0 = vmax.f32 %v1490_v61, 0.0  ;;  %v1901_v59 = vld [vmem:[%s7076_s25 + $0x20] sm:$0xff]  ;;  %v1902_v61 = vld [vmem:[%s7076_s25 + $0x28] sm:$0xff] }
 0x1c0   : > { %6403 = vmatprep.subr.bf16.mxu1 %v7037_v3  ;;  %v4616_v9 = vld [vmem:[%s7076_s25 + $0xb0] sm:$0xff] }
 0x1c1   : > { %v1491_v62 = vadd.f32 %v7518_v34, %v1467_v20  ;;  %v6437_v20 = vpack.c.bf16 %v4615_v14, %v4614_v1 }
 0x1c2   : > { %v1448_v63 = vpop.f32.mrb[66].mxu0 }
 0x1c3   : > { %v1508_v4 = vmax.f32 %v1491_v62, 0.0  ;;  %v1468_v16 = vadd.f32 %v1448_v63, %v7514_v28  ;;  %v5522_v5 = vpop.f32.mrb[67].mxu0  ;;  %v1512_v28 = vld [vmem:[%s7066_s17 + $0x10] sm:$0xff]  ;;  %v4617_v62 = vld [vmem:[%s7076_s25 + $0xb8] sm:$0xff]  ;;  %v6461_v63 = vpack.c.bf16 %v1902_v61, %v1901_v59 }
 0x1c4   : > { %v4618_v5 = vld [vmem:[%s7076_s25 + $0xc0] sm:$0xff] }
 0x1c5   : > { %v6404_v25 = vpack.c.bf16 %v1508_v4, %v1507_v0  ;;  %v1492_v6 = vadd.f32 %v7518_v34, %v1468_v16  ;;  %v1515_v34 = vld [vmem:[%s7066_s17 + $0x28] sm:$0xff]  ;;  %v1903_v0 = vld [vmem:[%s7076_s25 + $0x30] sm:$0xff]  ;;  %v1904_v4 = vld [vmem:[%s7076_s25 + $0x38] sm:$0xff]  ;;  %v6440_v16 = vpack.c.bf16 %v4617_v62, %v4616_v9 }
 0x1c7   : > { %6405 = vmatpush1.bf16.msra.mxu1 %v6404_v25  ;;  %v1509_v22 = vmax.f32 %v1492_v6, 0.0  ;;  %v6464_v6 = vpack.c.bf16 %v1904_v4, %v1903_v0 }
 0x1c8   : > { %1592 = vmatprep.subr.mxu1 %v7039_v11 }
 0x1cb   : > { %4590 = vmatpush1.msk.msra.mxu1 %vm1556_vm2, %v1509_v22 }
 0x1cc   : > { %1625 = vmatmul.mubr.f32.vlgmr.msra.gmra.mrb[34].mxu1 %v1510_v10  ;;  %6406 = vmatprep.subr.bf16.mxu1 %v7037_v3  ;;  %v1906_v10 = vld [vmem:[%s7076_s25 + $0x48] sm:$0xff] }
 0x1cd   : > { %6408 = vmatpush1.bf16.msra.mxu1 %v7524_v48  ;;  %4592 = vmatprep.mubr.msk.f32.mxu1 %vm1528_vm1, %v1513_v12  ;;  %v1516_v48 = vld [vmem:[%s7066_s17 + $0x30] sm:$0xff] }
 0x1ce   : > { %6409 = vmatprep.subr.bf16.mxu1 %v7037_v3 }
 0x1d0   : > { %1630 = vmatmul.mubr.f32.gmra.mrb[36].mxu1 %v1512_v28  ;;  %v4620_v28 = vld [vmem:[%s7076_s25 + $0xd0] sm:$0xff] }
 0x1d1   : > { %6411 = vmatpush1.bf16.msra.mxu1 %v7532_v58  ;;  %4593 = vmatprep.mubr.msk.f32.mxu1 %vm1528_vm1, %v1515_v34  ;;  %v1518_v58 = vld [vmem:[%s7066_s17 + $0x40] sm:$0xff]  ;;  %v4621_v34 = vld [vmem:[%s7076_s25 + $0xd8] sm:$0xff] }
 0x1d2   : > { %6412 = vmatprep.subr.bf16.mxu1 %v7037_v3 }
 0x1d4   : > { %1635 = vmatmul.mubr.f32.gmra.mrb[38].mxu1 %v1514_v30 }
 0x1d5   : > { %6414 = vmatpush1.bf16.msra.mxu1 %v7540_v7  ;;  %4594 = vmatprep.mubr.msk.f32.mxu1 %vm1528_vm1, %v1517_v13  ;;  %v1520_v7 = vld [vmem:[%s7066_s17 + $0x50] sm:$0xff] }
 0x1d6   : > { %6415 = vmatprep.subr.bf16.mxu1 %v7037_v3  ;;  %v1907_v13 = vld [vmem:[%s7076_s25 + $0x50] sm:$0xff] }
 0x1d8   : > { %1640 = vmatmul.mubr.f32.gmra.mrb[40].mxu1 %v1516_v48  ;;  %v1908_v48 = vld [vmem:[%s7076_s25 + $0x58] sm:$0xff] }
 0x1d9   : > { %6417 = vmatpush1.bf16.msra.mxu1 %v7548_v23  ;;  %4595 = vmatprep.mubr.msk.f32.mxu1 %vm1528_vm1, %v1519_v15  ;;  %v1527_v23 = vld [vmem:[%s7066_s17 + $0x88] sm:$0xf]  ;;  %v6446_v15 = vpack.c.bf16 %v4621_v34, %v4620_v28 }
 0x1da   : > { %6418 = vmatprep.subr.bf16.mxu1 %v7037_v3 }
 0x1dc   : > { %1645 = vmatmul.mubr.f32.gmra.mrb[42].mxu1 %v1518_v58  ;;  %v6470_v58 = vpack.c.bf16 %v1908_v48, %v1907_v13 }
 0x1dd   : > { %6420 = vmatpush1.bf16.msra.mxu1 %v7556_v37  ;;  %4596 = vmatprep.mubr.msk.f32.mxu1 %vm1528_vm1, %v1521_v17  ;;  %v1678_v37 = vld [vmem:[%s7071_s21 + $0x40] sm:$0xff] }
 0x1de   : > { %6421 = vmatprep.subr.bf16.mxu1 %v7037_v3 }
 0x1e0   : > { %1650 = vmatmul.mubr.f32.gmra.mrb[44].mxu1 %v1520_v7 }
 0x1e1   : > { %6423 = vmatpush1.bf16.msra.mxu1 %v7564_v2  ;;  %4597 = vmatprep.mubr.msk.f32.mxu1 %vm1528_vm1, %v1523_v18  ;;  %v4612_v2 = vld [vmem:[%s7076_s25 + $0x90] sm:$0xff] }
 0x1e2   : > { %6424 = vmatprep.subr.bf16.mxu1 %v7037_v3  ;;  %v6434_v8 = vpack.c.bf16 %v4613_v51, %v4612_v2  ;;  %v4625_v2 = vld [vmem:[%s7076_s25 + $0xf8] sm:$0xff] }
 0x1e3   : > { %v6452_v51 = vpack.c.bf16 %v4625_v2, %v4624_v47 }
 0x1e4   : > { %1655 = vmatmul.mubr.f32.gmra.mrb[46].mxu1 %v1522_v19  ;;  %6435 = vmatpush3.bf16.msra.mxu0 %v6434_v8 }
 0x1e5   : > { %6426 = vmatpush1.bf16.msra.mxu1 %v6401_v57  ;;  %4598 = vmatprep.mubr.msk.f32.mxu1 %vm1528_vm1, %v1525_v35  ;;  %v6458_v57 = vpack.c.bf16 %v1900_v56, %v1899_v54 }
 0x1e6   : > { %6427 = vmatprep.subr.bf16.mxu1 %v7037_v3  ;;  %6436 = vmatprep.subr.bf16.mxu0 %v7037_v3 }
 0x1e8   : > { %1660 = vmatmul.mubr.f32.gmra.mrb[48].mxu1 %v1524_v21  ;;  %6438 = vmatpush3.bf16.msra.mxu0 %v6437_v20 }
 0x1e9   : > { %6429 = vmatpush1.bf16.msra.mxu1 %v6404_v25  ;;  %4599 = vmatprep.mubr.msk.f32.mxu1 %vm1528_vm1, %v1527_v23  ;;  %v4619_v25 = vld [vmem:[%s7076_s25 + $0xc8] sm:$0xff] }
 0x1ea   : > { %1747 = vmatprep.subr.mxu1 %v7039_v11  ;;  %6439 = vmatprep.subr.bf16.mxu0 %v7037_v3  ;;  %v6443_v12 = vpack.c.bf16 %v4619_v25, %v4618_v5 }
 0x1ec   : > { %1665 = vmatmul.mubr.f32.gmra.mrb[50].mxu1 %v1526_v24  ;;  %6441 = vmatpush3.bf16.msra.mxu0 %v6440_v16 }
 0x1ed   : > { %4600 = vmatpush1.msk.msra.mxu1 %vm1556_vm2, %v1509_v22  ;;  %4601 = vmatprep.mubr.msk.f32.mxu1 %vm1528_vm1, %v1671_v26  ;;  %v1905_v22 = vld [vmem:[%s7076_s25 + $0x40] sm:$0xff] }
 0x1ee   : > { %6454 = vmatprep.subr.bf16.mxu1 %v7037_v3  ;;  %6442 = vmatprep.subr.bf16.mxu0 %v7037_v3  ;;  %v6467_v30 = vpack.c.bf16 %v1906_v10, %v1905_v22 }
 0x1f0   : > { %1780 = vmatmul.mubr.f32.vlgmr.msra.gmra.mrb[52].mxu1 %v1670_v40  ;;  %6444 = vmatpush3.bf16.msra.mxu0 %v6443_v12 }
 0x1f1   : > { %4602 = vmatprep.mubr.msk.f32.mxu1 %vm1528_vm1, %v1673_v27  ;;  %6456 = vmatpush3.bf16.msra.mxu1 %v6455_v53  ;;  %v1909_v27 = vld [vmem:[%s7076_s25 + $0x60] sm:$0xff] }
 0x1f2   : > { %6457 = vmatprep.subr.bf16.mxu1 %v7037_v3  ;;  %6445 = vmatprep.subr.bf16.mxu0 %v7037_v3 }
 0x1f4   : > { %1785 = vmatmul.mubr.f32.gmra.mrb[54].mxu1 %v1672_v29  ;;  %6447 = vmatpush3.bf16.msra.mxu0 %v6446_v15  ;;  %v1910_v29 = vld [vmem:[%s7076_s25 + $0x68] sm:$0xff] }
 0x1f5   : > { %4603 = vmatprep.mubr.msk.f32.mxu1 %vm1528_vm1, %v1675_v31  ;;  %6459 = vmatpush3.bf16.msra.mxu1 %v6458_v57 }
 0x1f6   : > { %6460 = vmatprep.subr.bf16.mxu1 %v7037_v3  ;;  %6448 = vmatprep.subr.bf16.mxu0 %v7037_v3 }
 0x1f8   : > { %1790 = vmatmul.mubr.f32.gmra.mrb[56].mxu1 %v1674_v32  ;;  %v6473_v32 = vpack.c.bf16 %v1910_v29, %v1909_v27 }
 0x1f9   : > { %4604 = vmatprep.mubr.msk.f32.mxu1 %vm1528_vm1, %v1677_v33  ;;  %6462 = vmatpush3.bf16.msra.mxu1 %v6461_v63 }
 0x1fa   : > { %6463 = vmatprep.subr.bf16.mxu1 %v7037_v3 }
 0x1fc   : > { %1795 = vmatmul.mubr.f32.gmra.mrb[58].mxu1 %v1676_v45  ;;  %v1911_v45 = vld [vmem:[%s7076_s25 + $0x70] sm:$0xff] }
 0x1fd   : > { %4605 = vmatprep.mubr.msk.f32.mxu1 %vm1528_vm1, %v1679_v36  ;;  %6465 = vmatpush3.bf16.msra.mxu1 %v6464_v6  ;;  %v1912_v36 = vld [vmem:[%s7076_s25 + $0x78] sm:$0xff] }
 0x1fe   : > { %6466 = vmatprep.subr.bf16.mxu1 %v7037_v3 }
 0x200   : > { %1800 = vmatmul.mubr.f32.gmra.mrb[60].mxu1 %v1678_v37 }
 0x201   : > { %4606 = vmatprep.mubr.msk.f32.mxu1 %vm1528_vm1, %v1681_v38  ;;  %6468 = vmatpush3.bf16.msra.mxu1 %v6467_v30  ;;  %v6476_v38 = vpack.c.bf16 %v1912_v36, %v1911_v45 }
 0x202   : > { %6469 = vmatprep.subr.bf16.mxu1 %v7037_v3 }
 0x204   : > { %1805 = vmatmul.mubr.f32.gmra.mrb[62].mxu1 %v1680_v39 }
 0x205   : > { %4607 = vmatprep.mubr.msk.f32.mxu1 %vm1528_vm1, %v1683_v50  ;;  %6471 = vmatpush3.bf16.msra.mxu1 %v6470_v58 }
 0x206   : > { %6472 = vmatprep.subr.bf16.mxu1 %v7037_v3 }
 0x208   : > { %1810 = vmatmul.mubr.f32.gmra.mrb[64].mxu1 %v1682_v41 }
 0x209   : > { %4608 = vmatprep.mubr.msk.f32.mxu1 %vm1528_vm1, %v1685_v42  ;;  %6474 = vmatpush3.bf16.msra.mxu1 %v6473_v32  ;;  %v4622_v42 = vld [vmem:[%s7076_s25 + $0xe0] sm:$0xff]  ;;  %v4631_v32 = vld [vmem:[%s7076_s25 + $0x128] sm:$0xff] }
 0x20a   : > { %6475 = vmatprep.subr.bf16.mxu1 %v7037_v3 }
 0x20c   : > { %1815 = vmatmul.mubr.f32.gmra.mrb[66].mxu1 %v1684_v43  ;;  %v4623_v43 = vld [vmem:[%s7076_s25 + $0xe8] sm:$0xff] }
 0x20d   : > { %4609 = vmatprep.mubr.msk.f32.mxu1 %vm1528_vm1, %v1687_v44  ;;  %6477 = vmatpush3.bf16.msra.mxu1 %v6476_v38  ;;  %v4632_v38 = vld [vmem:[%s7076_s25 + $0x130] sm:$0xff] }
 0x20e   : > { %6502 = vmatprep.subr.bf16.mxu1 %v7037_v3 }
 0x210   : > { %1820 = vmatmul.mubr.f32.gmra.mrb[68].mxu1 %v1686_v46  ;;  %v6449_v46 = vpack.c.bf16 %v4623_v43, %v4622_v42 }
 0x211   : > { %5614 = vmatprep.mubr.msk.f32.mxu1 %vm7038_vm0, %v7039_v11 }
 0x212   : > { %6450 = vmatpush3.bf16.msra.mxu0 %v6449_v46  ;;  %v4635_v46 = vld [vmem:[%s7076_s25 + $0x148] sm:$0xff] }
 0x213   : > { %6451 = vmatprep.subr.bf16.mxu0 %v7037_v3 }
 0x216   : > { %6453 = vmatpush3.bf16.msra.mxu0 %v6452_v51  ;;  %v4636_v51 = vld [vmem:[%s7076_s25 + $0x150] sm:$0xff] }
 0x217   : > { %6478 = vmatprep.subr.bf16.mxu0 %v7037_v3 }
 0x29f   : > { %v1626_v17 = vpop.f32.mrb[34].mxu1 }
 0x2a0   : > { %v1628_v7 = vpop.f32.mrb[35].mxu1 }
 0x2a1   : > { %v4626_v7 = vld [vmem:[%s7076_s25 + $0x100] sm:$0xff] }
 0x2a3   : > { %v1631_v18 = vpop.f32.mrb[36].mxu1 }
 0x2a4   : > { %v1633_v19 = vpop.f32.mrb[37].mxu1 }
 0x2a7   : > { %v1636_v35 = vpop.f32.mrb[38].mxu1 }
 0x2a8   : > { %v1638_v21 = vpop.f32.mrb[39].mxu1 }
 0x2ab   : > { %v1641_v23 = vpop.f32.mrb[40].mxu1 }
 0x2ac   : > { %v1643_v24 = vpop.f32.mrb[41].mxu1 }
 0x2ad   : > { %v4629_v24 = vld [vmem:[%s7076_s25 + $0x118] sm:$0xff] }
 0x2af   : > { %v1646_v26 = vpop.f32.mrb[42].mxu1 }
 0x2b0   : > { %v1648_v40 = vpop.f32.mrb[43].mxu1 }
 0x2b3   : > { %v1651_v31 = vpop.f32.mrb[44].mxu1 }
 0x2b4   : > { %v1653_v33 = vpop.f32.mrb[45].mxu1 }
 0x2b7   : > { %v1656_v37 = vpop.f32.mrb[46].mxu1 }
 0x2b8   : > { %v1658_v39 = vpop.f32.mrb[47].mxu1 }
 0x2b9   : > { %v4633_v39 = vld [vmem:[%s7076_s25 + $0x138] sm:$0xff] }
 0x2ba   : > { %v6488_v42 = vpack.c.bf16 %v4633_v39, %v4632_v38 }
 0x2bb   : > { %v1661_v50 = vpop.f32.mrb[48].mxu1 }
 0x2bc   : > { %v1663_v41 = vpop.f32.mrb[49].mxu1 }
 0x2bf   : > { %v1666_v44 = vpop.f32.mrb[50].mxu1 }
 0x2c0   : > { %v1668_v55 = vpop.f32.mrb[51].mxu1 }
 0x2c3   : > { %v1781_v49 = vpop.f32.mrb[52].mxu1 }
 0x2c4   : > { %v1825_v60 = vmax.f32 %v1626_v17, %v1781_v49  ;;  %v1783_v52 = vpop.f32.mrb[53].mxu1 }
 0x2c6   : > { %1843 = vrot.lane.b32.xlu0 %v1825_v60, %s8313_s23 }
 0x2c7   : > { %v1786_v8 = vpop.f32.mrb[54].mxu1 }
 0x2c8   : > { %v1826_v53 = vmax.f32 %v1631_v18, %v1786_v8  ;;  %v1788_v54 = vpop.f32.mrb[55].mxu1  ;;  %v4627_v18 = vld [vmem:[%s7076_s25 + $0x108] sm:$0xff] }
 0x2ca   : > { %1845 = vrot.lane.b32.xlu0 %v1826_v53, %s8313_s23 }
 0x2cb   : > { %v1791_v56 = vpop.f32.mrb[56].mxu1 }
 0x2cc   : > { %v1827_v1 = vmax.f32 %v1636_v35, %v1791_v56  ;;  %v1793_v14 = vpop.f32.mrb[57].mxu1  ;;  %v6479_v35 = vpack.c.bf16 %v4627_v18, %v4626_v7  ;;  %v4638_v56 = vld [vmem:[%s7076_s25 + $0x160] sm:$0xff] }
 0x2ce   : > { %1847 = vrot.lane.b32.xlu1 %v1827_v1, %s8313_s23 }
 0x2cf   : > { %v1796_v57 = vpop.f32.mrb[58].mxu1 }
 0x2d0   : > { %v1828_v59 = vmax.f32 %v1641_v23, %v1796_v57  ;;  %v1798_v61 = vpop.f32.mrb[59].mxu1  ;;  %v4628_v23 = vld [vmem:[%s7076_s25 + $0x110] sm:$0xff] }
 0x2d1   : > { %v6482_v27 = vpack.c.bf16 %v4629_v24, %v4628_v23  ;;  %v4641_v61 = vld [vmem:[%s7076_s25 + $0x178] sm:$0xff] }
 0x2d2   : > { %1849 = vrot.lane.b32.xlu1 %v1828_v59, %s8313_s23 }
 0x2d3   : > { %v1801_v20 = vpop.f32.mrb[60].mxu1 }
 0x2d4   : > { %v1829_v9 = vmax.f32 %v1646_v26, %v1801_v20  ;;  %v1803_v62 = vpop.f32.mrb[61].mxu1 }
 0x2d6   : > { %1851 = vrot.lane.b32.xlu0 %v1829_v9, %s8313_s23 }
 0x2d7   : > { %v1806_v63 = vpop.f32.mrb[62].mxu1 }
 0x2d8   : > { %v1830_v0 = vmax.f32 %v1651_v31, %v1806_v63  ;;  %v1808_v4 = vpop.f32.mrb[63].mxu1  ;;  %v4630_v31 = vld [vmem:[%s7076_s25 + $0x120] sm:$0xff] }
 0x2d9   : > { %v6485_v36 = vpack.c.bf16 %v4631_v32, %v4630_v31 }
 0x2da   : > { %1853 = vrot.lane.b32.xlu1 %v1830_v0, %s8313_s23 }
 0x2db   : > { %v1811_v16 = vpop.f32.mrb[64].mxu1 }
 0x2dc   : > { %v7705_v5 = vmax.f32 %v1656_v37, %v1811_v16  ;;  %v1813_v25 = vpop.f32.mrb[65].mxu1 }
 0x2de   : > { %1855 = vrot.lane.b32.xlu0 %v7705_v5, %s8313_s23 }
 0x2df   : > { %v1816_v6 = vpop.f32.mrb[66].mxu1 }
 0x2e0   : > { %v7709_v22 = vmax.f32 %v1661_v50, %v1816_v6  ;;  %v1818_v10 = vpop.f32.mrb[67].mxu1 }
 0x2e2   : > { %1857 = vrot.lane.b32.xlu1 %v7709_v22, %s8313_s23 }
 0x2e3   : > { %v1821_v12 = vpop.f32.mrb[68].mxu1 }
 0x2e4   : > { %v7713_v28 = vmax.f32 %v1666_v44, %v1821_v12  ;;  %v1823_v34 = vpop.f32.mrb[69].mxu1  ;;  %v4634_v44 = vld [vmem:[%s7076_s25 + $0x140] sm:$0xff] }
 0x2e5   : > { %v6491_v2 = vpack.c.bf16 %v4635_v46, %v4634_v44 }
 0x2e6   : > { %1859 = vrot.lane.b32.xlu0 %v7713_v28, %s8313_s23 }
 0x338   : > { %v1844_v30 = vpop.permute.xlu0 %1843 }
 0x339   : > { %v1870_v13 = vmax.f32 %v1825_v60, %v1844_v30  ;;  %v4637_v60 = vld [vmem:[%s7076_s25 + $0x158] sm:$0xff] }
 0x33b   : > { %1879 = vst [vmem:[#allocation2] sm:$0xff] %v1870_v13  ;;  %5615 = vmatmul.mubr.f32.vlgmr.msra.gmra.mrb[70].mxu1 %v1870_v13 }
 0x33c   : > { %v1846_v48 = vpop.permute.xlu0 %1845  ;;  %5617 = vmatprep.mubr.msk.f32.mxu1 %vm7038_vm0, %v7039_v11 }
 0x33d   : > { %v1871_v15 = vmax.f32 %v1826_v53, %v1846_v48  ;;  %v6494_v53 = vpack.c.bf16 %v4637_v60, %v4636_v51 }
 0x33f   : > { %1880 = vst [vmem:[#allocation2 + $0x8] sm:$0xff] %v1871_v15  ;;  %5618 = vmatmul.mubr.f32.gmra.mrb[72].mxu1 %v1871_v15 }
 0x340   : > { %v1848_v58 = vpop.permute.xlu1 %1847  ;;  %5620 = vmatprep.mubr.msk.f32.mxu1 %vm7038_vm0, %v7039_v11 }
 0x341   : > { %v1872_v17 = vmax.f32 %v1827_v1, %v1848_v58  ;;  %v4639_v1 = vld [vmem:[%s7076_s25 + $0x168] sm:$0xff] }
 0x342   : > { %v6497_v57 = vpack.c.bf16 %v4639_v1, %v4638_v56 }
 0x343   : > { %1881 = vst [vmem:[#allocation2 + $0x10] sm:$0xff] %v1872_v17  ;;  %5621 = vmatmul.mubr.f32.gmra.mrb[74].mxu1 %v1872_v17 }
 0x344   : > { %v1850_v19 = vpop.permute.xlu1 %1849  ;;  %5623 = vmatprep.mubr.msk.f32.mxu1 %vm7038_vm0, %v7039_v11 }
 0x345   : > { %v1873_v21 = vmax.f32 %v1828_v59, %v1850_v19  ;;  %v4640_v59 = vld [vmem:[%s7076_s25 + $0x170] sm:$0xff] }
 0x346   : > { %v1913_v26 = vld [vmem:[#allocation2 + $0x1] sm:$0xff] }
 0x347   : > { %1882 = vst [vmem:[#allocation2 + $0x18] sm:$0xff] %v1873_v21  ;;  %5556 = vmatmul.mubr.f32.vlgmr.msra.gmra.mrb[68].mxu0 %v1913_v26  ;;  %5624 = vmatmul.mubr.f32.gmra.mrb[76].mxu1 %v1873_v21  ;;  %v2159_v4 = vld [vmem:[#allocation2 + $0x2] sm:$0xff] }
 0x348   : > { %v1852_v40 = vpop.permute.xlu0 %1851  ;;  %5558 = vmatprep.mubr.msk.f32.mxu0 %vm7038_vm0, %v7039_v11  ;;  %6480 = vmatpush3.bf16.msra.mxu0 %v6479_v35 }
 0x349   : > { %v1874_v29 = vmax.f32 %v1829_v9, %v1852_v40  ;;  %6481 = vmatprep.subr.bf16.mxu0 %v7037_v3  ;;  %5626 = vmatprep.mubr.msk.f32.mxu1 %vm7038_vm0, %v7039_v11  ;;  %v6500_v9 = vpack.c.bf16 %v4641_v61, %v4640_v59  ;;  %v7803_v59 = vld [vmem:[%s7081_s29] ss:$0 sm:$0xff] }
 0x34a   : > { %v1914_v33 = vld [vmem:[#allocation2 + $0x9] sm:$0xff] }
 0x34b   : > { %1883 = vst [vmem:[#allocation2 + $0x20] sm:$0xff] %v1874_v29  ;;  %5559 = vmatmul.mubr.f32.gmra.mrb[70].mxu0 %v1914_v33  ;;  %5627 = vmatmul.mubr.f32.gmra.mrb[78].mxu1 %v1874_v29  ;;  %v2160_v16 = vld [vmem:[#allocation2 + $0xa] sm:$0xff] }
 0x34c   : > { %v1854_v45 = vpop.permute.xlu1 %1853  ;;  %5561 = vmatprep.mubr.msk.f32.mxu0 %vm7038_vm0, %v7039_v11  ;;  %6483 = vmatpush3.bf16.msra.mxu0 %v6482_v27 }
 0x34d   : > { %v1875_v37 = vmax.f32 %v1830_v0, %v1854_v45  ;;  %6484 = vmatprep.subr.bf16.mxu0 %v7037_v3  ;;  %5629 = vmatprep.mubr.msk.f32.mxu1 %vm7038_vm0, %v7039_v11 }
 0x34e   : > { %v1915_v50 = vld [vmem:[#allocation2 + $0x11] sm:$0xff] }
 0x34f   : > { %1884 = vst [vmem:[#allocation2 + $0x28] sm:$0xff] %v1875_v37  ;;  %5562 = vmatmul.mubr.f32.gmra.mrb[72].mxu0 %v1915_v50  ;;  %5630 = vmatmul.mubr.f32.gmra.mrb[80].mxu1 %v1875_v37 }
 0x350   : > { %v1856_v41 = vpop.permute.xlu0 %1855  ;;  %5564 = vmatprep.mubr.msk.f32.mxu0 %vm7038_vm0, %v7039_v11  ;;  %6486 = vmatpush3.bf16.msra.mxu0 %v6485_v36 }
 0x351   : > { %v1876_v43 = vmax.f32 %v7705_v5, %v1856_v41  ;;  %6487 = vmatprep.subr.bf16.mxu0 %v7037_v3  ;;  %5632 = vmatprep.mubr.msk.f32.mxu1 %vm7038_vm0, %v7039_v11  ;;  %v2161_v5 = vld [vmem:[#allocation2 + $0x12] sm:$0xff] }
 0x352   : > { %v1916_v55 = vld [vmem:[#allocation2 + $0x19] sm:$0xff] }
 0x353   : > { %1885 = vst [vmem:[#allocation2 + $0x30] sm:$0xff] %v1876_v43  ;;  %5565 = vmatmul.mubr.f32.gmra.mrb[74].mxu0 %v1916_v55  ;;  %5633 = vmatmul.mubr.f32.gmra.mrb[82].mxu1 %v1876_v43  ;;  %v2162_v25 = vld [vmem:[#allocation2 + $0x1a] sm:$0xff] }
 0x354   : > { %v1858_v47 = vpop.permute.xlu1 %1857  ;;  %5567 = vmatprep.mubr.msk.f32.mxu0 %vm7038_vm0, %v7039_v11  ;;  %6489 = vmatpush3.bf16.msra.mxu0 %v6488_v42 }
 0x355   : > { %v1877_v49 = vmax.f32 %v7709_v22, %v1858_v47  ;;  %6490 = vmatprep.subr.bf16.mxu0 %v7037_v3  ;;  %5635 = vmatprep.mubr.msk.f32.mxu1 %vm7038_vm0, %v7039_v11 }
 0x356   : > { %v1917_v52 = vld [vmem:[#allocation2 + $0x21] sm:$0xff] }
 0x357   : > { %1886 = vst [vmem:[#allocation2 + $0x38] sm:$0xff] %v1877_v49  ;;  %5568 = vmatmul.mubr.f32.gmra.mrb[76].mxu0 %v1917_v52  ;;  %5636 = vmatmul.mubr.f32.gmra.mrb[84].mxu1 %v1877_v49  ;;  %v2163_v6 = vld [vmem:[#allocation2 + $0x22] sm:$0xff] }
 0x358   : > { %v1860_v8 = vpop.permute.xlu0 %1859  ;;  %5570 = vmatprep.mubr.msk.f32.mxu0 %vm7038_vm0, %v7039_v11  ;;  %6492 = vmatpush3.bf16.msra.mxu0 %v6491_v2 }
 0x359   : > { %v1878_v54 = vmax.f32 %v7713_v28, %v1860_v8  ;;  %6493 = vmatprep.subr.bf16.mxu0 %v7037_v3  ;;  %5638 = vmatprep.mubr.msk.f32.mxu1 %vm7038_vm0, %v7039_v11 }
 0x35a   : > { %v1918_v14 = vld [vmem:[#allocation2 + $0x29] sm:$0xff] }
 0x35b   : > { %1887 = vst [vmem:[#allocation2 + $0x40] sm:$0xf] %v1878_v54  ;;  %5571 = vmatmul.mubr.f32.gmra.mrb[78].mxu0 %v1918_v14  ;;  %v2164_v22 = vld [vmem:[#allocation2 + $0x2a] sm:$0xff] }
 0x35c   : > { %5573 = vmatprep.mubr.msk.f32.mxu0 %vm7038_vm0, %v7039_v11  ;;  %6495 = vmatpush3.bf16.msra.mxu0 %v6494_v53 }
 0x35d   : > { %6496 = vmatprep.subr.bf16.mxu0 %v7037_v3 }
 0x35e   : > { %v1919_v20 = vld [vmem:[#allocation2 + $0x31] sm:$0xff] }
 0x35f   : > { %5574 = vmatmul.mubr.f32.gmra.mrb[80].mxu0 %v1919_v20  ;;  %v2165_v10 = vld [vmem:[#allocation2 + $0x32] sm:$0xff] }
 0x360   : > { %5576 = vmatprep.mubr.msk.f32.mxu0 %vm7038_vm0, %v7039_v11  ;;  %6498 = vmatpush3.bf16.msra.mxu0 %v6497_v57 }
 0x361   : > { %6499 = vmatprep.subr.bf16.mxu0 %v7037_v3 }
 0x362   : > { %v1920_v62 = vld [vmem:[#allocation2 + $0x39] sm:$0xff]  ;;  %v1921_v0 = vld [vmem:[#allocation2 + $0x41] sm:$0x3] }
 0x363   : > { %v1896_v63 = vld [vmem:[#allocation2 + $0x40] sm:$0x3]  ;;  %5577 = vmatmul.mubr.f32.gmra.mrb[82].mxu0 %v1920_v62  ;;  %v2167_v28 = vld [vmem:[#allocation2 + $0x42] sm:$0x3] }
 0x364   : > { %5639 = vmatmul.mubr.f32.gmra.mrb[86].mxu1 %v1896_v63  ;;  %5579 = vmatprep.mubr.msk.f32.mxu0 %vm7038_vm0, %v7039_v11  ;;  %v2166_v12 = vld [vmem:[#allocation2 + $0x3a] sm:$0xff] }
 0x365   : > { %6501 = vmatpush3.bf16.msra.mxu0 %v6500_v9  ;;  %5718 = vmatprep.mubr.msk.f32.mxu1 %vm7038_vm0, %v7039_v11 }
 0x366   : > { %6526 = vmatprep.subr.bf16.mxu0 %v7037_v3 }
 0x367   : > { %5580 = vmatmul.mubr.f32.gmra.mrb[84].mxu0 %v1921_v0 }
 0x368   : > { %5673 = vmatprep.mubr.msk.f32.mxu0 %vm7038_vm0, %v7039_v11 }
 0x36b   : > { %5674 = vmatmul.mubr.f32.vlgmr.msra.gmra.mrb[86].mxu0 %v2159_v4 }
 0x36c   : > { %5676 = vmatprep.mubr.msk.f32.mxu0 %vm7038_vm0, %v7039_v11 }
 0x36f   : > { %5677 = vmatmul.mubr.f32.gmra.mrb[88].mxu0 %v2160_v16  ;;  %v7807_v16 = vld [vmem:[%s8348_s3] ss:$0 sm:$0xff]  ;;  %s8355_s3 = sld [smem:[#allocation20_spill]] }
 0x370   : > { %5679 = vmatprep.mubr.msk.f32.mxu0 %vm7038_vm0, %v7039_v11 }
 0x373   : > { %5680 = vmatmul.mubr.f32.gmra.mrb[90].mxu0 %v2161_v5 }
 0x374   : > { %5682 = vmatprep.mubr.msk.f32.mxu0 %vm7038_vm0, %v7039_v11 }
 0x377   : > { %5683 = vmatmul.mubr.f32.gmra.mrb[92].mxu0 %v2162_v25 }
 0x378   : > { %5685 = vmatprep.mubr.msk.f32.mxu0 %vm7038_vm0, %v7039_v11 }
 0x37b   : > { %5686 = vmatmul.mubr.f32.gmra.mrb[94].mxu0 %v2163_v6 }
 0x37c   : > { %5688 = vmatprep.mubr.msk.f32.mxu0 %vm7038_vm0, %v7039_v11 }
 0x37f   : > { %5689 = vmatmul.mubr.f32.gmra.mrb[96].mxu0 %v2164_v22 }
 0x380   : > { %5691 = vmatprep.mubr.msk.f32.mxu0 %vm7038_vm0, %v7039_v11 }
 0x383   : > { %5692 = vmatmul.mubr.f32.gmra.mrb[98].mxu0 %v2165_v10 }
 0x384   : > { %5694 = vmatprep.mubr.msk.f32.mxu0 %vm7038_vm0, %v7039_v11 }
 0x387   : > { %5695 = vmatmul.mubr.f32.gmra.mrb[100].mxu0 %v2166_v12 }
 0x388   : > { %5697 = vmatprep.mubr.msk.f32.mxu0 %vm7038_vm0, %v7039_v11 }
 0x38b   : > { %5698 = vmatmul.mubr.f32.gmra.mrb[102].mxu0 %v2167_v28  ;;  %v4644_v28 = vld [vmem:[%s8349_s8] ss:$0 sm:$0xff]  ;;  %s8361_s8 = sld [smem:[#allocation27_spill]] }
 0x38c   : > { %5798 = vmatprep.mubr.msk.f32.mxu0 %vm7038_vm0, %v7039_v11 }
 0x40e   : > { %v2115_v34 = vpop.f32.mrb[70].mxu1 }
 0x40f   : > { %v5616_v30 = vpop.f32.mrb[71].mxu1 }
 0x412   : > { %v2120_v13 = vpop.f32.mrb[72].mxu1 }
 0x413   : > { %v5619_v48 = vpop.f32.mrb[73].mxu1 }
 0x416   : > { %v2125_v15 = vpop.f32.mrb[74].mxu1 }
 0x417   : > { %v5622_v58 = vpop.f32.mrb[75].mxu1 }
 0x41a   : > { %v2005_v17 = vpop.f32.mrb[68].mxu0  ;;  %v2130_v7 = vpop.f32.mrb[76].mxu1 }
 0x41b   : > { %v2116_v18 = vadd.f32 %v2115_v34, %v2005_v17  ;;  %v5557_v19 = vpop.f32.mrb[69].mxu0  ;;  %v5625_v35 = vpop.f32.mrb[77].mxu1 }
 0x41e   : > { %v2010_v21 = vpop.f32.mrb[70].mxu0  ;;  %v2135_v23 = vpop.f32.mrb[78].mxu1 }
 0x41f   : > { %v2121_v24 = vadd.f32 %v2120_v13, %v2010_v21  ;;  %v5560_v26 = vpop.f32.mrb[71].mxu0  ;;  %v5628_v40 = vpop.f32.mrb[79].mxu1 }
 0x422   : > { %v2015_v27 = vpop.f32.mrb[72].mxu0  ;;  %v2140_v29 = vpop.f32.mrb[80].mxu1 }
 0x423   : > { %v2126_v31 = vadd.f32 %v2125_v15, %v2015_v27  ;;  %v5563_v32 = vpop.f32.mrb[73].mxu0  ;;  %v5631_v33 = vpop.f32.mrb[81].mxu1 }
 0x426   : > { %v2020_v45 = vpop.f32.mrb[74].mxu0  ;;  %v2145_v36 = vpop.f32.mrb[82].mxu1 }
 0x427   : > { %v2131_v37 = vadd.f32 %v2130_v7, %v2020_v45  ;;  %v5566_v38 = vpop.f32.mrb[75].mxu0  ;;  %v5634_v39 = vpop.f32.mrb[83].mxu1 }
 0x42a   : > { %v2025_v50 = vpop.f32.mrb[76].mxu0  ;;  %v2150_v41 = vpop.f32.mrb[84].mxu1 }
 0x42b   : > { %v2136_v42 = vadd.f32 %v2135_v23, %v2025_v50  ;;  %v5569_v43 = vpop.f32.mrb[77].mxu0  ;;  %v5637_v44 = vpop.f32.mrb[85].mxu1 }
 0x42e   : > { %v2030_v46 = vpop.f32.mrb[78].mxu0 }
 0x42f   : > { %v2141_v55 = vadd.f32 %v2140_v29, %v2030_v46  ;;  %v5572_v47 = vpop.f32.mrb[79].mxu0 }
 0x432   : > { %v2035_v2 = vpop.f32.mrb[80].mxu0 }
 0x433   : > { %v2146_v49 = vadd.f32 %v2145_v36, %v2035_v2  ;;  %v5575_v51 = vpop.f32.mrb[81].mxu0 }
 0x436   : > { %v2040_v60 = vpop.f32.mrb[82].mxu0 }
 0x437   : > { %v2155_v52 = vpop.f32.mrb[86].mxu1  ;;  %v7798_v8 = vadd.f32 %v2150_v41, %v2040_v60  ;;  %v5578_v53 = vpop.f32.mrb[83].mxu0 }
 0x438   : > { %v5640_v54 = vpop.f32.mrb[87].mxu1 }
 0x43a   : > { %v2045_v56 = vpop.f32.mrb[84].mxu0 }
 0x43b   : > { %v7800_v1 = vadd.f32 %v2155_v52, %v2045_v56  ;;  %v5581_v14 = vpop.f32.mrb[85].mxu0 }
 0x43e   : > { %v2251_v57 = vpop.f32.mrb[86].mxu0 }
 0x43f   : > { %v2295_v61 = vadd.f32 %v2251_v57, %v2116_v18  ;;  %v5675_v20 = vpop.f32.mrb[87].mxu0 }
 0x441   : > { %v2311_v9 = vadd.f32 %v7803_v59, %v2295_v61 }
 0x442   : > { %v2256_v62 = vpop.f32.mrb[88].mxu0 }
 0x443   : > { %v2320_v63 = vmax.f32 %v2311_v9, 0.0  ;;  %v2296_v0 = vadd.f32 %v2256_v62, %v2121_v24  ;;  %v5678_v4 = vpop.f32.mrb[89].mxu0 }
 0x445   : > { %v2312_v5 = vadd.f32 %v7803_v59, %v2296_v0  ;;  %v2336_v6 = vmul.f32 %v7807_v16, %v2320_v63 }
 0x446   : > { %v2261_v25 = vpop.f32.mrb[90].mxu0 }
 0x447   : > { %v2321_v22 = vmax.f32 %v2312_v5, 0.0  ;;  %v2297_v10 = vadd.f32 %v2261_v25, %v2126_v31  ;;  %v5681_v12 = vpop.f32.mrb[91].mxu0  ;;  %v2352_v48 = vadd.f32 %v4644_v28, %v2336_v6  ;;  %v2361_v5 = vld [vmem:[%s8341_s14] sm:$0xff]  ;;  %v2364_v25 = vld [vmem:[%s8341_s14 + $0x18] sm:$0xff] }
 0x448   : > { %v2365_v6 = vld [vmem:[%s8341_s14 + $0x20] sm:$0xf]  ;;  %v2477_v12 = vld [vmem:[%s7101_s19 + $0x10] sm:$0xff] }
 0x449   : > { %v2337_v34 = vmul.f32 %v7807_v16, %v2321_v22  ;;  %v2313_v30 = vadd.f32 %v7803_v59, %v2297_v10  ;;  %v2475_v22 = vld [vmem:[%s7101_s19] sm:$0xff]  ;;  %v2476_v10 = vld [vmem:[%s7101_s19 + $0x8] sm:$0xff] }
 0x44a   : > { %v2266_v13 = vpop.f32.mrb[92].mxu0 }
 0x44b   : > { %v2353_v15 = vadd.f32 %v4644_v28, %v2337_v34  ;;  %v2322_v58 = vmax.f32 %v2313_v30, 0.0  ;;  %v2298_v17 = vadd.f32 %v2266_v13, %v2131_v37  ;;  %v5684_v7 = vpop.f32.mrb[93].mxu0  ;;  %v2479_v34 = vld [vmem:[%s7101_s19 + $0x20] sm:$0xf]  ;;  %v2626_v13 = vld [vmem:[%s7106_s24 + $0x8] sm:$0xff] }
 0x44c   : > { %v2625_v30 = vld [vmem:[%s7106_s24] sm:$0xff]  ;;  %v2628_v7 = vld [vmem:[%s7106_s24 + $0x18] sm:$0xff] }
 0x44d   : > { %v2314_v18 = vadd.f32 %v7803_v59, %v2298_v17  ;;  %v6503_v19 = vpack.c.bf16 %v2353_v15, %v2352_v48  ;;  %v2338_v21 = vmul.f32 %v7807_v16, %v2322_v58  ;;  %v4657_v48 = vld [vmem:[%s7106_s24 + $0x80] sm:$0xff]  ;;  %v6551_v15 = vpack.c.bf16 %v2626_v13, %v2625_v30  ;;  %v4658_v58 = vld [vmem:[%s7106_s24 + $0x88] sm:$0xff]  ;;  %v2627_v17 = vld [vmem:[%s7106_s24 + $0x10] sm:$0xff] }
 0x44e   : > { %v2271_v35 = vpop.f32.mrb[94].mxu0 }
 0x44f   : > { %v2323_v23 = vmax.f32 %v2314_v18, 0.0  ;;  %v2299_v24 = vadd.f32 %v2271_v35, %v2136_v42  ;;  %v5687_v26 = vpop.f32.mrb[95].mxu0  ;;  %6504 = vmatpush3.bf16.msra.mxu1 %v6503_v19  ;;  %v2354_v31 = vadd.f32 %v4644_v28, %v2338_v21  ;;  %v6527_v18 = vpack.c.bf16 %v4658_v58, %v4657_v48  ;;  %v4660_v35 = vld [vmem:[%s7106_s24 + $0x98] sm:$0xff] }
 0x450   : > { %6505 = vmatprep.subr.bf16.mxu1 %v7037_v3  ;;  %v6554_v21 = vpack.c.bf16 %v2628_v7, %v2627_v17  ;;  %v2630_v26 = vld [vmem:[%s7106_s24 + $0x28] sm:$0xff] }
 0x451   : > { %v2339_v40 = vmul.f32 %v7807_v16, %v2323_v23  ;;  %v2315_v27 = vadd.f32 %v7803_v59, %v2299_v24  ;;  %6528 = vmatpush3.bf16.msra.mxu0 %v6527_v18  ;;  %v2629_v24 = vld [vmem:[%s7106_s24 + $0x20] sm:$0xff] }
 0x452   : > { %v2276_v29 = vpop.f32.mrb[96].mxu0  ;;  %6529 = vmatprep.subr.bf16.mxu0 %v7037_v3 }
 0x453   : > { %v2355_v32 = vadd.f32 %v4644_v28, %v2339_v40  ;;  %v2324_v33 = vmax.f32 %v2315_v27, 0.0  ;;  %v2300_v45 = vadd.f32 %v2276_v29, %v2141_v55  ;;  %v5690_v36 = vpop.f32.mrb[97].mxu0  ;;  %v4661_v40 = vld [vmem:[%s7106_s24 + $0xa0] sm:$0xff]  ;;  %v4662_v27 = vld [vmem:[%s7106_s24 + $0xa8] sm:$0xff]  ;;  %v6557_v29 = vpack.c.bf16 %v2630_v26, %v2629_v24 }
 0x454   : > { %v4664_v36 = vld [vmem:[%s7106_s24 + $0xb8] sm:$0xff] }
 0x455   : > { %v2316_v37 = vadd.f32 %v7803_v59, %v2300_v45  ;;  %v6506_v38 = vpack.c.bf16 %v2355_v32, %v2354_v31  ;;  %v2340_v50 = vmul.f32 %v7807_v16, %v2324_v33  ;;  %v6533_v31 = vpack.c.bf16 %v4662_v27, %v4661_v40  ;;  %v2631_v32 = vld [vmem:[%s7106_s24 + $0x30] sm:$0xff]  ;;  %v2632_v33 = vld [vmem:[%s7106_s24 + $0x38] sm:$0xff] }
 0x456   : > { %v2281_v39 = vpop.f32.mrb[98].mxu0  ;;  %v4663_v45 = vld [vmem:[%s7106_s24 + $0xb0] sm:$0xff] }
 0x457   : > { %v2325_v41 = vmax.f32 %v2316_v37, 0.0  ;;  %v2301_v42 = vadd.f32 %v2281_v39, %v2146_v49  ;;  %v5693_v43 = vpop.f32.mrb[99].mxu0  ;;  %6507 = vmatpush3.bf16.msra.mxu1 %v6506_v38  ;;  %v2356_v2 = vadd.f32 %v4644_v28, %v2340_v50  ;;  %v6560_v37 = vpack.c.bf16 %v2632_v33, %v2631_v32  ;;  %v2633_v39 = vld [vmem:[%s7106_s24 + $0x40] sm:$0xff]  ;;  %v2634_v50 = vld [vmem:[%s7106_s24 + $0x48] sm:$0xff] }
 0x458   : > { %6508 = vmatprep.subr.bf16.mxu1 %v7037_v3  ;;  %v6563_v43 = vpack.c.bf16 %v2634_v50, %v2633_v39  ;;  %v4674_v32 = vld [vmem:[%s7106_s24 + $0x108] sm:$0xff] }
 0x459   : > { %v2341_v44 = vmul.f32 %v7807_v16, %v2325_v41  ;;  %v2317_v46 = vadd.f32 %v7803_v59, %v2301_v42  ;;  %v4665_v41 = vld [vmem:[%s7106_s24 + $0xc0] sm:$0xff]  ;;  %v4666_v42 = vld [vmem:[%s7106_s24 + $0xc8] sm:$0xff] }
 0x45a   : > { %v2286_v47 = vpop.f32.mrb[100].mxu0 }
 0x45b   : > { %v2357_v55 = vadd.f32 %v4644_v28, %v2341_v44  ;;  %v2326_v51 = vmax.f32 %v2317_v46, 0.0  ;;  %v2302_v60 = vadd.f32 %v2286_v47, %v7798_v8  ;;  %v5696_v52 = vpop.f32.mrb[101].mxu0  ;;  %v6539_v44 = vpack.c.bf16 %v4666_v42, %v4665_v41  ;;  %v2635_v46 = vld [vmem:[%s7106_s24 + $0x50] sm:$0xff]  ;;  %v2636_v47 = vld [vmem:[%s7106_s24 + $0x58] sm:$0xff] }
 0x45c   : > { %v2638_v52 = vld [vmem:[%s7106_s24 + $0x68] sm:$0xff] }
 0x45d   : > { %v2318_v53 = vadd.f32 %v7803_v59, %v2302_v60  ;;  %v6509_v54 = vpack.c.bf16 %v2357_v55, %v2356_v2  ;;  %v2342_v49 = vmul.f32 %v7807_v16, %v2326_v51  ;;  %v6566_v2 = vpack.c.bf16 %v2636_v47, %v2635_v46  ;;  %v2637_v60 = vld [vmem:[%s7106_s24 + $0x60] sm:$0xff] }
 0x45e   : > { %v2291_v56 = vpop.f32.mrb[102].mxu0 }
 0x45f   : > { %v2327_v14 = vmax.f32 %v2318_v53, 0.0  ;;  %v2303_v57 = vadd.f32 %v2291_v56, %v7800_v1  ;;  %v5699_v61 = vpop.f32.mrb[103].mxu0  ;;  %6510 = vmatpush3.bf16.msra.mxu1 %v6509_v54  ;;  %v2358_v8 = vadd.f32 %v4644_v28, %v2342_v49  ;;  %v2639_v49 = vld [vmem:[%s7106_s24 + $0x70] sm:$0xff] }
 0x460   : > { %6511 = vmatprep.subr.bf16.mxu1 %v7037_v3 }
 0x461   : > { %v2343_v20 = vmul.f32 %v7807_v16, %v2327_v14  ;;  %v2319_v9 = vadd.f32 %v7803_v59, %v2303_v57  ;;  %v2362_v59 = vld [vmem:[%s8341_s14 + $0x8] sm:$0xff]  ;;  %v2640_v14 = vld [vmem:[%s7106_s24 + $0x78] sm:$0xff] }
 0x462   : > { %v6572_v61 = vpack.c.bf16 %v2640_v14, %v2639_v49  ;;  %v4683_v14 = vld [vmem:[%s7106_s24 + $0x150] sm:$0xff] }
 0x463   : > { %v2359_v62 = vadd.f32 %v4644_v28, %v2343_v20  ;;  %v2328_v63 = vmax.f32 %v2319_v9, 0.0  ;;  %v4667_v9 = vld [vmem:[%s7106_s24 + $0xd0] sm:$0xff] }
 0x465   : > { %v2344_v0 = vmul.f32 %v7807_v16, %v2328_v63  ;;  %v6512_v4 = vpack.c.bf16 %v2359_v62, %v2358_v8  ;;  %v2363_v16 = vld [vmem:[%s8341_s14 + $0x10] sm:$0xff]  ;;  %v4668_v8 = vld [vmem:[%s7106_s24 + $0xd8] sm:$0xff] }
 0x466   : > { %v6542_v62 = vpack.c.bf16 %v4668_v8, %v4667_v9  ;;  %v4685_v9 = vld [vmem:[%s7106_s24 + $0x160] sm:$0xff]  ;;  %v4686_v8 = vld [vmem:[%s7106_s24 + $0x168] sm:$0xff] }
 0x467   : > { %6513 = vmatpush3.bf16.msra.mxu1 %v6512_v4  ;;  %v2360_v1 = vadd.f32 %v4644_v28, %v2344_v0  ;;  %v2478_v28 = vld [vmem:[%s7101_s19 + $0x18] sm:$0xff] }
 0x468   : > { %5716 = vmatprep.subr.mxu1 %v7039_v11 }
 0x46b   : > { %5717 = vmatpush3.msk.msra.mxu1 %vm1556_vm2, %v2360_v1 }
 0x46c   : > { %5719 = vmatmul.mubr.msk.f32.vlgmr.msra.gmra.mrb[88].mxu1 %vm2366_vm3, %v2361_v5  ;;  %6514 = vmatprep.subr.bf16.mxu1 %v7037_v3 }
 0x46d   : > { %6516 = vmatpush3.bf16.msra.mxu1 %v6503_v19  ;;  %5721 = vmatprep.mubr.msk.f32.mxu1 %vm7038_vm0, %v7039_v11  ;;  %v4659_v19 = vld [vmem:[%s7106_s24 + $0x90] sm:$0xff] }
 0x46e   : > { %6517 = vmatprep.subr.bf16.mxu1 %v7037_v3  ;;  %v6530_v23 = vpack.c.bf16 %v4660_v35, %v4659_v19 }
 0x470   : > { %5722 = vmatmul.mubr.msk.f32.gmra.mrb[90].mxu1 %vm2366_vm3, %v2362_v59  ;;  %6531 = vmatpush3.bf16.msra.mxu0 %v6530_v23 }
 0x471   : > { %6519 = vmatpush3.bf16.msra.mxu1 %v6506_v38  ;;  %5724 = vmatprep.mubr.msk.f32.mxu1 %vm7038_vm0, %v7039_v11  ;;  %v6536_v38 = vpack.c.bf16 %v4664_v36, %v4663_v45 }
 0x472   : > { %6520 = vmatprep.subr.bf16.mxu1 %v7037_v3  ;;  %6532 = vmatprep.subr.bf16.mxu0 %v7037_v3 }
 0x474   : > { %5725 = vmatmul.mubr.msk.f32.gmra.mrb[92].mxu1 %vm2366_vm3, %v2363_v16  ;;  %6534 = vmatpush3.bf16.msra.mxu0 %v6533_v31  ;;  %v4673_v31 = vld [vmem:[%s7106_s24 + $0x100] sm:$0xff] }
 0x475   : > { %6522 = vmatpush3.bf16.msra.mxu1 %v6509_v54  ;;  %5727 = vmatprep.mubr.msk.f32.mxu1 %vm7038_vm0, %v7039_v11  ;;  %v6569_v54 = vpack.c.bf16 %v2638_v52, %v2637_v60  ;;  %v6575_v45 = vpack.c.bf16 %v4674_v32, %v4673_v31  ;;  %v4681_v52 = vld [vmem:[%s7106_s24 + $0x140] sm:$0xff] }
 0x476   : > { %6523 = vmatprep.subr.bf16.mxu1 %v7037_v3  ;;  %6535 = vmatprep.subr.bf16.mxu0 %v7037_v3 }
 0x478   : > { %5728 = vmatmul.mubr.msk.f32.gmra.mrb[94].mxu1 %vm2366_vm3, %v2364_v25  ;;  %6537 = vmatpush3.bf16.msra.mxu0 %v6536_v38  ;;  %v4671_v25 = vld [vmem:[%s7106_s24 + $0xf0] sm:$0xff]  ;;  %v4676_v38 = vld [vmem:[%s7106_s24 + $0x118] sm:$0xff] }
 0x479   : > { %6525 = vmatpush3.bf16.msra.mxu1 %v6512_v4  ;;  %5730 = vmatprep.mubr.msk.f32.mxu1 %vm7038_vm0, %v7039_v11  ;;  %v4669_v4 = vld [vmem:[%s7106_s24 + $0xe0] sm:$0xff] }
 0x47a   : > { %5749 = vmatprep.subr.mxu1 %v7039_v11  ;;  %6538 = vmatprep.subr.bf16.mxu0 %v7037_v3 }
 0x47c   : > { %5731 = vmatmul.mubr.msk.f32.gmra.mrb[96].mxu1 %vm2366_vm3, %v2365_v6  ;;  %6540 = vmatpush3.bf16.msra.mxu0 %v6539_v44  ;;  %v4672_v6 = vld [vmem:[%s7106_s24 + $0xf8] sm:$0xff]  ;;  %v4678_v44 = vld [vmem:[%s7106_s24 + $0x128] sm:$0xff] }
 0x47d   : > { %5750 = vmatpush3.msk.msra.mxu1 %vm1556_vm2, %v2360_v1  ;;  %5751 = vmatprep.mubr.msk.f32.mxu1 %vm7038_vm0, %v7039_v11  ;;  %v4670_v1 = vld [vmem:[%s7106_s24 + $0xe8] sm:$0xff] }
 0x47e   : > { %6550 = vmatprep.subr.bf16.mxu1 %v7037_v3  ;;  %6541 = vmatprep.subr.bf16.mxu0 %v7037_v3  ;;  %v6545_v5 = vpack.c.bf16 %v4670_v1, %v4669_v4 }
 0x480   : > { %5752 = vmatmul.mubr.msk.f32.vlgmr.msra.gmra.mrb[98].mxu1 %vm2366_vm3, %v2475_v22  ;;  %6543 = vmatpush3.bf16.msra.mxu0 %v6542_v62  ;;  %v6548_v22 = vpack.c.bf16 %v4672_v6, %v4671_v25  ;;  %v6593_v62 = vpack.c.bf16 %v4686_v8, %v4685_v9 }
 0x481   : > { %5754 = vmatprep.mubr.msk.f32.mxu1 %vm7038_vm0, %v7039_v11  ;;  %6552 = vmatpush3.bf16.msra.mxu1 %v6551_v15 }
 0x482   : > { %6553 = vmatprep.subr.bf16.mxu1 %v7037_v3  ;;  %6544 = vmatprep.subr.bf16.mxu0 %v7037_v3 }
 0x484   : > { %5755 = vmatmul.mubr.msk.f32.gmra.mrb[100].mxu1 %vm2366_vm3, %v2476_v10  ;;  %6546 = vmatpush3.bf16.msra.mxu0 %v6545_v5 }
 0x485   : > { %5757 = vmatprep.mubr.msk.f32.mxu1 %vm7038_vm0, %v7039_v11  ;;  %6555 = vmatpush3.bf16.msra.mxu1 %v6554_v21 }
 0x486   : > { %6556 = vmatprep.subr.bf16.mxu1 %v7037_v3  ;;  %6547 = vmatprep.subr.bf16.mxu0 %v7037_v3 }
 0x488   : > { %5758 = vmatmul.mubr.msk.f32.gmra.mrb[102].mxu1 %vm2366_vm3, %v2477_v12  ;;  %6549 = vmatpush3.bf16.msra.mxu0 %v6548_v22 }
 0x489   : > { %5760 = vmatprep.mubr.msk.f32.mxu1 %vm7038_vm0, %v7039_v11  ;;  %6558 = vmatpush3.bf16.msra.mxu1 %v6557_v29 }
 0x48a   : > { %6559 = vmatprep.subr.bf16.mxu1 %v7037_v3  ;;  %6574 = vmatprep.subr.bf16.mxu0 %v7037_v3 }
 0x48c   : > { %5761 = vmatmul.mubr.msk.f32.gmra.mrb[104].mxu1 %vm2366_vm3, %v2478_v28 }
 0x48d   : > { %5763 = vmatprep.mubr.msk.f32.mxu1 %vm7038_vm0, %v7039_v11  ;;  %6561 = vmatpush3.bf16.msra.mxu1 %v6560_v37  ;;  %v4675_v37 = vld [vmem:[%s7106_s24 + $0x110] sm:$0xff] }
 0x48e   : > { %6562 = vmatprep.subr.bf16.mxu1 %v7037_v3  ;;  %v6578_v41 = vpack.c.bf16 %v4676_v38, %v4675_v37  ;;  %v4689_v37 = vld [vmem:[%s7111_s30] ss:$0 sm:$0xff] }
 0x490   : > { %5764 = vmatmul.mubr.msk.f32.gmra.mrb[106].mxu1 %vm2366_vm3, %v2479_v34 }
 0x491   : > { %5845 = vmatprep.mubr.msk.f32.mxu1 %vm7038_vm0, %v7039_v11  ;;  %6564 = vmatpush3.bf16.msra.mxu1 %v6563_v43  ;;  %v4677_v43 = vld [vmem:[%s7106_s24 + $0x120] sm:$0xff] }
 0x492   : > { %6565 = vmatprep.subr.bf16.mxu1 %v7037_v3  ;;  %v6581_v47 = vpack.c.bf16 %v4678_v44, %v4677_v43 }
 0x495   : > { %6567 = vmatpush3.bf16.msra.mxu1 %v6566_v2  ;;  %v4679_v2 = vld [vmem:[%s7106_s24 + $0x130] sm:$0xff] }
 0x496   : > { %6568 = vmatprep.subr.bf16.mxu1 %v7037_v3 }
 0x499   : > { %6570 = vmatpush3.bf16.msra.mxu1 %v6569_v54 }
 0x49a   : > { %6571 = vmatprep.subr.bf16.mxu1 %v7037_v3 }
 0x49d   : > { %6573 = vmatpush3.bf16.msra.mxu1 %v6572_v61 }
 0x49e   : > { %6610 = vmatprep.subr.bf16.mxu1 %v7037_v3 }
 0x53f   : > { %v2451_v55 = vpop.f32.mrb[88].mxu1 }
 0x540   : > { %v5720_v51 = vpop.f32.mrb[89].mxu1 }
 0x543   : > { %v2456_v53 = vpop.f32.mrb[90].mxu1 }
 0x544   : > { %v5723_v56 = vpop.f32.mrb[91].mxu1 }
 0x547   : > { %v2461_v57 = vpop.f32.mrb[92].mxu1 }
 0x548   : > { %v5726_v20 = vpop.f32.mrb[93].mxu1 }
 0x54b   : > { %v2466_v63 = vpop.f32.mrb[94].mxu1 }
 0x54c   : > { %v5729_v0 = vpop.f32.mrb[95].mxu1 }
 0x54d   : > { %v4688_v0 = vld [vmem:[%s7106_s24 + $0x178] sm:$0xff] }
 0x54f   : > { %v2471_v59 = vpop.f32.mrb[96].mxu1 }
 0x550   : > { %v5732_v16 = vpop.f32.mrb[97].mxu1 }
 0x553   : > { %v2561_v10 = vpop.f32.mrb[98].mxu1 }
 0x554   : > { %v2585_v12 = vmax.f32 %v2451_v55, %v2561_v10  ;;  %v5753_v28 = vpop.f32.mrb[99].mxu1  ;;  %v4680_v55 = vld [vmem:[%s7106_s24 + $0x138] sm:$0xff] }
 0x555   : > { %v6584_v60 = vpack.c.bf16 %v4680_v55, %v4679_v2 }
 0x556   : > { %2595 = vrot.lane.b32.xlu1 %v2585_v12, %s8313_s23 }
 0x557   : > { %v2566_v34 = vpop.f32.mrb[100].mxu1 }
 0x558   : > { %v2586_v30 = vmax.f32 %v2456_v53, %v2566_v34  ;;  %v5756_v13 = vpop.f32.mrb[101].mxu1  ;;  %v4682_v53 = vld [vmem:[%s7106_s24 + $0x148] sm:$0xff] }
 0x559   : > { %v6587_v49 = vpack.c.bf16 %v4682_v53, %v4681_v52 }
 0x55a   : > { %2597 = vrot.lane.b32.xlu0 %v2586_v30, %s8313_s23 }
 0x55b   : > { %v2571_v48 = vpop.f32.mrb[102].mxu1 }
 0x55c   : > { %v2587_v15 = vmax.f32 %v2461_v57, %v2571_v48  ;;  %v5759_v58 = vpop.f32.mrb[103].mxu1  ;;  %v4684_v57 = vld [vmem:[%s7106_s24 + $0x158] sm:$0xff] }
 0x55d   : > { %v6590_v20 = vpack.c.bf16 %v4684_v57, %v4683_v14 }
 0x55e   : > { %2599 = vrot.lane.b32.xlu1 %v2587_v15, %s8313_s23 }
 0x55f   : > { %v2576_v17 = vpop.f32.mrb[104].mxu1 }
 0x560   : > { %v2588_v7 = vmax.f32 %v2466_v63, %v2576_v17  ;;  %v5762_v18 = vpop.f32.mrb[105].mxu1  ;;  %v4687_v63 = vld [vmem:[%s7106_s24 + $0x170] sm:$0xff] }
 0x561   : > { %v6596_v4 = vpack.c.bf16 %v4688_v0, %v4687_v63  ;;  %v2978_v63 = vld [vmem:[%s8343_s6 + $0x8] sm:$0xff]  ;;  %v2979_v0 = vld [vmem:[%s8343_s6 + $0x10] sm:$0xf] }
 0x562   : > { %2601 = vrot.lane.b32.xlu0 %v2588_v7, %s8313_s23 }
 0x563   : > { %v2581_v19 = vpop.f32.mrb[106].mxu1 }
 0x564   : > { %v2589_v35 = vmax.f32 %v2471_v59, %v2581_v19  ;;  %v5765_v21 = vpop.f32.mrb[107].mxu1 }
 0x566   : > { %2603 = vrot.lane.b32.xlu1 %v2589_v35, %s8313_s23 }
 0x5c8   : > { %v2596_v23 = vpop.permute.xlu1 %2595 }
 0x5c9   : > { %v2610_v24 = vmax.f32 %v2585_v12, %v2596_v23 }
 0x5cb   : > { %2615 = vst [vmem:[#allocation3] sm:$0xff] %v2610_v24  ;;  %5846 = vmatmul.mubr.f32.vlgmr.msra.gmra.mrb[108].mxu1 %v2610_v24 }
 0x5cc   : > { %v2598_v26 = vpop.permute.xlu0 %2597  ;;  %5848 = vmatprep.mubr.msk.f32.mxu1 %vm7038_vm0, %v7039_v11 }
 0x5cd   : > { %v2611_v40 = vmax.f32 %v2586_v30, %v2598_v26 }
 0x5cf   : > { %2616 = vst [vmem:[#allocation3 + $0x8] sm:$0xff] %v2611_v40  ;;  %5849 = vmatmul.mubr.f32.gmra.mrb[110].mxu1 %v2611_v40 }
 0x5d0   : > { %v2600_v27 = vpop.permute.xlu1 %2599  ;;  %5851 = vmatprep.mubr.msk.f32.mxu1 %vm7038_vm0, %v7039_v11 }
 0x5d1   : > { %v2612_v29 = vmax.f32 %v2587_v15, %v2600_v27 }
 0x5d3   : > { %2617 = vst [vmem:[#allocation3 + $0x10] sm:$0xff] %v2612_v29  ;;  %5852 = vmatmul.mubr.f32.gmra.mrb[112].mxu1 %v2612_v29 }
 0x5d4   : > { %v2602_v33 = vpop.permute.xlu0 %2601  ;;  %5854 = vmatprep.mubr.msk.f32.mxu1 %vm7038_vm0, %v7039_v11 }
 0x5d5   : > { %v2613_v36 = vmax.f32 %v2588_v7, %v2602_v33 }
 0x5d6   : > { %v2641_v39 = vld [vmem:[#allocation3 + $0x1] sm:$0xff] }
 0x5d7   : > { %2618 = vst [vmem:[#allocation3 + $0x18] sm:$0xff] %v2613_v36  ;;  %5799 = vmatmul.mubr.f32.vlgmr.msra.gmra.mrb[104].mxu0 %v2641_v39  ;;  %5855 = vmatmul.mubr.f32.gmra.mrb[114].mxu1 %v2613_v36  ;;  %v2843_v1 = vld [vmem:[#allocation3 + $0x2] sm:$0xff] }
 0x5d8   : > { %6576 = vmatpush3.bf16.msra.mxu0 %v6575_v45  ;;  %v2604_v50 = vpop.permute.xlu1 %2603  ;;  %5801 = vmatprep.mubr.msk.f32.mxu0 %vm7038_vm0, %v7039_v11 }
 0x5d9   : > { %v2614_v42 = vmax.f32 %v2589_v35, %v2604_v50  ;;  %6577 = vmatprep.subr.bf16.mxu0 %v7037_v3  ;;  %5857 = vmatprep.mubr.msk.f32.mxu1 %vm7038_vm0, %v7039_v11 }
 0x5da   : > { %v2642_v46 = vld [vmem:[#allocation3 + $0x9] sm:$0xff] }
 0x5db   : > { %2619 = vst [vmem:[#allocation3 + $0x20] sm:$0xf] %v2614_v42  ;;  %5802 = vmatmul.mubr.f32.gmra.mrb[106].mxu0 %v2642_v46  ;;  %v2844_v5 = vld [vmem:[#allocation3 + $0xa] sm:$0xff] }
 0x5dc   : > { %6579 = vmatpush3.bf16.msra.mxu0 %v6578_v41  ;;  %5804 = vmatprep.mubr.msk.f32.mxu0 %vm7038_vm0, %v7039_v11 }
 0x5dd   : > { %6580 = vmatprep.subr.bf16.mxu0 %v7037_v3 }
 0x5de   : > { %v2643_v51 = vld [vmem:[#allocation3 + $0x11] sm:$0xff] }
 0x5df   : > { %5805 = vmatmul.mubr.f32.gmra.mrb[108].mxu0 %v2643_v51  ;;  %v2845_v59 = vld [vmem:[#allocation3 + $0x12] sm:$0xff] }
 0x5e0   : > { %6582 = vmatpush3.bf16.msra.mxu0 %v6581_v47  ;;  %5807 = vmatprep.mubr.msk.f32.mxu0 %vm7038_vm0, %v7039_v11 }
 0x5e1   : > { %6583 = vmatprep.subr.bf16.mxu0 %v7037_v3 }
 0x5e2   : > { %v2644_v54 = vld [vmem:[#allocation3 + $0x19] sm:$0xff]  ;;  %v2645_v61 = vld [vmem:[#allocation3 + $0x21] sm:$0x3] }
 0x5e3   : > { %v2624_v56 = vld [vmem:[#allocation3 + $0x20] sm:$0x3]  ;;  %5808 = vmatmul.mubr.f32.gmra.mrb[110].mxu0 %v2644_v54  ;;  %v2847_v25 = vld [vmem:[#allocation3 + $0x22] sm:$0x3] }
 0x5e4   : > { %5858 = vmatmul.mubr.f32.gmra.mrb[116].mxu1 %v2624_v56  ;;  %6585 = vmatpush3.bf16.msra.mxu0 %v6584_v60  ;;  %v2846_v16 = vld [vmem:[#allocation3 + $0x1a] sm:$0xff] }
 0x5e5   : > { %5810 = vmatprep.mubr.msk.f32.mxu0 %vm7038_vm0, %v7039_v11  ;;  %6586 = vmatprep.subr.bf16.mxu0 %v7037_v3 }
 0x5e6   : > { %5977 = vmatprep.mubr.msk.f32.mxu1 %vm7038_vm0, %v7039_v11 }
 0x5e7   : > { %5811 = vmatmul.mubr.f32.gmra.mrb[112].mxu0 %v2645_v61 }
 0x5e8   : > { %6588 = vmatpush3.bf16.msra.mxu0 %v6587_v49  ;;  %5892 = vmatprep.mubr.msk.f32.mxu0 %vm7038_vm0, %v7039_v11 }
 0x5e9   : > { %6589 = vmatprep.subr.bf16.mxu0 %v7037_v3 }
 0x5ec   : > { %6591 = vmatpush3.bf16.msra.mxu0 %v6590_v20 }
 0x5ed   : > { %6592 = vmatprep.subr.bf16.mxu0 %v7037_v3 }
 0x5f0   : > { %6594 = vmatpush3.bf16.msra.mxu0 %v6593_v62  ;;  %v2977_v62 = vld [vmem:[%s8343_s6] sm:$0xff]  ;;  %s8360_s6 = sld [smem:[#allocation26_spill]] }
 0x5f1   : > { %6595 = vmatprep.subr.bf16.mxu0 %v7037_v3 }
 0x5f4   : > { %6597 = vmatpush3.bf16.msra.mxu0 %v6596_v4  ;;  %v3073_v4 = vld [vmem:[%s8350_s2] sm:$0xff] }
 0x5f5   : > { %6598 = vmatprep.subr.bf16.mxu0 %v7037_v3 }
 0x5f7   : > { %5893 = vmatmul.mubr.f32.vlgmr.msra.gmra.mrb[114].mxu0 %v2843_v1  ;;  %v3074_v1 = vld [vmem:[%s8350_s2 + $0x8] sm:$0xff] }
 0x5f8   : > { %5895 = vmatprep.mubr.msk.f32.mxu0 %vm7038_vm0, %v7039_v11 }
 0x5fb   : > { %5896 = vmatmul.mubr.f32.gmra.mrb[116].mxu0 %v2844_v5  ;;  %v3075_v5 = vld [vmem:[%s8350_s2 + $0x10] sm:$0xf]  ;;  %s8354_s2 = sld [smem:[#allocation19_spill]] }
 0x5fc   : > { %5898 = vmatprep.mubr.msk.f32.mxu0 %vm7038_vm0, %v7039_v11 }
 0x5ff   : > { %5899 = vmatmul.mubr.f32.gmra.mrb[118].mxu0 %v2845_v59  ;;  %v3189_v59 = vld [vmem:[%s8351_s16] sm:$0xff] }
 0x600   : > { %5901 = vmatprep.mubr.msk.f32.mxu0 %vm7038_vm0, %v7039_v11 }
 0x603   : > { %5902 = vmatmul.mubr.f32.gmra.mrb[120].mxu0 %v2846_v16  ;;  %v3190_v16 = vld [vmem:[%s8351_s16 + $0x8] sm:$0xff] }
 0x604   : > { %5904 = vmatprep.mubr.msk.f32.mxu0 %vm7038_vm0, %v7039_v11 }
 0x607   : > { %5905 = vmatmul.mubr.f32.gmra.mrb[122].mxu0 %v2847_v25  ;;  %v4698_v25 = vld [vmem:[%s8351_s16 + $0x80] sm:$0xff] }
 0x608   : > { %5917 = vmatprep.mubr.msk.f32.mxu0 %vm7038_vm0, %v7039_v11 }
 0x69e   : > { %v2819_v6 = vpop.f32.mrb[108].mxu1 }
 0x69f   : > { %v5847_v22 = vpop.f32.mrb[109].mxu1 }
 0x6a0   : > { %v4699_v22 = vld [vmem:[%s8351_s16 + $0x88] sm:$0xff] }
 0x6a2   : > { %v2824_v10 = vpop.f32.mrb[110].mxu1 }
 0x6a3   : > { %v5850_v12 = vpop.f32.mrb[111].mxu1 }
 0x6a4   : > { %v3192_v12 = vld [vmem:[%s8351_s16 + $0x18] sm:$0xff] }
 0x6a6   : > { %v2829_v28 = vpop.f32.mrb[112].mxu1 }
 0x6a7   : > { %v5853_v34 = vpop.f32.mrb[113].mxu1 }
 0x6a8   : > { %v4700_v34 = vld [vmem:[%s8351_s16 + $0x90] sm:$0xff] }
 0x6aa   : > { %v2729_v30 = vpop.f32.mrb[104].mxu0  ;;  %v2834_v13 = vpop.f32.mrb[114].mxu1 }
 0x6ab   : > { %v2820_v48 = vadd.f32 %v2819_v6, %v2729_v30  ;;  %v5800_v15 = vpop.f32.mrb[105].mxu0  ;;  %v5856_v58 = vpop.f32.mrb[115].mxu1  ;;  %v6635_v6 = vpack.c.bf16 %v3190_v16, %v3189_v59  ;;  %v4701_v30 = vld [vmem:[%s8351_s16 + $0x98] sm:$0xff] }
 0x6ac   : > { %v3193_v15 = vld [vmem:[%s8351_s16 + $0x20] sm:$0xff]  ;;  %v3194_v58 = vld [vmem:[%s8351_s16 + $0x28] sm:$0xff] }
 0x6ae   : > { %v2734_v17 = vpop.f32.mrb[106].mxu0 }
 0x6af   : > { %v2825_v7 = vadd.f32 %v2824_v10, %v2734_v17  ;;  %v5803_v18 = vpop.f32.mrb[107].mxu0  ;;  %v3191_v10 = vld [vmem:[%s8351_s16 + $0x10] sm:$0xff]  ;;  %v4702_v17 = vld [vmem:[%s8351_s16 + $0xa0] sm:$0xff] }
 0x6b0   : > { %v6641_v18 = vpack.c.bf16 %v3194_v58, %v3193_v15 }
 0x6b2   : > { %v2739_v19 = vpop.f32.mrb[108].mxu0 }
 0x6b3   : > { %v2830_v35 = vadd.f32 %v2829_v28, %v2739_v19  ;;  %v5806_v21 = vpop.f32.mrb[109].mxu0  ;;  %v6611_v28 = vpack.c.bf16 %v4699_v22, %v4698_v25 }
 0x6b4   : > { %v3196_v21 = vld [vmem:[%s8351_s16 + $0x38] sm:$0xff] }
 0x6b5   : > { %6612 = vmatpush3.bf16.msra.mxu1 %v6611_v28  ;;  %v4714_v28 = vld [vmem:[%s8351_s16 + $0x100] sm:$0xff] }
 0x6b6   : > { %v2744_v23 = vpop.f32.mrb[110].mxu0  ;;  %6613 = vmatprep.subr.bf16.mxu1 %v7037_v3 }
 0x6b7   : > { %v2839_v24 = vpop.f32.mrb[116].mxu1  ;;  %v2835_v26 = vadd.f32 %v2834_v13, %v2744_v23  ;;  %v5809_v40 = vpop.f32.mrb[111].mxu0  ;;  %v6638_v13 = vpack.c.bf16 %v3192_v12, %v3191_v10  ;;  %v4704_v23 = vld [vmem:[%s8351_s16 + $0xb0] sm:$0xff] }
 0x6b8   : > { %v5859_v27 = vpop.f32.mrb[117].mxu1 }
 0x6b9   : > { %v3197_v27 = vld [vmem:[%s8351_s16 + $0x40] sm:$0xff] }
 0x6ba   : > { %v2749_v29 = vpop.f32.mrb[112].mxu0 }
 0x6bb   : > { %v2840_v31 = vadd.f32 %v2839_v24, %v2749_v29  ;;  %v5812_v32 = vpop.f32.mrb[113].mxu0  ;;  %v4705_v24 = vld [vmem:[%s8351_s16 + $0xb8] sm:$0xff]  ;;  %v3198_v29 = vld [vmem:[%s8351_s16 + $0x48] sm:$0xff] }
 0x6bc   : > { %v6620_v40 = vpack.c.bf16 %v4705_v24, %v4704_v23  ;;  %v4707_v32 = vld [vmem:[%s8351_s16 + $0xc8] sm:$0xff]  ;;  %v4721_v23 = vld [vmem:[%s8351_s16 + $0x138] sm:$0xff] }
 0x6ca   : > { %v2931_v33 = vpop.f32.mrb[114].mxu0 }
 0x6cb   : > { %v2955_v45 = vadd.f32 %v2931_v33, %v2820_v48  ;;  %v5894_v36 = vpop.f32.mrb[115].mxu0  ;;  %v6614_v48 = vpack.c.bf16 %v4701_v30, %v4700_v34  ;;  %v6647_v33 = vpack.c.bf16 %v3198_v29, %v3197_v27  ;;  %v4715_v34 = vld [vmem:[%s8351_s16 + $0x108] sm:$0xff] }
 0x6cc   : > { %v3199_v36 = vld [vmem:[%s8351_s16 + $0x50] sm:$0xff]  ;;  %v6659_v30 = vpack.c.bf16 %v4715_v34, %v4714_v28  ;;  %v4723_v27 = vld [vmem:[%s8351_s16 + $0x148] sm:$0xff] }
 0x6cd   : > { %v2967_v39 = vadd.f32 %v4689_v37, %v2955_v45  ;;  %6615 = vmatpush3.bf16.msra.mxu1 %v6614_v48  ;;  %v4717_v48 = vld [vmem:[%s8351_s16 + $0x118] sm:$0xff] }
 0x6ce   : > { %v2936_v38 = vpop.f32.mrb[116].mxu0  ;;  %6616 = vmatprep.subr.bf16.mxu1 %v7037_v3 }
 0x6cf   : > { %v2956_v50 = vadd.f32 %v2936_v38, %v2825_v7  ;;  %v5897_v41 = vpop.f32.mrb[117].mxu0  ;;  %v2972_v44 = vmax.f32 %v2967_v39, 0.0  ;;  %v4703_v7 = vld [vmem:[%s8351_s16 + $0xa8] sm:$0xff]  ;;  %v3201_v39 = vld [vmem:[%s8351_s16 + $0x60] sm:$0xff] }
 0x6d0   : > { %v6617_v19 = vpack.c.bf16 %v4703_v7, %v4702_v17  ;;  %v4718_v17 = vld [vmem:[%s8351_s16 + $0x120] sm:$0xff]  ;;  %v4719_v7 = vld [vmem:[%s8351_s16 + $0x128] sm:$0xff] }
 0x6d1   : > { %v2968_v42 = vadd.f32 %v4689_v37, %v2956_v50  ;;  %v3202_v50 = vld [vmem:[%s8351_s16 + $0x68] sm:$0xff] }
 0x6d2   : > { %v2941_v43 = vpop.f32.mrb[118].mxu0  ;;  %6618 = vmatpush3.bf16.msra.mxu1 %v6617_v19  ;;  %v6653_v41 = vpack.c.bf16 %v3202_v50, %v3201_v39  ;;  %v4729_v39 = vld [vmem:[%s8351_s16 + $0x178] sm:$0xff] }
 0x6d3   : > { %v2973_v46 = vmax.f32 %v2968_v42, 0.0  ;;  %v2957_v47 = vadd.f32 %v2941_v43, %v2830_v35  ;;  %v5900_v2 = vpop.f32.mrb[119].mxu0  ;;  %v3195_v35 = vld [vmem:[%s8351_s16 + $0x30] sm:$0xff]  ;;  %6619 = vmatprep.subr.bf16.mxu1 %v7037_v3  ;;  %v3204_v43 = vld [vmem:[%s8351_s16 + $0x78] sm:$0xff] }
 0x6d4   : > { %v3203_v42 = vld [vmem:[%s8351_s16 + $0x70] sm:$0xff] }
 0x6d5   : > { %v6599_v55 = vpack.c.bf16 %v2973_v46, %v2972_v44  ;;  %v2969_v60 = vadd.f32 %v4689_v37, %v2957_v47  ;;  %v6656_v44 = vpack.c.bf16 %v3204_v43, %v3203_v42  ;;  %v4708_v2 = vld [vmem:[%s8351_s16 + $0xd0] sm:$0xff] }
 0x6d6   : > { %v2946_v51 = vpop.f32.mrb[120].mxu0  ;;  %6621 = vmatpush3.bf16.msra.mxu1 %v6620_v40  ;;  %v4722_v40 = vld [vmem:[%s8351_s16 + $0x140] sm:$0xff] }
 0x6d7   : > { %v2958_v52 = vadd.f32 %v2946_v51, %v2835_v26  ;;  %v5903_v53 = vpop.f32.mrb[121].mxu0  ;;  %6600 = vmatpush3.bf16.msra.mxu0 %v6599_v55  ;;  %v2974_v49 = vmax.f32 %v2969_v60, 0.0  ;;  %v6644_v26 = vpack.c.bf16 %v3196_v21, %v3195_v35  ;;  %6622 = vmatprep.subr.bf16.mxu1 %v7037_v3  ;;  %v6665_v35 = vpack.c.bf16 %v4719_v7, %v4718_v17  ;;  %v4720_v21 = vld [vmem:[%s8351_s16 + $0x130] sm:$0xff] }
 0x6d8   : > { %6601 = vmatprep.subr.bf16.mxu0 %v7037_v3  ;;  %v4710_v53 = vld [vmem:[%s8351_s16 + $0xe0] sm:$0xff]  ;;  %v6671_v29 = vpack.c.bf16 %v4723_v27, %v4722_v40 }
 0x6d9   : > { %v2970_v54 = vadd.f32 %v4689_v37, %v2958_v52 }
 0x6da   : > { %v2951_v56 = vpop.f32.mrb[122].mxu0 }
 0x6db   : > { %v2975_v14 = vmax.f32 %v2970_v54, 0.0  ;;  %v2959_v57 = vadd.f32 %v2951_v56, %v2840_v31  ;;  %v5906_v61 = vpop.f32.mrb[123].mxu0  ;;  %v4706_v31 = vld [vmem:[%s8351_s16 + $0xc0] sm:$0xff]  ;;  %v4711_v54 = vld [vmem:[%s8351_s16 + $0xe8] sm:$0xff] }
 0x6dc   : > { %v6623_v45 = vpack.c.bf16 %v4707_v32, %v4706_v31  ;;  %v6629_v56 = vpack.c.bf16 %v4711_v54, %v4710_v53  ;;  %v4713_v61 = vld [vmem:[%s8351_s16 + $0xf8] sm:$0xff]  ;;  %v4724_v31 = vld [vmem:[%s8351_s16 + $0x150] sm:$0xff] }
 0x6dd   : > { %v6602_v20 = vpack.c.bf16 %v2975_v14, %v2974_v49  ;;  %v2971_v9 = vadd.f32 %v4689_v37, %v2959_v57  ;;  %v3200_v37 = vld [vmem:[%s8351_s16 + $0x58] sm:$0xff]  ;;  %v4712_v57 = vld [vmem:[%s8351_s16 + $0xf0] sm:$0xff] }
 0x6de   : > { %v6650_v38 = vpack.c.bf16 %v3200_v37, %v3199_v36  ;;  %6624 = vmatpush3.bf16.msra.mxu1 %v6623_v45  ;;  %v4725_v32 = vld [vmem:[%s8351_s16 + $0x158] sm:$0xff]  ;;  %v4726_v45 = vld [vmem:[%s8351_s16 + $0x160] sm:$0xff]  ;;  %v4727_v36 = vld [vmem:[%s8351_s16 + $0x168] sm:$0xff] }
 0x6df   : > { %6603 = vmatpush3.bf16.msra.mxu0 %v6602_v20  ;;  %v2976_v8 = vmax.f32 %v2971_v9, 0.0  ;;  %6625 = vmatprep.subr.bf16.mxu1 %v7037_v3  ;;  %v6677_v37 = vpack.c.bf16 %v4727_v36, %v4726_v45 }
 0x6e0   : > { %5915 = vmatprep.subr.mxu0 %v7039_v11 }
 0x6e3   : > { %5916 = vmatpush3.msk.msra.mxu0 %vm1556_vm2, %v2976_v8 }
 0x6e4   : > { %5918 = vmatmul.mubr.msk.f32.vlgmr.msra.gmra.mrb[124].mxu0 %vm2980_vm4, %v2977_v62  ;;  %6604 = vmatprep.subr.bf16.mxu0 %v7037_v3 }
 0x6e5   : > { %6606 = vmatpush3.bf16.msra.mxu0 %v6599_v55  ;;  %5920 = vmatprep.mubr.msk.f32.mxu0 %vm7038_vm0, %v7039_v11  ;;  %v4709_v55 = vld [vmem:[%s8351_s16 + $0xd8] sm:$0xff] }
 0x6e6   : > { %6607 = vmatprep.subr.bf16.mxu0 %v7037_v3  ;;  %v6626_v51 = vpack.c.bf16 %v4709_v55, %v4708_v2 }
 0x6e8   : > { %5921 = vmatmul.mubr.msk.f32.gmra.mrb[126].mxu0 %vm2980_vm4, %v2978_v63  ;;  %6627 = vmatpush3.bf16.msra.mxu1 %v6626_v51 }
 0x6e9   : > { %6609 = vmatpush3.bf16.msra.mxu0 %v6602_v20  ;;  %5923 = vmatprep.mubr.msk.f32.mxu0 %vm7038_vm0, %v7039_v11  ;;  %v6632_v20 = vpack.c.bf16 %v4713_v61, %v4712_v57 }
 0x6ea   : > { %5934 = vmatprep.subr.mxu0 %v7039_v11  ;;  %6628 = vmatprep.subr.bf16.mxu1 %v7037_v3 }
 0x6ec   : > { %5924 = vmatmul.mubr.msk.f32.gmra.mrb[128].mxu0 %vm2980_vm4, %v2979_v0  ;;  %6630 = vmatpush3.bf16.msra.mxu1 %v6629_v56 }
 0x6ed   : > { %5935 = vmatpush3.msk.msra.mxu0 %vm1556_vm2, %v2976_v8  ;;  %5936 = vmatprep.mubr.msk.f32.mxu0 %vm7038_vm0, %v7039_v11 }
 0x6ee   : > { %6634 = vmatprep.subr.bf16.mxu0 %v7037_v3  ;;  %6631 = vmatprep.subr.bf16.mxu1 %v7037_v3 }
 0x6f0   : > { %5937 = vmatmul.mubr.msk.f32.vlgmr.msra.gmra.mrb[130].mxu0 %vm2980_vm4, %v3073_v4  ;;  %6633 = vmatpush3.bf16.msra.mxu1 %v6632_v20 }
 0x6f1   : > { %5939 = vmatprep.mubr.msk.f32.mxu0 %vm7038_vm0, %v7039_v11  ;;  %6636 = vmatpush3.bf16.msra.mxu0 %v6635_v6 }
 0x6f2   : > { %6637 = vmatprep.subr.bf16.mxu0 %v7037_v3  ;;  %6658 = vmatprep.subr.bf16.mxu1 %v7037_v3 }
 0x6f4   : > { %5940 = vmatmul.mubr.msk.f32.gmra.mrb[132].mxu0 %vm2980_vm4, %v3074_v1 }
 0x6f5   : > { %5942 = vmatprep.mubr.msk.f32.mxu0 %vm7038_vm0, %v7039_v11  ;;  %6639 = vmatpush3.bf16.msra.mxu0 %v6638_v13  ;;  %v4716_v13 = vld [vmem:[%s8351_s16 + $0x110] sm:$0xff] }
 0x6f6   : > { %6640 = vmatprep.subr.bf16.mxu0 %v7037_v3  ;;  %v6662_v58 = vpack.c.bf16 %v4717_v48, %v4716_v13 }
 0x6f8   : > { %5943 = vmatmul.mubr.msk.f32.gmra.mrb[134].mxu0 %vm2980_vm4, %v3075_v5 }
 0x6f9   : > { %6018 = vmatprep.mubr.msk.f32.mxu0 %vm7038_vm0, %v7039_v11  ;;  %6642 = vmatpush3.bf16.msra.mxu0 %v6641_v18 }
 0x6fa   : > { %6643 = vmatprep.subr.bf16.mxu0 %v7037_v3 }
 0x6fd   : > { %6645 = vmatpush3.bf16.msra.mxu0 %v6644_v26  ;;  %v6668_v26 = vpack.c.bf16 %v4721_v23, %v4720_v21 }
 0x6fe   : > { %6646 = vmatprep.subr.bf16.mxu0 %v7037_v3 }
 0x701   : > { %6648 = vmatpush3.bf16.msra.mxu0 %v6647_v33  ;;  %v6674_v33 = vpack.c.bf16 %v4725_v32, %v4724_v31 }
 0x702   : > { %6649 = vmatprep.subr.bf16.mxu0 %v7037_v3 }
 0x705   : > { %6651 = vmatpush3.bf16.msra.mxu0 %v6650_v38  ;;  %v4728_v38 = vld [vmem:[%s8351_s16 + $0x170] sm:$0xff] }
 0x706   : > { %6652 = vmatprep.subr.bf16.mxu0 %v7037_v3  ;;  %v6680_v50 = vpack.c.bf16 %v4729_v39, %v4728_v38 }
 0x709   : > { %6654 = vmatpush3.bf16.msra.mxu0 %v6653_v41 }
 0x70a   : > { %6655 = vmatprep.subr.bf16.mxu0 %v7037_v3 }
 0x70d   : > { %6657 = vmatpush3.bf16.msra.mxu0 %v6656_v44  ;;  %v3521_v44 = vld [vmem:[%s8352_s22] sm:$0xff] }
 0x7b7   : > { %v3059_v46 = vpop.f32.mrb[124].mxu0 }
 0x7b8   : > { %v5919_v47 = vpop.f32.mrb[125].mxu0 }
 0x7bb   : > { %v3064_v60 = vpop.f32.mrb[126].mxu0 }
 0x7bc   : > { %v5922_v52 = vpop.f32.mrb[127].mxu0 }
 0x7bf   : > { %v3069_v49 = vpop.f32.mrb[128].mxu0 }
 0x7c0   : > { %v5925_v14 = vpop.f32.mrb[129].mxu0 }
 0x7c3   : > { %v3151_v9 = vpop.f32.mrb[130].mxu0 }
 0x7c4   : > { %v3165_v8 = vmax.f32 %v3059_v46, %v3151_v9  ;;  %v5938_v62 = vpop.f32.mrb[131].mxu0 }
 0x7c5   : > { %v4730_v62 = vld [vmem:[%s8354_s2] ss:$0 sm:$0xff]  ;;  %s8357_s2 = sld [smem:[#allocation24_spill]] }
 0x7c6   : > { %3171 = vrot.lane.b32.xlu0 %v3165_v8, %s8313_s23 }
 0x7c7   : > { %v3156_v63 = vpop.f32.mrb[132].mxu0 }
 0x7c8   : > { %v3166_v0 = vmax.f32 %v3064_v60, %v3156_v63  ;;  %v5941_v4 = vpop.f32.mrb[133].mxu0 }
 0x7ca   : > { %3173 = vrot.lane.b32.xlu1 %v3166_v0, %s8313_s23 }
 0x7cb   : > { %v3161_v1 = vpop.f32.mrb[134].mxu0  ;;  %v4739_v23 = vld [vmem:[%s8357_s2 + $0x80] sm:$0xff]  ;;  %v4742_v27 = vld [vmem:[%s8357_s2 + $0x98] sm:$0xff]  ;;  %v4744_v32 = vld [vmem:[%s8357_s2 + $0xa8] sm:$0xff] }
 0x7cc   : > { %v3167_v5 = vmax.f32 %v3069_v49, %v3161_v1  ;;  %v5944_v59 = vpop.f32.mrb[135].mxu0  ;;  %v4743_v31 = vld [vmem:[%s8357_s2 + $0xa0] sm:$0xff]  ;;  %v4745_v45 = vld [vmem:[%s8357_s2 + $0xb0] sm:$0xff]  ;;  %v4746_v36 = vld [vmem:[%s8357_s2 + $0xb8] sm:$0xff] }
 0x7cd   : > { %v4747_v38 = vld [vmem:[%s8357_s2 + $0xc0] sm:$0xff]  ;;  %v4748_v39 = vld [vmem:[%s8357_s2 + $0xc8] sm:$0xff] }
 0x7ce   : > { %3175 = vrot.lane.b32.xlu0 %v3167_v5, %s8313_s23  ;;  %s8353_s23 = sld [smem:[#allocation23_spill]] }
 0x7d4   : > { %v3608_v46 = vld [vmem:[%s8353_s23] sm:$0xff]  ;;  %v3609_v21 = vld [vmem:[%s8353_s23 + $0x8] sm:$0xf] }
 0x838   : > { %v3172_v16 = vpop.permute.xlu0 %3171 }
 0x839   : > { %v3180_v25 = vmax.f32 %v3165_v8, %v3172_v16 }
 0x83b   : > { %3183 = vst [vmem:[#allocation4] sm:$0xff] %v3180_v25  ;;  %6019 = vmatmul.mubr.f32.vlgmr.msra.gmra.mrb[136].mxu0 %v3180_v25  ;;  %v4731_v25 = vld [vmem:[%s8355_s3] ss:$0 sm:$0xff]  ;;  %s8359_s3 = sld [smem:[#allocation25_spill]] }
 0x83c   : > { %v3174_v6 = vpop.permute.xlu1 %3173  ;;  %6021 = vmatprep.mubr.msk.f32.mxu0 %vm7038_vm0, %v7039_v11 }
 0x83d   : > { %v3181_v22 = vmax.f32 %v3166_v0, %v3174_v6 }
 0x83f   : > { %3184 = vst [vmem:[#allocation4 + $0x8] sm:$0xff] %v3181_v22  ;;  %6022 = vmatmul.mubr.f32.gmra.mrb[138].mxu0 %v3181_v22 }
 0x840   : > { %v3176_v10 = vpop.permute.xlu0 %3175  ;;  %6024 = vmatprep.mubr.msk.f32.mxu0 %vm7038_vm0, %v7039_v11 }
 0x841   : > { %v3182_v12 = vmax.f32 %v3167_v5, %v3176_v10 }
 0x843   : > { %3185 = vst [vmem:[#allocation4 + $0x10] sm:$0xf] %v3182_v12 }
 0x846   : > { %v3205_v15 = vld [vmem:[#allocation4 + $0x1] sm:$0xff] }
 0x847   : > { %5978 = vmatmul.mubr.f32.vlgmr.msra.gmra.mrb[118].mxu1 %v3205_v15  ;;  %v3385_v41 = vld [vmem:[#allocation4 + $0x2] sm:$0xff] }
 0x848   : > { %6660 = vmatpush3.bf16.msra.mxu1 %v6659_v30  ;;  %5980 = vmatprep.mubr.msk.f32.mxu1 %vm7038_vm0, %v7039_v11  ;;  %v4732_v30 = vld [vmem:[%s8356_s5] ss:$0 sm:$0xff]  ;;  %s8358_s5 = smov 127  }
 0x849   : > { %6661 = vmatprep.subr.bf16.mxu1 %v7037_v3 }
 0x84a   : > { %v3206_v18 = vld [vmem:[#allocation4 + $0x9] sm:$0xff]  ;;  %v3207_v24 = vld [vmem:[#allocation4 + $0x11] sm:$0x3] }
 0x84b   : > { %v3188_v19 = vld [vmem:[#allocation4 + $0x10] sm:$0x3]  ;;  %5981 = vmatmul.mubr.f32.gmra.mrb[120].mxu1 %v3206_v18  ;;  %v3387_v43 = vld [vmem:[#allocation4 + $0x12] sm:$0x3] }
 0x84c   : > { %6025 = vmatmul.mubr.f32.gmra.mrb[140].mxu0 %v3188_v19  ;;  %6663 = vmatpush3.bf16.msra.mxu1 %v6662_v58  ;;  %v3386_v42 = vld [vmem:[#allocation4 + $0xa] sm:$0xff] }
 0x84d   : > { %5983 = vmatprep.mubr.msk.f32.mxu1 %vm7038_vm0, %v7039_v11  ;;  %6664 = vmatprep.subr.bf16.mxu1 %v7037_v3 }
 0x84e   : > { %6083 = vmatprep.mubr.msk.f32.mxu0 %vm3523_vm5, %v3608_v46  ;;  %v4752_v46 = vld [vmem:[%s8357_s2 + $0xe8] sm:$0xff] }
 0x84f   : > { %5984 = vmatmul.mubr.f32.gmra.mrb[122].mxu1 %v3207_v24  ;;  %v4740_v24 = vld [vmem:[%s8357_s2 + $0x88] sm:$0xff] }
 0x850   : > { %6666 = vmatpush3.bf16.msra.mxu1 %v6665_v35  ;;  %6059 = vmatprep.mubr.msk.f32.mxu1 %vm7038_vm0, %v7039_v11  ;;  %v3522_v35 = vld [vmem:[%s8352_s22 + $0x8] sm:$0xf]  ;;  %v6690_v40 = vpack.c.bf16 %v4740_v24, %v4739_v23  ;;  %v4757_v24 = vld [vmem:[%s8357_s2 + $0x110] sm:$0xff] }
 0x851   : > { %6667 = vmatprep.subr.bf16.mxu1 %v7037_v3 }
 0x854   : > { %6669 = vmatpush3.bf16.msra.mxu1 %v6668_v26  ;;  %v4741_v26 = vld [vmem:[%s8357_s2 + $0x90] sm:$0xff] }
 0x855   : > { %6670 = vmatprep.subr.bf16.mxu1 %v7037_v3 }
 0x858   : > { %6672 = vmatpush3.bf16.msra.mxu1 %v6671_v29  ;;  %v6694_v29 = vpack.c.bf16 %v4742_v27, %v4741_v26  ;;  %v4758_v26 = vld [vmem:[%s8357_s2 + $0x118] sm:$0xff] }
 0x859   : > { %6673 = vmatprep.subr.bf16.mxu1 %v7037_v3 }
 0x85c   : > { %6675 = vmatpush3.bf16.msra.mxu1 %v6674_v33  ;;  %v6698_v33 = vpack.c.bf16 %v4744_v32, %v4743_v31  ;;  %v4760_v31 = vld [vmem:[%s8357_s2 + $0x128] sm:$0xff] }
 0x85d   : > { %6676 = vmatprep.subr.bf16.mxu1 %v7037_v3 }
 0x860   : > { %6678 = vmatpush3.bf16.msra.mxu1 %v6677_v37  ;;  %v6702_v37 = vpack.c.bf16 %v4746_v36, %v4745_v45  ;;  %v4761_v45 = vld [vmem:[%s8357_s2 + $0x130] sm:$0xff]  ;;  %v4762_v36 = vld [vmem:[%s8357_s2 + $0x138] sm:$0xff] }
 0x861   : > { %6679 = vmatprep.subr.bf16.mxu1 %v7037_v3 }
 0x864   : > { %6681 = vmatpush3.bf16.msra.mxu1 %v6680_v50  ;;  %v6706_v50 = vpack.c.bf16 %v4748_v39, %v4747_v38  ;;  %v4763_v38 = vld [vmem:[%s8357_s2 + $0x140] sm:$0xff]  ;;  %v4764_v39 = vld [vmem:[%s8357_s2 + $0x148] sm:$0xff] }
 0x867   : > { %6060 = vmatmul.mubr.f32.vlgmr.msra.gmra.mrb[124].mxu1 %v3385_v41  ;;  %v4749_v41 = vld [vmem:[%s8357_s2 + $0xd0] sm:$0xff] }
 0x868   : > { %6062 = vmatprep.mubr.msk.f32.mxu1 %vm7038_vm0, %v7039_v11 }
 0x86b   : > { %6063 = vmatmul.mubr.f32.gmra.mrb[126].mxu1 %v3386_v42  ;;  %v4750_v42 = vld [vmem:[%s8357_s2 + $0xd8] sm:$0xff] }
 0x86c   : > { %6065 = vmatprep.mubr.msk.f32.mxu1 %vm7038_vm0, %v7039_v11 }
 0x86f   : > { %6066 = vmatmul.mubr.f32.gmra.mrb[128].mxu1 %v3387_v43  ;;  %v6710_v43 = vpack.c.bf16 %v4750_v42, %v4749_v41  ;;  %v4765_v41 = vld [vmem:[%s8357_s2 + $0x150] sm:$0xff]  ;;  %v4766_v42 = vld [vmem:[%s8357_s2 + $0x158] sm:$0xff] }
 0x870   : > { %6074 = vmatprep.mubr.msk.f32.mxu1 %vm3523_vm5, %v3521_v44  ;;  %v4751_v44 = vld [vmem:[%s8357_s2 + $0xe0] sm:$0xff] }
 0x90e   : > { %v3371_v47 = vpop.f32.mrb[136].mxu0 }
 0x90f   : > { %v6020_v2 = vpop.f32.mrb[137].mxu0 }
 0x910   : > { %v4753_v2 = vld [vmem:[%s8357_s2 + $0xf0] sm:$0xff] }
 0x912   : > { %v3376_v55 = vpop.f32.mrb[138].mxu0 }
 0x913   : > { %v6023_v51 = vpop.f32.mrb[139].mxu0 }
 0x91a   : > { %v3291_v60 = vpop.f32.mrb[118].mxu1 }
 0x91b   : > { %v3372_v52 = vadd.f32 %v3371_v47, %v3291_v60  ;;  %v5979_v53 = vpop.f32.mrb[119].mxu1  ;;  %v6714_v47 = vpack.c.bf16 %v4752_v46, %v4751_v44  ;;  %v3707_v60 = vld [vmem:[%s8357_s2] sm:$0xff]  ;;  %v4768_v46 = vld [vmem:[%s8357_s2 + $0x168] sm:$0xff] }
 0x91c   : > { %v4767_v44 = vld [vmem:[%s8357_s2 + $0x160] sm:$0xff] }
 0x91e   : > { %v3296_v54 = vpop.f32.mrb[120].mxu1 }
 0x91f   : > { %v3381_v56 = vpop.f32.mrb[140].mxu0  ;;  %v3377_v49 = vadd.f32 %v3376_v55, %v3296_v54  ;;  %v5982_v14 = vpop.f32.mrb[121].mxu1  ;;  %v4754_v55 = vld [vmem:[%s8357_s2 + $0xf8] sm:$0xff] }
 0x920   : > { %v6026_v57 = vpop.f32.mrb[141].mxu0  ;;  %v6718_v51 = vpack.c.bf16 %v4754_v55, %v4753_v2  ;;  %v4769_v2 = vld [vmem:[%s8357_s2 + $0x170] sm:$0xff]  ;;  %v4770_v55 = vld [vmem:[%s8357_s2 + $0x178] sm:$0xff] }
 0x922   : > { %v3301_v61 = vpop.f32.mrb[122].mxu1 }
 0x923   : > { %v3382_v20 = vadd.f32 %v3381_v56, %v3301_v61  ;;  %v5985_v9 = vpop.f32.mrb[123].mxu1 }
 0x93a   : > { %v3471_v8 = vpop.f32.mrb[124].mxu1 }
 0x93b   : > { %v3485_v63 = vadd.f32 %v3471_v8, %v3372_v52  ;;  %v6061_v0 = vpop.f32.mrb[125].mxu1  ;;  %v3708_v52 = vld [vmem:[%s8357_s2 + $0x8] sm:$0xff] }
 0x93c   : > { %v6722_v53 = vpack.c.bf16 %v3708_v52, %v3707_v60  ;;  %v3710_v0 = vld [vmem:[%s8357_s2 + $0x18] sm:$0xff]  ;;  %v4771_v52 = vld [vmem:[%s8359_s3] ss:$0 sm:$0xff] }
 0x93d   : > { %v3495_v4 = vadd.f32 %v4730_v62, %v3485_v63  ;;  %v3709_v63 = vld [vmem:[%s8357_s2 + $0x10] sm:$0xff] }
 0x93e   : > { %v3476_v1 = vpop.f32.mrb[126].mxu1 }
 0x93f   : > { %v3498_v5 = vmax.f32 %v3495_v4, 0.0  ;;  %v3486_v59 = vadd.f32 %v3476_v1, %v3377_v49  ;;  %v6064_v16 = vpop.f32.mrb[127].mxu1  ;;  %v6726_v1 = vpack.c.bf16 %v3710_v0, %v3709_v63  ;;  %v4778_v63 = vld [vmem:[%s8362_s9 + $0x90] sm:$0xff] }
 0x940   : > { %v3712_v16 = vld [vmem:[%s8357_s2 + $0x28] sm:$0xff] }
 0x941   : > { %v3496_v6 = vadd.f32 %v4730_v62, %v3486_v59  ;;  %v3508_v10 = vmul.f32 %v4731_v25, %v3498_v5  ;;  %v3711_v59 = vld [vmem:[%s8357_s2 + $0x20] sm:$0xff] }
 0x942   : > { %v3481_v22 = vpop.f32.mrb[128].mxu1 }
 0x943   : > { %v3499_v12 = vmax.f32 %v3496_v6, 0.0  ;;  %v3487_v28 = vadd.f32 %v3481_v22, %v3382_v20  ;;  %v6067_v34 = vpop.f32.mrb[129].mxu1  ;;  %v3518_v15 = vadd.f32 %v4732_v30, %v3508_v10  ;;  %v3713_v6 = vld [vmem:[%s8357_s2 + $0x30] sm:$0xff]  ;;  %v3714_v22 = vld [vmem:[%s8357_s2 + $0x38] sm:$0xff] }
 0x944   : > { %v6734_v10 = vpack.c.bf16 %v3714_v22, %v3713_v6  ;;  %v4783_v6 = vld [vmem:[%s8362_s9 + $0xb8] sm:$0xff] }
 0x945   : > { %v3509_v13 = vmul.f32 %v4731_v25, %v3499_v12  ;;  %v3497_v48 = vadd.f32 %v4730_v62, %v3487_v28  ;;  %v3715_v12 = vld [vmem:[%s8357_s2 + $0x40] sm:$0xff]  ;;  %v3716_v28 = vld [vmem:[%s8357_s2 + $0x48] sm:$0xff] }
 0x946   : > { %v6738_v34 = vpack.c.bf16 %v3716_v28, %v3715_v12  ;;  %v4785_v12 = vld [vmem:[%s8362_s9 + $0xc8] sm:$0xff] }
 0x947   : > { %v3519_v58 = vadd.f32 %v4732_v30, %v3509_v13  ;;  %v3500_v17 = vmax.f32 %v3497_v48, 0.0  ;;  %v3718_v13 = vld [vmem:[%s8357_s2 + $0x58] sm:$0xff] }
 0x949   : > { %v3510_v7 = vmul.f32 %v4731_v25, %v3500_v17  ;;  %v6682_v18 = vpack.c.bf16 %v3519_v58, %v3518_v15  ;;  %v6730_v25 = vpack.c.bf16 %v3712_v16, %v3711_v59  ;;  %v3719_v15 = vld [vmem:[%s8357_s2 + $0x60] sm:$0xff]  ;;  %v3720_v58 = vld [vmem:[%s8357_s2 + $0x68] sm:$0xff] }
 0x94a   : > { %v6746_v17 = vpack.c.bf16 %v3720_v58, %v3719_v15  ;;  %v4781_v59 = vld [vmem:[%s8362_s9 + $0xa8] sm:$0xff] }
 0x94b   : > { %v3520_v19 = vadd.f32 %v4732_v30, %v3510_v7  ;;  %6683 = vmatprep.subr.bf16.mxu1 %v6682_v18  ;;  %6687 = vmatprep.subr.bf16.mxu0 %v6682_v18  ;;  %v3717_v30 = vld [vmem:[%s8357_s2 + $0x50] sm:$0xff]  ;;  %v4789_v15 = vld [vmem:[%s8362_s9 + $0xe8] sm:$0xff] }
 0x94c   : > { %6685 = vmatpush3.bf16.msra.mxu1 %v6682_v18  ;;  %6689 = vmatpush3.bf16.msra.mxu0 %v6682_v18  ;;  %v6742_v48 = vpack.c.bf16 %v3718_v13, %v3717_v30  ;;  %v3721_v7 = vld [vmem:[%s8357_s2 + $0x70] sm:$0xff]  ;;  %v3722_v18 = vld [vmem:[%s8357_s2 + $0x78] sm:$0xff] }
 0x94d   : > { %6072 = vmatprep.subr.msk.mxu1 %vm1556_vm2, %v3520_v19  ;;  %6081 = vmatprep.subr.msk.mxu0 %vm1556_vm2, %v3520_v19  ;;  %v4787_v30 = vld [vmem:[%s8362_s9 + $0xd8] sm:$0xff] }
 0x950   : > { %6073 = vmatpush3.msk.msra.mxu1 %vm1556_vm2, %v3520_v19  ;;  %6082 = vmatpush3.msk.msra.mxu0 %vm1556_vm2, %v3520_v19  ;;  %v6750_v19 = vpack.c.bf16 %v3722_v18, %v3721_v7  ;;  %v4791_v7 = vld [vmem:[%s8362_s9 + $0xf8] sm:$0xff] }
 0x951   : > { %6075 = vmatmul.mubr.msk.f32.vlgmr.msra.gmra.mrb[130].mxu1 %vm3523_vm5, %v3522_v35  ;;  %6084 = vmatmul.mubr.msk.f32.vlgmr.msra.gmra.mrb[142].mxu0 %vm3523_vm5, %v3609_v21  ;;  %v4755_v35 = vld [vmem:[%s8357_s2 + $0x100] sm:$0xff]  ;;  %v4756_v21 = vld [vmem:[%s8357_s2 + $0x108] sm:$0xff] }
 0x952   : > { %6786 = vmatprep.subr.bf16.mxu1 %v7037_v3  ;;  %6195 = vmatprep.mubr.msk.f32.mxu1 %vm7038_vm0, %v7039_v11  ;;  %v6754_v23 = vpack.c.bf16 %v4756_v21, %v4755_v35 }
 0x953   : > { %6691 = vmatprep.subr.bf16.mxu0 %v6690_v40 }
 0x954   : > { %6693 = vmatpush3.bf16.msra.mxu0 %v6690_v40  ;;  %v6758_v40 = vpack.c.bf16 %v4758_v26, %v4757_v24 }
 0x955   : > { %6695 = vmatprep.subr.bf16.mxu0 %v6694_v29 }
 0x958   : > { %6697 = vmatpush3.bf16.msra.mxu0 %v6694_v29  ;;  %v4759_v29 = vld [vmem:[%s8357_s2 + $0x120] sm:$0xff] }
 0x959   : > { %6699 = vmatprep.subr.bf16.mxu0 %v6698_v33 }
 0x95c   : > { %6701 = vmatpush3.bf16.msra.mxu0 %v6698_v33  ;;  %v6762_v33 = vpack.c.bf16 %v4760_v31, %v4759_v29  ;;  %v4160_v29 = vld [vmem:[%s8362_s9 + $0x8] sm:$0xff] }
 0x95d   : > { %6703 = vmatprep.subr.bf16.mxu0 %v6702_v37 }
 0x960   : > { %6705 = vmatpush3.bf16.msra.mxu0 %v6702_v37  ;;  %v6766_v37 = vpack.c.bf16 %v4762_v36, %v4761_v45 }
 0x961   : > { %6707 = vmatprep.subr.bf16.mxu0 %v6706_v50 }
 0x964   : > { %6709 = vmatpush3.bf16.msra.mxu0 %v6706_v50  ;;  %v6770_v50 = vpack.c.bf16 %v4764_v39, %v4763_v38  ;;  %v4164_v38 = vld [vmem:[%s8362_s9 + $0x28] sm:$0xff] }
 0x965   : > { %6711 = vmatprep.subr.bf16.mxu0 %v6710_v43 }
 0x968   : > { %6713 = vmatpush3.bf16.msra.mxu0 %v6710_v43  ;;  %v6774_v43 = vpack.c.bf16 %v4766_v42, %v4765_v41  ;;  %v4166_v41 = vld [vmem:[%s8362_s9 + $0x38] sm:$0xff] }
 0x969   : > { %6715 = vmatprep.subr.bf16.mxu0 %v6714_v47 }
 0x96c   : > { %6717 = vmatpush3.bf16.msra.mxu0 %v6714_v47  ;;  %v6778_v47 = vpack.c.bf16 %v4768_v46, %v4767_v44  ;;  %v4168_v44 = vld [vmem:[%s8362_s9 + $0x48] sm:$0xff] }
 0x96d   : > { %6719 = vmatprep.subr.bf16.mxu0 %v6718_v51 }
 0x970   : > { %6721 = vmatpush3.bf16.msra.mxu0 %v6718_v51  ;;  %v6782_v51 = vpack.c.bf16 %v4770_v55, %v4769_v2  ;;  %v4170_v2 = vld [vmem:[%s8362_s9 + $0x58] sm:$0xff] }
 0x971   : > { %6723 = vmatprep.subr.bf16.mxu0 %v6722_v53 }
 0xa24   : > { %v6076_v54 = vpop.f32.mrb[130].mxu1  ;;  %v6085_v56 = vpop.f32.mrb[142].mxu0 }
 0xa25   : > { %v3692_v49 = vmax.f32 %v6076_v54, %v6085_v56  ;;  %v3599_v14 = vpop.f32.mrb[131].mxu1  ;;  %v3682_v57 = vpop.f32.mrb[143].mxu0 }
 0xa26   : > { %v3691_v61 = vmax.f32 %v3599_v14, %v3682_v57 }
 0xa27   : > { %3697 = vrot.lane.b32.xlu0 %v3692_v49, %s8358_s5 }
 0xa28   : > { %3695 = vrot.lane.b32.xlu1 %v3691_v61, %s8358_s5 }
 0xa99   : > { %v3698_v20 = vpop.permute.xlu0 %3697 }
 0xa9a   : > { %v3702_v9 = vmax.f32 %v3692_v49, %v3698_v20  ;;  %v3696_v8 = vpop.permute.xlu1 %3695  ;;  %v3999_v20 = vld [vmem:[%s8360_s6] sm:$0xff] }
 0xa9b   : > { %v3701_v62 = vmax.f32 %v3691_v61, %v3696_v8  ;;  %v4776_v8 = vld [vmem:[%s8362_s9 + $0x80] sm:$0xff] }
 0xa9c   : > { %3704 = vst [vmem:[#allocation5 + $0x8] sm:$0xf] %v3702_v9  ;;  %v4077_v9 = vld [vmem:[%s8361_s8] sm:$0xff]  ;;  %s893_s8 = sand.u32 1, %s6998_s10  }
 0xa9d   : > { %3703 = vst [vmem:[#allocation5] sm:$0xff] %v3701_v62  ;;  %s4555_s6 = sshll.u32 %s893_s8, 2 }
 0xa9e   : > { %s895_s3 = scalar_lea.vmem [#allocation7], %s4555_s6 }
 0xa9f   : > { %s4463_s2 = sshll.u32 %s895_s3, 4  ;;  %s8270_s2 = int_to_ptr.vmem [resolvable:$true] %s4463_s2 }
 0xaa0   : > { %s6944_s13 = scalar_lea.vmem %s8270_s2, 64 }
 0xaa1   : > { %p6945_p11 = scmp.ne.s32.totalorder %s8270_s2, %s6944_s13 }
 0xaa3   : > { %v3724_v5 = vld [vmem:[#allocation5 + $0x9] sm:$0x3]  ;;  %p6946_p12 = pnand %p6945_p11, %p7236_p5 }
 0xaa4   : > { %v3723_v4 = vld [vmem:[#allocation5 + $0x1] sm:$0xff]  ;;  %v3893_v60 = vld [vmem:[#allocation5 + $0xa] sm:$0x3] }
 0xaa5   : > { %6118 = vmatprep.mubr.f32.mxu0 %v3723_v4  ;;  %v3706_v27 = vld [vmem:[#allocation5 + $0x8] sm:$0x3]  ;;  %v4779_v4 = vld [vmem:[%s8362_s9 + $0x98] sm:$0xff]  ;;  %p6947_p13 = pneg %p6946_p12 }
 0xaa6   : > { %6119 = vmatmul.mubr.f32.vlgmr.msra.gmra.mrb[144].mxu0 %v3724_v5  ;;  %v3892_v32 = vld [vmem:[#allocation5 + $0x2] sm:$0xff]  ;;  %v4780_v5 = vld [vmem:[%s8362_s9 + $0xa0] sm:$0xff] }
 0xaa7   : > { %6725 = vmatpush3.bf16.msra.mxu0 %v6722_v53  ;;  %6153 = vmatprep.mubr.f32.mxu0 %v3701_v62  ;;  %v4777_v62 = vld [vmem:[%s8362_s9 + $0x88] sm:$0xff]  ;;  %v6801_v16 = vpack.c.bf16 %v4781_v59, %v4780_v5 }
 0xaa8   : > { %6727 = vmatprep.subr.bf16.mxu0 %v6726_v1  ;;  %v6795_v0 = vpack.c.bf16 %v4777_v62, %v4776_v8  ;;  %v4796_v62 = vld [vmem:[%s8362_s9 + $0x120] sm:$0xff]  ;;  %v4801_v59 = vld [vmem:[%s8362_s9 + $0x148] sm:$0xff] }
 0xaab   : > { %6729 = vmatpush3.bf16.msra.mxu0 %v6726_v1  ;;  %v6798_v1 = vpack.c.bf16 %v4779_v4, %v4778_v63  ;;  %v4797_v63 = vld [vmem:[%s8362_s9 + $0x128] sm:$0xff]  ;;  %v4798_v4 = vld [vmem:[%s8362_s9 + $0x130] sm:$0xff] }
 0xaac   : > { %6731 = vmatprep.subr.bf16.mxu0 %v6730_v25 }
 0xaaf   : > { %6733 = vmatpush3.bf16.msra.mxu0 %v6730_v25  ;;  %v4782_v25 = vld [vmem:[%s8362_s9 + $0xb0] sm:$0xff] }
 0xab0   : > { %6735 = vmatprep.subr.bf16.mxu0 %v6734_v10  ;;  %v6804_v22 = vpack.c.bf16 %v4783_v6, %v4782_v25  ;;  %v4802_v25 = vld [vmem:[%s8362_s9 + $0x150] sm:$0xff]  ;;  %v4803_v6 = vld [vmem:[%s8362_s9 + $0x158] sm:$0xff] }
 0xab3   : > { %6737 = vmatpush3.bf16.msra.mxu0 %v6734_v10  ;;  %v4784_v10 = vld [vmem:[%s8362_s9 + $0xc0] sm:$0xff] }
 0xab4   : > { %6739 = vmatprep.subr.bf16.mxu0 %v6738_v34  ;;  %v6807_v28 = vpack.c.bf16 %v4785_v12, %v4784_v10  ;;  %v4804_v10 = vld [vmem:[%s8362_s9 + $0x160] sm:$0xff]  ;;  %v4805_v12 = vld [vmem:[%s8362_s9 + $0x168] sm:$0xff] }
 0xab7   : > { %6741 = vmatpush3.bf16.msra.mxu0 %v6738_v34  ;;  %v4786_v34 = vld [vmem:[%s8362_s9 + $0xd0] sm:$0xff] }
 0xab8   : > { %6743 = vmatprep.subr.bf16.mxu0 %v6742_v48  ;;  %v6810_v13 = vpack.c.bf16 %v4787_v30, %v4786_v34  ;;  %v4806_v34 = vld [vmem:[%s8362_s9 + $0x170] sm:$0xff]  ;;  %v4807_v30 = vld [vmem:[%s8362_s9 + $0x178] sm:$0xff] }
 0xabb   : > { %6745 = vmatpush3.bf16.msra.mxu0 %v6742_v48  ;;  %v4788_v48 = vld [vmem:[%s8362_s9 + $0xe0] sm:$0xff] }
 0xabc   : > { %6747 = vmatprep.subr.bf16.mxu0 %v6746_v17  ;;  %v6813_v58 = vpack.c.bf16 %v4789_v15, %v4788_v48 }
 0xabf   : > { %6749 = vmatpush3.bf16.msra.mxu0 %v6746_v17  ;;  %v4790_v17 = vld [vmem:[%s8362_s9 + $0xf0] sm:$0xff] }
 0xac0   : > { %6751 = vmatprep.subr.bf16.mxu0 %v6750_v19  ;;  %v6816_v18 = vpack.c.bf16 %v4791_v7, %v4790_v17 }
 0xac3   : > { %6753 = vmatpush3.bf16.msra.mxu0 %v6750_v19 }
 0xac4   : > { %6755 = vmatprep.subr.bf16.mxu0 %v6754_v23 }
 0xac6   : > { %6154 = vmatmul.mubr.f32.vlgmr.msra.gmra.mrb[144].mxu0 %v3706_v27  ;;  %v4159_v27 = vld [vmem:[%s8362_s9] sm:$0xff] }
 0xac7   : > { %6757 = vmatpush3.bf16.msra.mxu0 %v6754_v23  ;;  %6188 = vmatprep.mubr.f32.mxu0 %v3892_v32  ;;  %v6819_v31 = vpack.c.bf16 %v4160_v29, %v4159_v27  ;;  %v4161_v32 = vld [vmem:[%s8362_s9 + $0x10] sm:$0xff] }
 0xac8   : > { %6759 = vmatprep.subr.bf16.mxu0 %v6758_v40 }
 0xacb   : > { %6761 = vmatpush3.bf16.msra.mxu0 %v6758_v40 }
 0xacc   : > { %6763 = vmatprep.subr.bf16.mxu0 %v6762_v33 }
 0xacf   : > { %6765 = vmatpush3.bf16.msra.mxu0 %v6762_v33  ;;  %v4162_v33 = vld [vmem:[%s8362_s9 + $0x18] sm:$0xff] }
 0xad0   : > { %6767 = vmatprep.subr.bf16.mxu0 %v6766_v37  ;;  %v6822_v36 = vpack.c.bf16 %v4162_v33, %v4161_v32 }
 0xad3   : > { %6769 = vmatpush3.bf16.msra.mxu0 %v6766_v37  ;;  %v4163_v37 = vld [vmem:[%s8362_s9 + $0x20] sm:$0xff] }
 0xad4   : > { %6771 = vmatprep.subr.bf16.mxu0 %v6770_v50  ;;  %v6825_v39 = vpack.c.bf16 %v4164_v38, %v4163_v37 }
 0xad7   : > { %6773 = vmatpush3.bf16.msra.mxu0 %v6770_v50  ;;  %v4165_v50 = vld [vmem:[%s8362_s9 + $0x30] sm:$0xff] }
 0xad8   : > { %6775 = vmatprep.subr.bf16.mxu0 %v6774_v43  ;;  %v6828_v42 = vpack.c.bf16 %v4166_v41, %v4165_v50 }
 0xadb   : > { %6777 = vmatpush3.bf16.msra.mxu0 %v6774_v43  ;;  %v4167_v43 = vld [vmem:[%s8362_s9 + $0x40] sm:$0xff] }
 0xadc   : > { %6779 = vmatprep.subr.bf16.mxu0 %v6778_v47  ;;  %v6831_v46 = vpack.c.bf16 %v4168_v44, %v4167_v43 }
 0xadf   : > { %6781 = vmatpush3.bf16.msra.mxu0 %v6778_v47  ;;  %v4169_v47 = vld [vmem:[%s8362_s9 + $0x50] sm:$0xff] }
 0xae0   : > { %6783 = vmatprep.subr.bf16.mxu0 %v6782_v51  ;;  %v6834_v55 = vpack.c.bf16 %v4170_v2, %v4169_v47 }
 0xae3   : > { %6785 = vmatpush3.bf16.msra.mxu0 %v6782_v51  ;;  %v4171_v51 = vld [vmem:[%s8362_s9 + $0x60] sm:$0xff] }
 0xae6   : > { %6189 = vmatmul.mubr.f32.vlgmr.msra.gmra.mrb[144].mxu0 %v3893_v60  ;;  %v4172_v60 = vld [vmem:[%s8362_s9 + $0x68] sm:$0xff] }
 0xbb9   : > { %v6190_v53 = vpop.f32.mrb[144].mxu0 }
 0xbba   : > { %v3996_v54 = vadd.f32 %v6190_v53, %v4771_v52  ;;  %v3977_v56 = vpop.f32.mrb[145].mxu0  ;;  %v4173_v53 = vld [vmem:[%s8362_s9 + $0x70] sm:$0xff] }
 0xbbb   : > { %v3995_v49 = vadd.f32 %v4771_v52, %v3977_v56  ;;  %v6837_v52 = vpack.c.bf16 %v4172_v60, %v4171_v51 }
 0xbbc   : > { %v3998_v14 = vmax.f32 %v3996_v54, 0.0  ;;  %v4174_v54 = vld [vmem:[%s8362_s9 + $0x78] sm:$0xff] }
 0xbbd   : > { %v3997_v57 = vmax.f32 %v3995_v49, 0.0  ;;  %v6840_v56 = vpack.c.bf16 %v4174_v54, %v4173_v53  ;;  %v4792_v49 = vld [vmem:[%s8362_s9 + $0x100] sm:$0xff] }
 0xbbf   : > { %v6787_v61 = vpack.c.bf16 %v3998_v14, %v3997_v57  ;;  %v4793_v14 = vld [vmem:[%s8362_s9 + $0x108] sm:$0xff] }
 0xbc0   : > { %v6843_v57 = vpack.c.bf16 %v4793_v14, %v4792_v49 }
 0xbc1   : > { %6789 = vmatpush3.bf16.msk.msra.mxu1 %vm6788_vm7, %v6787_v61 }
 0xbc2   : > { %6790 = vmatprep.subr.bf16.mxu1 %v7037_v3 }
 0xbc4   : > { %6196 = vmatmul.mubr.msk.f32.vlgmr.msra.gmra.mrb[132].mxu1 %vm4000_vm8, %v3999_v20  ;;  %v4795_v20 = vld [vmem:[%s8362_s9 + $0x118] sm:$0xff] }
 0xbc5   : > { %6793 = vmatpush3.bf16.msk.msra.mxu1 %vm6788_vm7, %v6787_v61  ;;  %6202 = vmatprep.mubr.msk.f32.mxu1 %vm7038_vm0, %v7039_v11  ;;  %v4794_v61 = vld [vmem:[%s8362_s9 + $0x110] sm:$0xff] }
 0xbc6   : > { %6794 = vmatprep.subr.bf16.mxu1 %v7037_v3  ;;  %v6846_v8 = vpack.c.bf16 %v4795_v20, %v4794_v61 }
 0xbc8   : > { %6203 = vmatmul.mubr.msk.f32.vlgmr.msra.gmra.mrb[134].mxu1 %vm4000_vm8, %v4077_v9 }
 0xbc9   : > { %6237 = vmatprep.mubr.msk.f32.mxu1 %vm7038_vm0, %v7039_v11  ;;  %6796 = vmatpush3.bf16.msra.mxu1 %v6795_v0  ;;  %v6849_v0 = vpack.c.bf16 %v4797_v63, %v4796_v62 }
 0xbca   : > { %6797 = vmatprep.subr.bf16.mxu1 %v7037_v3 }
 0xbcd   : > { %6799 = vmatpush3.bf16.msra.mxu1 %v6798_v1  ;;  %v4799_v1 = vld [vmem:[%s8362_s9 + $0x138] sm:$0xff] }
 0xbce   : > { %6800 = vmatprep.subr.bf16.mxu1 %v7037_v3  ;;  %v6852_v5 = vpack.c.bf16 %v4799_v1, %v4798_v4 }
 0xbd1   : > { %6802 = vmatpush3.bf16.msra.mxu1 %v6801_v16 }
 0xbd2   : > { %6803 = vmatprep.subr.bf16.mxu1 %v7037_v3 }
 0xbd5   : > { %6805 = vmatpush3.bf16.msra.mxu1 %v6804_v22  ;;  %v6858_v22 = vpack.c.bf16 %v4803_v6, %v4802_v25 }
 0xbd6   : > { %6806 = vmatprep.subr.bf16.mxu1 %v7037_v3 }
 0xbd9   : > { %6808 = vmatpush3.bf16.msra.mxu1 %v6807_v28  ;;  %v6861_v28 = vpack.c.bf16 %v4805_v12, %v4804_v10 }
 0xbda   : > { %6809 = vmatprep.subr.bf16.mxu1 %v7037_v3 }
 0xbdd   : > { %6811 = vmatpush3.bf16.msra.mxu1 %v6810_v13  ;;  %v6864_v13 = vpack.c.bf16 %v4807_v30, %v4806_v34 }
 0xbde   : > { %6812 = vmatprep.subr.bf16.mxu1 %v7037_v3 }
 0xbe1   : > { %6814 = vmatpush3.bf16.msra.mxu1 %v6813_v58 }
 0xbe2   : > { %6815 = vmatprep.subr.bf16.mxu1 %v7037_v3 }
 0xbe5   : > { %6817 = vmatpush3.bf16.msra.mxu1 %v6816_v18 }
 0xbe6   : > { %6818 = vmatprep.subr.bf16.mxu1 %v7037_v3 }
 0xc97   : > { %v4073_v19 = vpop.f32.mrb[132].mxu1 }
 0xc98   : > { %v6197_v35 = vpop.f32.mrb[133].mxu1 }
 0xc99   : > { %v4808_v35 = vld [vmem:[%s8363_s12] ss:$0 sm:$0xff]  ;;  %s4450_s12 = scalar_lea.sflag [#allocation8], %s893_s8 }
 0xc9b   : > { %v4147_v21 = vpop.f32.mrb[134].mxu1 }
 0xc9c   : > { %v4151_v23 = vmax.f32 %v4073_v19, %v4147_v21  ;;  %v6204_v24 = vpop.f32.mrb[135].mxu1 }
 0xc9e   : > { %4153 = vrot.lane.b32.xlu1 %v4151_v23, %s8358_s5  ;;  %s4812_s5 = sshll.u32 %s7219_s0, 6  ;;  %s7042_s0 = smov [#allocation7]  }
 0xc9f   : > { %s6948_s6 = sshll.u32 %s7042_s0, 4  ;;  %s6949_s6 = int_to_ptr.vmem [resolvable:$false] %s6948_s6 }
 0xca0   : > { %s6950_s14 = scalar_lea.vmem %s6949_s6, 128  ;;  %p6951_p0 = scmp.lt.s32.totalorder %s8270_s2, %s6949_s6 }
 0xca1   : > { %p6952_p1 = scmp.lt.s32.totalorder %s6950_s14, %s6944_s13 }
 0xca3   : > { %p6953_p2 = por %p6952_p1, %p6951_p0 }
 0xca5   : > { %p6954_p3 = pnand %p6953_p2, %p6947_p13 }
 0xd10   : > { %v4154_v26 = vpop.permute.xlu1 %4153 }
 0xd11   : > { %v4156_v40 = vmax.f32 %v4151_v23, %v4154_v26 }
 0xd13   : > { %4157 = vst [vmem:[#allocation6] sm:$0xff] %v4156_v40  ;;  %v4810_v40 = vld [vmem:[%s7191_s27] ss:$0 sm:$0xff] }
 0xd1a   : > { %v4175_v45 = vld [vmem:[#allocation6 + $0x1] sm:$0x3f] }
 0xd1b   : > { %6238 = vmatmul.mubr.f32.vlgmr.msra.gmra.mrb[136].mxu1 %v4175_v45  ;;  %v4158_v9 = vld [vmem:[#allocation6] sm:$0x3f] }
 0xd1c   : > { %6820 = vmatpush3.bf16.msra.mxu1 %v6819_v31  ;;  %6272 = vmatprep.mubr.msk.f32.mxu1 %vm7038_vm0, %v7039_v11  ;;  %v4333_v48 = vld [vmem:[#allocation6 + $0x2] sm:$0x3f] }
 0xd1d   : > { %6821 = vmatprep.subr.bf16.mxu1 %v7037_v3 }
 0xd20   : > { %6823 = vmatpush3.bf16.msra.mxu1 %v6822_v36 }
 0xd21   : > { %6824 = vmatprep.subr.bf16.mxu1 %v7037_v3 }
 0xd24   : > { %6826 = vmatpush3.bf16.msra.mxu1 %v6825_v39 }
 0xd25   : > { %6827 = vmatprep.subr.bf16.mxu1 %v7037_v3 }
 0xd28   : > { %6829 = vmatpush3.bf16.msra.mxu1 %v6828_v42 }
 0xd29   : > { %6830 = vmatprep.subr.bf16.mxu1 %v7037_v3 }
 0xd2c   : > { %6832 = vmatpush3.bf16.msra.mxu1 %v6831_v46 }
 0xd2d   : > { %6833 = vmatprep.subr.bf16.mxu1 %v7037_v3 }
 0xd30   : > { %6835 = vmatpush3.bf16.msra.mxu1 %v6834_v55 }
 0xd31   : > { %6836 = vmatprep.subr.bf16.mxu1 %v7037_v3 }
 0xd34   : > { %6838 = vmatpush3.bf16.msra.mxu1 %v6837_v52 }
 0xd35   : > { %6839 = vmatprep.subr.bf16.mxu1 %v7037_v3 }
 0xd38   : > { %6841 = vmatpush3.bf16.msra.mxu1 %v6840_v56 }
 0xd39   : > { %6842 = vmatprep.subr.bf16.mxu1 %v7037_v3 }
 0xd3b   : > { %6273 = vmatmul.mubr.f32.vlgmr.msra.gmra.mrb[138].mxu1 %v4158_v9 }
 0xd3c   : > { %6844 = vmatpush3.bf16.msra.mxu1 %v6843_v57  ;;  %6307 = vmatprep.mubr.msk.f32.mxu1 %vm7038_vm0, %v7039_v11  ;;  %v4800_v11 = vld [vmem:[%s8362_s9 + $0x140] sm:$0xff]  ;;  %s8268_s9 = scalar_lea.hbm %s7196_s4, %s4812_s5 }
 0xd3d   : > { %6845 = vmatprep.subr.bf16.mxu1 %v7037_v3  ;;  %v6855_v16 = vpack.c.bf16 %v4801_v59, %v4800_v11 }
 0xd40   : > { %6847 = vmatpush3.bf16.msra.mxu1 %v6846_v8 }
 0xd41   : > { %6848 = vmatprep.subr.bf16.mxu1 %v7037_v3 }
 0xd44   : > { %6850 = vmatpush3.bf16.msra.mxu1 %v6849_v0 }
 0xd45   : > { %6851 = vmatprep.subr.bf16.mxu1 %v7037_v3 }
 0xd48   : > { %6853 = vmatpush3.bf16.msra.mxu1 %v6852_v5 }
 0xd49   : > { %6854 = vmatprep.subr.bf16.mxu1 %v7037_v3 }
 0xd4c   : > { %6856 = vmatpush3.bf16.msra.mxu1 %v6855_v16 }
 0xd4d   : > { %6857 = vmatprep.subr.bf16.mxu1 %v7037_v3 }
 0xd50   : > { %6859 = vmatpush3.bf16.msra.mxu1 %v6858_v22 }
 0xd51   : > { %6860 = vmatprep.subr.bf16.mxu1 %v7037_v3 }
 0xd54   : > { %6862 = vmatpush3.bf16.msra.mxu1 %v6861_v28 }
 0xd55   : > { %6863 = vmatprep.subr.bf16.mxu1 %v7037_v3  ;;  %v4809_v3 = vld [vmem:[%s7186_s20] ss:$0 sm:$0xff] }
 0xd58   : > { %6865 = vmatpush3.bf16.msra.mxu1 %v6864_v13 }
 0xd5b   : > { %6308 = vmatmul.mubr.f32.vlgmr.msra.gmra.mrb[140].mxu1 %v4333_v48 }
 0xdee   : > { %v4259_v15 = vpop.f32.mrb[136].mxu1 }
 0xdef   : > { %v6239_v58 = vpop.f32.mrb[137].mxu1 }
 0xe0e   : > { %v4329_v17 = vpop.f32.mrb[138].mxu1 }
 0xe0f   : > { %v4330_v7 = vadd.f32 %v4329_v17, %v4259_v15  ;;  %v6274_v18 = vpop.f32.mrb[139].mxu1 }
 0xe2e   : > { %v4417_v19 = vpop.f32.mrb[140].mxu1 }
 0xe2f   : > { %v4421_v21 = vadd.f32 %v4417_v19, %v4330_v7  ;;  %v6309_v23 = vpop.f32.mrb[141].mxu1 }
 0xe31   : > { %v4429_v24 = vadd.f32 %v4808_v35, %v4421_v21 }
 0xe33   : > { %v4430_v26 = vmax.f32 %v4429_v24, 0.0 }
 0xe35   : > { %v4438_v27 = vmul.f32 %v4809_v3, %v4430_v26 }
 0xe37   : > { %v4446_v29 = vadd.f32 %v4810_v40, %v4438_v27 }
 0xe39   : > { %4447 = vst [vmem:[%s895_s3] sm:$0x3] %v4446_v29  ;;  %4448 = vst [vmem:[%s895_s3 - $0x2] sm:$0x30] %v4446_v29 }
 0xe3a   : > { %6957 = shalt.err (!%p6954_p3)
}
 0xe3b   : > { %s6958_s8 = scalar_lea.hbm %s8268_s9, 64  ;;  %s6962_s5 = scalar_lea.hbm %s7196_s4, 128 }
 0xe3c   : > { %p6959_p4 = scmp.ne.s32.totalorder %s8268_s9, %s6958_s8  ;;  %p6963_p9 = scmp.lt.u32.totalorder %s8268_s9, %s7196_s4 }
 0xe3d   : > { %p6964_p10 = scmp.lt.u32.totalorder %s6962_s5, %s6958_s8  ;;  %p6966_p12 = scmp.lt.u32.totalorder %s6958_s8, %s8268_s9 }
 0xe3e   : > { %p6960_p7 = pnand %p6959_p4, %p7236_p5 }
 0xe3f   : > { %p6965_p11 = por %p6964_p10, %p6963_p9 }
 0xe40   : > { %p6961_p8 = pneg %p6960_p7 }
 0xe41   : > { %p6967_p0 = por %p6966_p12, %p6965_p11 }
 0xe43   : > { %p6968_p13 = pnand %p6967_p0, %p6961_p8 }
 0xe45   : > { %6971 = shalt.err (!%p6968_p13)
}
 0xe46   : > { %6871 = dma.vmem_to_hbm [thread:$0]  (%p7236_p5), %s8270_s2, 64, %s8268_s9, %s4450_s12  }
 0xe47 PF: > { %p6877_p1 = scmp.ge.s32.totalorder %s7006_s15, 2  ;;  %s4475_s13 = sand.u32 1, %s6994_s7  }
 0xe48   : > { %s4476_s14 = scalar_lea.sflag [#allocation8], %s4475_s13 }
 0xe49   : > { %p6874_p2 = pnand %p6877_p1, %p7240_p6 }
 0xe4b   : > { %6989 = dma.done.wait (!%p6874_p2), %s4476_s14, 64  }
 0xe4c   : > { %6991 = vsyncadd (!%p6874_p2), %s4476_s14, 4294967232  ;;  %p69_p3 = scmp.ge.s32.totalorder %s7223_s18, 4   ;;  %s8364_s7 = smov %s6998_s10 }
 0xe4d   : > { %s8365_s10 = smov %s7002_s11  ;;  %s8366_s11 = smov %s7234_s26 }
 0xe4e   : > { %s8367_s15 = smov %s7223_s18  ;;  %71 = sbr.rel (!%p69_p3) target bundleno = 61 (0x3d), region = 212 }
 0xe55   :  { %4481 = vsyncpa [#allocation8], 1 }
 0xe56   :  { %4483 = vsyncpa [#allocation8 + $0x1], 1 }

</bundles_post_ra>
